<compile_context>
chip_gen: v5e
topology: v5e:2x2
jax: 0.10.0
libtpu: 0.0.40
codegen_flags: <defaults>
</compile_context>

<pallas_src>
import numpy as np
import jax
import jax.numpy as jnp
from jax.experimental import pallas as pl
from jax.experimental.pallas import tpu as pltpu


# ----------------------------------------------------------------------------
# Fused Pallas kernel: normalize + conv1 + conv2 + flatten + enc_fc + q head
# ----------------------------------------------------------------------------
def _qnet_fused_kernel(x_ref, g1_ref, w1_ref, g2_ref, w2_ref, w3_ref, wq_ref,
                       bconv_ref, bhead_ref, o_ref,
                       sel1_ref, sel2_ref, flat_ref):
    f32, bf16 = jnp.float32, jnp.bfloat16

    n_tap = w1_ref.shape[0]                 # 9
    bc1 = w1_ref.shape[1]                   # B * c1
    bc2 = w2_ref.shape[1]                   # B * c2
    n1 = g1_ref.shape[1] // n_tap           # H1 * W1 (conv1 output pixels)
    n2 = g2_ref.shape[1] // n_tap           # H2 * W2 (conv2 output pixels)
    batch, n_act = o_ref.shape
    c2 = bc2 // batch
    hidden = w3_ref.shape[1]

    bconv = bconv_ref[...]                  # (B*max(c1,c2), 2) f32
    bhead = bhead_ref[...]                  # (2, 128) f32

    # normalize: x/255*2 - 1  ==  x*(2/255) - 1, one VPU FMA over 2 dense vregs;
    # kept as a register-resident value (no VMEM scratch).
    xn = (x_ref[...] * (2.0 / 255.0) - 1.0).astype(bf16)        # (B*C, H*W)

    # ---- conv1: one wide lane-dense selection matmul + 9 tiny weight dots ---
    # gather columns are exact 0/1 with one nonzero per column (zero columns
    # encode the zero padding), so the bf16 round-trip is exact.
    sel1_ref[...] = jnp.dot(xn, g1_ref[...],
                            preferred_element_type=f32).astype(bf16)
    acc1 = jnp.zeros((bc1, n1), f32)
    for t in range(n_tap):
        acc1 = acc1 + jnp.dot(w1_ref[t], sel1_ref[:, t * n1:(t + 1) * n1],
                              preferred_element_type=f32)
    a1 = jnp.maximum(acc1 + bconv[:bc1, 0:1], 0.0).astype(bf16)  # (B*c1, n1)

    # ---- conv2 ---------------------------------------------------------------
    sel2_ref[...] = jnp.dot(a1, g2_ref[...],
                            preferred_element_type=f32).astype(bf16)
    acc2 = jnp.zeros((bc2, n2), f32)
    for t in range(n_tap):
        acc2 = acc2 + jnp.dot(w2_ref[t], sel2_ref[:, t * n2:(t + 1) * n2],
                              preferred_element_type=f32)
    a2 = jnp.maximum(acc2 + bconv[:bc2, 1:2], 0.0)               # (B*c2, n2) f32

    # ---- flatten to PyTorch NCHW .view(B,-1) order (co*n2 + p) --------------
    # 64 tiny aligned stores into a lane-dense (B, c2*n2) VMEM slab; the slab
    # then feeds a single K = c2*n2 enc_fc contraction.
    for b in range(batch):
        for co in range(c2):
            r = b * c2 + co
            flat_ref[b:b + 1, co * n2:(co + 1) * n2] = a2[r:r + 1, :]
    flat = flat_ref[...].astype(bf16)                            # (B, c2*n2)

    # ---- enc_fc (one dot) + ReLU --------------------------------------------
    latent = jnp.maximum(
        jnp.dot(flat, w3_ref[...], preferred_element_type=f32)
        + bhead[0:1, :hidden], 0.0).astype(bf16)                 # (B, hidden)

    # ---- q head --------------------------------------------------------------
    q = jnp.dot(latent, wq_ref[...], preferred_element_type=f32)
    # TODO(synk): the (B, n_actions) store is lane-sparse (6 < 128 lanes) ->
    # one masked vst; not worth padding at this output size.
    o_ref[...] = q + bhead[1:2, :n_act]


# ----------------------------------------------------------------------------
# One-time (init) packing: per-image gather matrices, block-diag weight slabs
# ----------------------------------------------------------------------------
def _out_size(n, k, stride, pad):
    return (n + 2 * pad - k) // stride + 1


def _gather_cat(h_in, w_in, h_out, w_out, k, stride, pad):
    """Per-image 0/1 gather matrix, taps concatenated along the column axis.

    g[q, t*n_out + p] = 1 iff input pixel q feeds output pixel p under tap t;
    all-zero columns encode the zero padding.  Batch rides on the sublane axis
    of the activation, so no batch duplication is needed.
    """
    n_in, n_out = h_in * w_in, h_out * w_out
    g = np.zeros((n_in, k * k * n_out), np.float32)
    for ki in range(k):
        for kj in range(k):
            t = ki * k + kj
            for ho in range(h_out):
                hi = ho * stride + ki - pad
                if not (0 <= hi < h_in):
                    continue
                for wo in range(w_out):
                    wi = wo * stride + kj - pad
                    if not (0 <= wi < w_in):
                        continue
                    g[hi * w_in + wi, t * n_out + ho * w_out + wo] = 1.0
    return g


def build_kernel_inputs(params, obs_shape, batch, n_actions, hidden):
    """Pack weights into the fused kernel's layout (bf16) + gather matrices."""
    C, H, W = obs_shape
    k, stride, pad = 3, 2, 1
    H1, W1 = _out_size(H, k, stride, pad), _out_size(W, k, stride, pad)
    H2, W2 = _out_size(H1, k, stride, pad), _out_size(W1, k, stride, pad)

    w1 = np.asarray(params["conv1_w"], np.float32)   # (c1, C, 3, 3)
    w2 = np.asarray(params["conv2_w"], np.float32)   # (c2, c1, 3, 3)
    c1, c2 = w1.shape[0], w2.shape[0]

    # per-image gather matrices (taps concatenated along columns)
    g1 = _gather_cat(H, W, H1, W1, k, stride, pad)    # (H*W,   9*H1*W1)
    g2 = _gather_cat(H1, W1, H2, W2, k, stride, pad)  # (H1*W1, 9*H2*W2)

    # per-tap weight slabs, block-diagonal over batch (batch rides on sublanes)
    w1bd = np.zeros((k * k, batch * c1, batch * C), np.float32)
    w2bd = np.zeros((k * k, batch * c2, batch * c1), np.float32)
    for t in range(k * k):
        ki, kj = divmod(t, k)
        tap1 = w1[:, :, ki, kj]
        tap2 = w2[:, :, ki, kj]
        for b in range(batch):
            w1bd[t, b * c1:(b + 1) * c1, b * C:(b + 1) * C] = tap1
            w2bd[t, b * c2:(b + 1) * c2, b * c1:(b + 1) * c1] = tap2

    # conv biases as per-(batch, channel) sublane columns
    nb = batch * max(c1, c2)
    bias_conv = np.zeros((nb, 2), np.float32)
    bias_conv[:batch * c1, 0] = np.tile(np.asarray(params["conv1_b"]), batch)
    bias_conv[:batch * c2, 1] = np.tile(np.asarray(params["conv2_b"]), batch)

    assert max(hidden, n_actions) <= 128, "head bias pack assumes <=128 lanes"
    bias_head = np.zeros((2, 128), np.float32)
    bias_head[0, :hidden] = np.asarray(params["enc_fc_b"])
    bias_head[1, :n_actions] = np.asarray(params["q_b"])

    # enc_fc weight's flat index is co*H2*W2 + pos (PyTorch NCHW flatten) and
    # matches the kernel's flatten order directly -> no permutation needed.
    w3 = np.asarray(params["enc_fc_w"], np.float32)   # (c2*H2*W2, hidden)
    wq = np.asarray(params["q_w"], np.float32)        # (hidden, n_actions)

    bf16 = jnp.bfloat16
    return {
        "g1": jnp.asarray(g1, dtype=bf16),
        "w1": jnp.asarray(w1bd, dtype=bf16),
        "g2": jnp.asarray(g2, dtype=bf16),
        "w2": jnp.asarray(w2bd, dtype=bf16),
        "w3": jnp.asarray(w3, dtype=bf16),
        "wq": jnp.asarray(wq, dtype=bf16),
        "bias_conv": jnp.asarray(bias_conv),
        "bias_head": jnp.asarray(bias_head),
    }


# ----------------------------------------------------------------------------
# Forward wrapper (one pallas_call)
# ----------------------------------------------------------------------------
def qnetwork_forward(kernel_inputs, x_nchw):
    """QNetwork forward.  x_nchw: (B, C, H, W) float32 pixels in [0, 255]."""
    B, C, H, W = x_nchw.shape
    ki = kernel_inputs
    n_actions = ki["wq"].shape[1]

    # pure reshape (no transpose): NCHW -> (batch*channel rows, pixel lanes)
    x2d = x_nchw.reshape(B * C, H * W)

    sel1_shape = (B * C, ki["g1"].shape[1])            # (B*C,   9*H1*W1)
    sel2_shape = (ki["w1"].shape[1], ki["g2"].shape[1])  # (B*c1, 9*H2*W2)
    flat_shape = (B, ki["w3"].shape[0])                # (B, c2*H2*W2)

    return pl.pallas_call(
        _qnet_fused_kernel,
        out_shape=jax.ShapeDtypeStruct((B, n_actions), jnp.float32),
        grid=(1,),
        in_specs=[
            pl.BlockSpec(x2d.shape, lambda i: (0, 0)),
            pl.BlockSpec(ki["g1"].shape, lambda i: (0, 0)),
            pl.BlockSpec(ki["w1"].shape, lambda i: (0, 0, 0)),
            pl.BlockSpec(ki["g2"].shape, lambda i: (0, 0)),
            pl.BlockSpec(ki["w2"].shape, lambda i: (0, 0, 0)),
            pl.BlockSpec(ki["w3"].shape, lambda i: (0, 0)),
            pl.BlockSpec(ki["wq"].shape, lambda i: (0, 0)),
            pl.BlockSpec(ki["bias_conv"].shape, lambda i: (0, 0)),
            pl.BlockSpec(ki["bias_head"].shape, lambda i: (0, 0)),
        ],
        out_specs=pl.BlockSpec((B, n_actions), lambda i: (0, 0)),
        scratch_shapes=[
            pltpu.VMEM(sel1_shape, jnp.bfloat16),
            pltpu.VMEM(sel2_shape, jnp.bfloat16),
            pltpu.VMEM(flat_shape, jnp.float32),
        ],
        compiler_params=pltpu.CompilerParams(
            dimension_semantics=("arbitrary",),
            vmem_limit_bytes=16 * 1024 * 1024,
        ),
    )(x2d, ki["g1"], ki["w1"], ki["g2"], ki["w2"], ki["w3"], ki["wq"],
      ki["bias_conv"], ki["bias_head"])


# ----------------------------------------------------------------------------
# Parameter init (synthesized GenEncoder) and a plain-JAX reference
# ----------------------------------------------------------------------------
def init_params(key, obs_shape, n_actions, hidden=32):
    C, H, W = obs_shape
    k = jax.random.split(key, 8)
    s = 0.05
    H1, W1 = _out_size(H, 3, 2, 1), _out_size(W, 3, 2, 1)
    H2, W2 = _out_size(H1, 3, 2, 1), _out_size(W1, 3, 2, 1)
    flat = 32 * H2 * W2
    return {
        "conv1_w": s * jax.random.normal(k[0], (16, C, 3, 3), jnp.float32),
        "conv1_b": s * jax.random.normal(k[1], (16,), jnp.float32),
        "conv2_w": s * jax.random.normal(k[2], (32, 16, 3, 3), jnp.float32),
        "conv2_b": s * jax.random.normal(k[3], (32,), jnp.float32),
        "enc_fc_w": s * jax.random.normal(k[4], (flat, hidden), jnp.float32),
        "enc_fc_b": s * jax.random.normal(k[5], (hidden,), jnp.float32),
        "q_w": s * jax.random.normal(k[6], (hidden, n_actions), jnp.float32),
        "q_b": s * jax.random.normal(k[7], (n_actions,), jnp.float32),
    }


def reference_forward(params, x_nchw):
    hp = jax.lax.Precision.HIGHEST
    x = x_nchw / 255.0 * 2.0 - 1.0
    h = jax.lax.conv_general_dilated(
        x, params["conv1_w"], window_strides=(2, 2), padding=((1, 1), (1, 1)),
        dimension_numbers=("NCHW", "OIHW", "NCHW"), precision=hp)
    h = jax.nn.relu(h + params["conv1_b"][None, :, None, None])
    h = jax.lax.conv_general_dilated(
        h, params["conv2_w"], window_strides=(2, 2), padding=((1, 1), (1, 1)),
        dimension_numbers=("NCHW", "OIHW", "NCHW"), precision=hp)
    h = jax.nn.relu(h + params["conv2_b"][None, :, None, None])
    h = h.reshape(x.shape[0], -1)
    latent = jax.nn.relu(jnp.dot(h, params["enc_fc_w"], precision=hp)
                         + params["enc_fc_b"])
    return jnp.dot(latent, params["q_w"], precision=hp) + params["q_b"]


if __name__ == "__main__":
    key = jax.random.PRNGKey(0)
    k_obs, k_param = jax.random.split(key)

    B, C, H, W = 2, 4, 16, 16
    n_actions = 6
    hidden = 32

    # synthetic observations, pixel-valued in [0, 255]
    x = jax.random.uniform(k_obs, (B, C, H, W), jnp.float32, 0.0, 255.0)

    params = init_params(k_param, (C, H, W), n_actions, hidden=hidden)
    kernel_inputs = build_kernel_inputs(params, (C, H, W), batch=B,
                                        n_actions=n_actions, hidden=hidden)

    fwd = jax.jit(qnetwork_forward)
    q_values = fwd(kernel_inputs, x)
    jax.block_until_ready(q_values)

    assert q_values.shape == (B, n_actions), q_values.shape
    assert q_values.dtype == jnp.float32

    # cross-check against a plain-JAX reference (bf16 MXU operands -> loose tol)
    q_ref = reference_forward(params, x)
    np.testing.assert_allclose(np.asarray(q_values), np.asarray(q_ref),
                               rtol=5e-2, atol=1e-2)

    print("KERNEL_OK")
</pallas_src>

<mosaic_0001>
module attributes {stable_mosaic.version = 11 : i64} {
  func.func @_qnet_fused_kernel(%arg0: i32, %arg1: memref<8x256xf32, #tpu.memory_space<vmem>>, %arg2: memref<256x576xbf16, #tpu.memory_space<vmem>>, %arg3: memref<9x32x8xbf16, #tpu.memory_space<vmem>>, %arg4: memref<64x144xbf16, #tpu.memory_space<vmem>>, %arg5: memref<9x64x32xbf16, #tpu.memory_space<vmem>>, %arg6: memref<512x32xbf16, #tpu.memory_space<vmem>>, %arg7: memref<32x6xbf16, #tpu.memory_space<vmem>>, %arg8: memref<64x2xf32, #tpu.memory_space<vmem>>, %arg9: memref<2x128xf32, #tpu.memory_space<vmem>>, %arg10: memref<2x6xf32, #tpu.memory_space<vmem>>, %arg11: memref<8x576xbf16, #tpu.memory_space<vmem>>, %arg12: memref<32x144xbf16, #tpu.memory_space<vmem>>, %arg13: memref<2x512xf32, #tpu.memory_space<vmem>>) attributes {dimension_semantics = [#tpu.dimension_semantics<arbitrary>], iteration_bounds = array<i64: 1>, scalar_prefetch = 0 : i64, scratch_operands = 3 : i64, tpu.core_type = #tpu.core_type<tc>, window_params = [{pipeline_mode = #tpu.pipeline_mode<synchronous>, transform_indices = @transform_0, window_bounds = array<i64: 8, 256>}, {pipeline_mode = #tpu.pipeline_mode<synchronous>, transform_indices = @transform_1, window_bounds = array<i64: 256, 576>}, {pipeline_mode = #tpu.pipeline_mode<synchronous>, transform_indices = @transform_2, window_bounds = array<i64: 9, 32, 8>}, {pipeline_mode = #tpu.pipeline_mode<synchronous>, transform_indices = @transform_3, window_bounds = array<i64: 64, 144>}, {pipeline_mode = #tpu.pipeline_mode<synchronous>, transform_indices = @transform_4, window_bounds = array<i64: 9, 64, 32>}, {pipeline_mode = #tpu.pipeline_mode<synchronous>, transform_indices = @transform_5, window_bounds = array<i64: 512, 32>}, {pipeline_mode = #tpu.pipeline_mode<synchronous>, transform_indices = @transform_6, window_bounds = array<i64: 32, 6>}, {pipeline_mode = #tpu.pipeline_mode<synchronous>, transform_indices = @transform_7, window_bounds = array<i64: 64, 2>}, {pipeline_mode = #tpu.pipeline_mode<synchronous>, transform_indices = @transform_8, window_bounds = array<i64: 2, 128>}, {pipeline_mode = #tpu.pipeline_mode<synchronous>, transform_indices = @transform_9, window_bounds = array<i64: 2, 6>}]} {
    %c0 = arith.constant 0 : index
    %c0_0 = arith.constant 0 : index
    %0 = vector.load %arg8[%c0, %c0_0] : memref<64x2xf32, #tpu.memory_space<vmem>>, vector<64x2xf32>
    %c0_1 = arith.constant 0 : index
    %c0_2 = arith.constant 0 : index
    %1 = vector.load %arg9[%c0_1, %c0_2] : memref<2x128xf32, #tpu.memory_space<vmem>>, vector<2x128xf32>
    %c0_3 = arith.constant 0 : index
    %c0_4 = arith.constant 0 : index
    %2 = vector.load %arg1[%c0_3, %c0_4] : memref<8x256xf32, #tpu.memory_space<vmem>>, vector<8x256xf32>
    %cst = arith.constant 0.00784313772 : f32
    %3 = vector.broadcast %cst : f32 to vector<8x256xf32>
    %4 = arith.mulf %2, %3 : vector<8x256xf32>
    %cst_5 = arith.constant 1.000000e+00 : f32
    %5 = vector.broadcast %cst_5 : f32 to vector<8x256xf32>
    %6 = arith.subf %4, %5 : vector<8x256xf32>
    %7 = arith.truncf %6 : vector<8x256xf32> to vector<8x256xbf16>
    %c0_6 = arith.constant 0 : index
    %c0_7 = arith.constant 0 : index
    %8 = vector.load %arg2[%c0_6, %c0_7] : memref<256x576xbf16, #tpu.memory_space<vmem>>, vector<256x576xbf16>
    %cst_8 = arith.constant dense<0.000000e+00> : vector<8x576xf32>
    %9 = tpu.matmul %7, %8, %cst_8 {dimension_numbers = #tpu.dot_dimension_numbers<[1], [0], [0], [1], [0, 0, 1, 1], [], []>} : vector<8x256xbf16>, vector<256x576xbf16>, vector<8x576xf32> -> vector<8x576xf32>
    %10 = arith.truncf %9 : vector<8x576xf32> to vector<8x576xbf16>
    %c0_9 = arith.constant 0 : index
    %c0_10 = arith.constant 0 : index
    %11 = vector.load %arg11[%c0_9, %c0_10] : memref<8x576xbf16, #tpu.memory_space<vmem>>, vector<8x576xbf16>
    tpu.vector_store %arg11[%c0_9, %c0_10], %10 {strides = array<i32>} : memref<8x576xbf16, #tpu.memory_space<vmem>>, vector<8x576xbf16>,
    %cst_11 = arith.constant 0.000000e+00 : f32
    %12 = vector.broadcast %cst_11 : f32 to vector<32x64xf32>
    %c0_12 = arith.constant 0 : index
    %c0_13 = arith.constant 0 : index
    %c0_14 = arith.constant 0 : index
    %13 = vector.load %arg3[%c0_12, %c0_13, %c0_14] : memref<9x32x8xbf16, #tpu.memory_space<vmem>>, vector<1x32x8xbf16>
    %14 = vector.shape_cast %13 : vector<1x32x8xbf16> to vector<32x8xbf16>
    %c0_15 = arith.constant 0 : index
    %c0_16 = arith.constant 0 : index
    %15 = vector.load %arg11[%c0_15, %c0_16] : memref<8x576xbf16, #tpu.memory_space<vmem>>, vector<8x64xbf16>
    %cst_17 = arith.constant dense<0.000000e+00> : vector<32x64xf32>
    %16 = tpu.matmul %14, %15, %cst_17 {dimension_numbers = #tpu.dot_dimension_numbers<[1], [0], [0], [1], [0, 0, 1, 1], [], []>} : vector<32x8xbf16>, vector<8x64xbf16>, vector<32x64xf32> -> vector<32x64xf32>
    %17 = arith.addf %12, %16 : vector<32x64xf32>
    %c1 = arith.constant 1 : index
    %c0_18 = arith.constant 0 : index
    %c0_19 = arith.constant 0 : index
    %18 = vector.load %arg3[%c1, %c0_18, %c0_19] : memref<9x32x8xbf16, #tpu.memory_space<vmem>>, vector<1x32x8xbf16>
    %19 = vector.shape_cast %18 : vector<1x32x8xbf16> to vector<32x8xbf16>
    %c0_20 = arith.constant 0 : index
    %c64 = arith.constant 64 : index
    %20 = vector.load %arg11[%c0_20, %c64] : memref<8x576xbf16, #tpu.memory_space<vmem>>, vector<8x64xbf16>
    %cst_21 = arith.constant dense<0.000000e+00> : vector<32x64xf32>
    %21 = tpu.matmul %19, %20, %cst_21 {dimension_numbers = #tpu.dot_dimension_numbers<[1], [0], [0], [1], [0, 0, 1, 1], [], []>} : vector<32x8xbf16>, vector<8x64xbf16>, vector<32x64xf32> -> vector<32x64xf32>
    %22 = arith.addf %17, %21 : vector<32x64xf32>
    %c2 = arith.constant 2 : index
    %c0_22 = arith.constant 0 : index
    %c0_23 = arith.constant 0 : index
    %23 = vector.load %arg3[%c2, %c0_22, %c0_23] : memref<9x32x8xbf16, #tpu.memory_space<vmem>>, vector<1x32x8xbf16>
    %24 = vector.shape_cast %23 : vector<1x32x8xbf16> to vector<32x8xbf16>
    %c0_24 = arith.constant 0 : index
    %c128 = arith.constant 128 : index
    %25 = vector.load %arg11[%c0_24, %c128] : memref<8x576xbf16, #tpu.memory_space<vmem>>, vector<8x64xbf16>
    %cst_25 = arith.constant dense<0.000000e+00> : vector<32x64xf32>
    %26 = tpu.matmul %24, %25, %cst_25 {dimension_numbers = #tpu.dot_dimension_numbers<[1], [0], [0], [1], [0, 0, 1, 1], [], []>} : vector<32x8xbf16>, vector<8x64xbf16>, vector<32x64xf32> -> vector<32x64xf32>
    %27 = arith.addf %22, %26 : vector<32x64xf32>
    %c3 = arith.constant 3 : index
    %c0_26 = arith.constant 0 : index
    %c0_27 = arith.constant 0 : index
    %28 = vector.load %arg3[%c3, %c0_26, %c0_27] : memref<9x32x8xbf16, #tpu.memory_space<vmem>>, vector<1x32x8xbf16>
    %29 = vector.shape_cast %28 : vector<1x32x8xbf16> to vector<32x8xbf16>
    %c0_28 = arith.constant 0 : index
    %c192 = arith.constant 192 : index
    %30 = vector.load %arg11[%c0_28, %c192] : memref<8x576xbf16, #tpu.memory_space<vmem>>, vector<8x64xbf16>
    %cst_29 = arith.constant dense<0.000000e+00> : vector<32x64xf32>
    %31 = tpu.matmul %29, %30, %cst_29 {dimension_numbers = #tpu.dot_dimension_numbers<[1], [0], [0], [1], [0, 0, 1, 1], [], []>} : vector<32x8xbf16>, vector<8x64xbf16>, vector<32x64xf32> -> vector<32x64xf32>
    %32 = arith.addf %27, %31 : vector<32x64xf32>
    %c4 = arith.constant 4 : index
    %c0_30 = arith.constant 0 : index
    %c0_31 = arith.constant 0 : index
    %33 = vector.load %arg3[%c4, %c0_30, %c0_31] : memref<9x32x8xbf16, #tpu.memory_space<vmem>>, vector<1x32x8xbf16>
    %34 = vector.shape_cast %33 : vector<1x32x8xbf16> to vector<32x8xbf16>
    %c0_32 = arith.constant 0 : index
    %c256 = arith.constant 256 : index
    %35 = vector.load %arg11[%c0_32, %c256] : memref<8x576xbf16, #tpu.memory_space<vmem>>, vector<8x64xbf16>
    %cst_33 = arith.constant dense<0.000000e+00> : vector<32x64xf32>
    %36 = tpu.matmul %34, %35, %cst_33 {dimension_numbers = #tpu.dot_dimension_numbers<[1], [0], [0], [1], [0, 0, 1, 1], [], []>} : vector<32x8xbf16>, vector<8x64xbf16>, vector<32x64xf32> -> vector<32x64xf32>
    %37 = arith.addf %32, %36 : vector<32x64xf32>
    %c5 = arith.constant 5 : index
    %c0_34 = arith.constant 0 : index
    %c0_35 = arith.constant 0 : index
    %38 = vector.load %arg3[%c5, %c0_34, %c0_35] : memref<9x32x8xbf16, #tpu.memory_space<vmem>>, vector<1x32x8xbf16>
    %39 = vector.shape_cast %38 : vector<1x32x8xbf16> to vector<32x8xbf16>
    %c0_36 = arith.constant 0 : index
    %c320 = arith.constant 320 : index
    %40 = vector.load %arg11[%c0_36, %c320] : memref<8x576xbf16, #tpu.memory_space<vmem>>, vector<8x64xbf16>
    %cst_37 = arith.constant dense<0.000000e+00> : vector<32x64xf32>
    %41 = tpu.matmul %39, %40, %cst_37 {dimension_numbers = #tpu.dot_dimension_numbers<[1], [0], [0], [1], [0, 0, 1, 1], [], []>} : vector<32x8xbf16>, vector<8x64xbf16>, vector<32x64xf32> -> vector<32x64xf32>
    %42 = arith.addf %37, %41 : vector<32x64xf32>
    %c6 = arith.constant 6 : index
    %c0_38 = arith.constant 0 : index
    %c0_39 = arith.constant 0 : index
    %43 = vector.load %arg3[%c6, %c0_38, %c0_39] : memref<9x32x8xbf16, #tpu.memory_space<vmem>>, vector<1x32x8xbf16>
    %44 = vector.shape_cast %43 : vector<1x32x8xbf16> to vector<32x8xbf16>
    %c0_40 = arith.constant 0 : index
    %c384 = arith.constant 384 : index
    %45 = vector.load %arg11[%c0_40, %c384] : memref<8x576xbf16, #tpu.memory_space<vmem>>, vector<8x64xbf16>
    %cst_41 = arith.constant dense<0.000000e+00> : vector<32x64xf32>
    %46 = tpu.matmul %44, %45, %cst_41 {dimension_numbers = #tpu.dot_dimension_numbers<[1], [0], [0], [1], [0, 0, 1, 1], [], []>} : vector<32x8xbf16>, vector<8x64xbf16>, vector<32x64xf32> -> vector<32x64xf32>
    %47 = arith.addf %42, %46 : vector<32x64xf32>
    %c7 = arith.constant 7 : index
    %c0_42 = arith.constant 0 : index
    %c0_43 = arith.constant 0 : index
    %48 = vector.load %arg3[%c7, %c0_42, %c0_43] : memref<9x32x8xbf16, #tpu.memory_space<vmem>>, vector<1x32x8xbf16>
    %49 = vector.shape_cast %48 : vector<1x32x8xbf16> to vector<32x8xbf16>
    %c0_44 = arith.constant 0 : index
    %c448 = arith.constant 448 : index
    %50 = vector.load %arg11[%c0_44, %c448] : memref<8x576xbf16, #tpu.memory_space<vmem>>, vector<8x64xbf16>
    %cst_45 = arith.constant dense<0.000000e+00> : vector<32x64xf32>
    %51 = tpu.matmul %49, %50, %cst_45 {dimension_numbers = #tpu.dot_dimension_numbers<[1], [0], [0], [1], [0, 0, 1, 1], [], []>} : vector<32x8xbf16>, vector<8x64xbf16>, vector<32x64xf32> -> vector<32x64xf32>
    %52 = arith.addf %47, %51 : vector<32x64xf32>
    %c8 = arith.constant 8 : index
    %c0_46 = arith.constant 0 : index
    %c0_47 = arith.constant 0 : index
    %53 = vector.load %arg3[%c8, %c0_46, %c0_47] : memref<9x32x8xbf16, #tpu.memory_space<vmem>>, vector<1x32x8xbf16>
    %54 = vector.shape_cast %53 : vector<1x32x8xbf16> to vector<32x8xbf16>
    %c0_48 = arith.constant 0 : index
    %c512 = arith.constant 512 : index
    %55 = vector.load %arg11[%c0_48, %c512] : memref<8x576xbf16, #tpu.memory_space<vmem>>, vector<8x64xbf16>
    %cst_49 = arith.constant dense<0.000000e+00> : vector<32x64xf32>
    %56 = tpu.matmul %54, %55, %cst_49 {dimension_numbers = #tpu.dot_dimension_numbers<[1], [0], [0], [1], [0, 0, 1, 1], [], []>} : vector<32x8xbf16>, vector<8x64xbf16>, vector<32x64xf32> -> vector<32x64xf32>
    %57 = arith.addf %52, %56 : vector<32x64xf32>
    %58 = vector.extract_strided_slice %0 {offsets = [0, 0], sizes = [32, 1], strides = [1, 1]} : vector<64x2xf32> to vector<32x1xf32>
    %59 = vector.broadcast %58 : vector<32x1xf32> to vector<32x64xf32>
    %60 = arith.addf %57, %59 : vector<32x64xf32>
    %cst_50 = arith.constant 0.000000e+00 : f32
    %61 = vector.broadcast %cst_50 : f32 to vector<32x64xf32>
    %62 = arith.maximumf %60, %61 : vector<32x64xf32>
    %63 = arith.truncf %62 : vector<32x64xf32> to vector<32x64xbf16>
    %c0_51 = arith.constant 0 : index
    %c0_52 = arith.constant 0 : index
    %64 = vector.load %arg4[%c0_51, %c0_52] : memref<64x144xbf16, #tpu.memory_space<vmem>>, vector<64x144xbf16>
    %cst_53 = arith.constant dense<0.000000e+00> : vector<32x144xf32>
    %65 = tpu.matmul %63, %64, %cst_53 {dimension_numbers = #tpu.dot_dimension_numbers<[1], [0], [0], [1], [0, 0, 1, 1], [], []>} : vector<32x64xbf16>, vector<64x144xbf16>, vector<32x144xf32> -> vector<32x144xf32>
    %66 = arith.truncf %65 : vector<32x144xf32> to vector<32x144xbf16>
    %c0_54 = arith.constant 0 : index
    %c0_55 = arith.constant 0 : index
    %67 = vector.load %arg12[%c0_54, %c0_55] : memref<32x144xbf16, #tpu.memory_space<vmem>>, vector<32x144xbf16>
    tpu.vector_store %arg12[%c0_54, %c0_55], %66 {strides = array<i32>} : memref<32x144xbf16, #tpu.memory_space<vmem>>, vector<32x144xbf16>,
    %cst_56 = arith.constant 0.000000e+00 : f32
    %68 = vector.broadcast %cst_56 : f32 to vector<64x16xf32>
    %c0_57 = arith.constant 0 : index
    %c0_58 = arith.constant 0 : index
    %c0_59 = arith.constant 0 : index
    %69 = vector.load %arg5[%c0_57, %c0_58, %c0_59] : memref<9x64x32xbf16, #tpu.memory_space<vmem>>, vector<1x64x32xbf16>
    %70 = vector.shape_cast %69 : vector<1x64x32xbf16> to vector<64x32xbf16>
    %c0_60 = arith.constant 0 : index
    %c0_61 = arith.constant 0 : index
    %71 = vector.load %arg12[%c0_60, %c0_61] : memref<32x144xbf16, #tpu.memory_space<vmem>>, vector<32x16xbf16>
    %cst_62 = arith.constant dense<0.000000e+00> : vector<64x16xf32>
    %72 = tpu.matmul %70, %71, %cst_62 {dimension_numbers = #tpu.dot_dimension_numbers<[1], [0], [0], [1], [0, 0, 1, 1], [], []>} : vector<64x32xbf16>, vector<32x16xbf16>, vector<64x16xf32> -> vector<64x16xf32>
    %73 = arith.addf %68, %72 : vector<64x16xf32>
    %c1_63 = arith.constant 1 : index
    %c0_64 = arith.constant 0 : index
    %c0_65 = arith.constant 0 : index
    %74 = vector.load %arg5[%c1_63, %c0_64, %c0_65] : memref<9x64x32xbf16, #tpu.memory_space<vmem>>, vector<1x64x32xbf16>
    %75 = vector.shape_cast %74 : vector<1x64x32xbf16> to vector<64x32xbf16>
    %c0_66 = arith.constant 0 : index
    %c16 = arith.constant 16 : index
    %76 = vector.load %arg12[%c0_66, %c16] : memref<32x144xbf16, #tpu.memory_space<vmem>>, vector<32x16xbf16>
    %cst_67 = arith.constant dense<0.000000e+00> : vector<64x16xf32>
    %77 = tpu.matmul %75, %76, %cst_67 {dimension_numbers = #tpu.dot_dimension_numbers<[1], [0], [0], [1], [0, 0, 1, 1], [], []>} : vector<64x32xbf16>, vector<32x16xbf16>, vector<64x16xf32> -> vector<64x16xf32>
    %78 = arith.addf %73, %77 : vector<64x16xf32>
    %c2_68 = arith.constant 2 : index
    %c0_69 = arith.constant 0 : index
    %c0_70 = arith.constant 0 : index
    %79 = vector.load %arg5[%c2_68, %c0_69, %c0_70] : memref<9x64x32xbf16, #tpu.memory_space<vmem>>, vector<1x64x32xbf16>
    %80 = vector.shape_cast %79 : vector<1x64x32xbf16> to vector<64x32xbf16>
    %c0_71 = arith.constant 0 : index
    %c32 = arith.constant 32 : index
    %81 = vector.load %arg12[%c0_71, %c32] : memref<32x144xbf16, #tpu.memory_space<vmem>>, vector<32x16xbf16>
    %cst_72 = arith.constant dense<0.000000e+00> : vector<64x16xf32>
    %82 = tpu.matmul %80, %81, %cst_72 {dimension_numbers = #tpu.dot_dimension_numbers<[1], [0], [0], [1], [0, 0, 1, 1], [], []>} : vector<64x32xbf16>, vector<32x16xbf16>, vector<64x16xf32> -> vector<64x16xf32>
    %83 = arith.addf %78, %82 : vector<64x16xf32>
    %c3_73 = arith.constant 3 : index
    %c0_74 = arith.constant 0 : index
    %c0_75 = arith.constant 0 : index
    %84 = vector.load %arg5[%c3_73, %c0_74, %c0_75] : memref<9x64x32xbf16, #tpu.memory_space<vmem>>, vector<1x64x32xbf16>
    %85 = vector.shape_cast %84 : vector<1x64x32xbf16> to vector<64x32xbf16>
    %c0_76 = arith.constant 0 : index
    %c48 = arith.constant 48 : index
    %86 = vector.load %arg12[%c0_76, %c48] : memref<32x144xbf16, #tpu.memory_space<vmem>>, vector<32x16xbf16>
    %cst_77 = arith.constant dense<0.000000e+00> : vector<64x16xf32>
    %87 = tpu.matmul %85, %86, %cst_77 {dimension_numbers = #tpu.dot_dimension_numbers<[1], [0], [0], [1], [0, 0, 1, 1], [], []>} : vector<64x32xbf16>, vector<32x16xbf16>, vector<64x16xf32> -> vector<64x16xf32>
    %88 = arith.addf %83, %87 : vector<64x16xf32>
    %c4_78 = arith.constant 4 : index
    %c0_79 = arith.constant 0 : index
    %c0_80 = arith.constant 0 : index
    %89 = vector.load %arg5[%c4_78, %c0_79, %c0_80] : memref<9x64x32xbf16, #tpu.memory_space<vmem>>, vector<1x64x32xbf16>
    %90 = vector.shape_cast %89 : vector<1x64x32xbf16> to vector<64x32xbf16>
    %c0_81 = arith.constant 0 : index
    %c64_82 = arith.constant 64 : index
    %91 = vector.load %arg12[%c0_81, %c64_82] : memref<32x144xbf16, #tpu.memory_space<vmem>>, vector<32x16xbf16>
    %cst_83 = arith.constant dense<0.000000e+00> : vector<64x16xf32>
    %92 = tpu.matmul %90, %91, %cst_83 {dimension_numbers = #tpu.dot_dimension_numbers<[1], [0], [0], [1], [0, 0, 1, 1], [], []>} : vector<64x32xbf16>, vector<32x16xbf16>, vector<64x16xf32> -> vector<64x16xf32>
    %93 = arith.addf %88, %92 : vector<64x16xf32>
    %c5_84 = arith.constant 5 : index
    %c0_85 = arith.constant 0 : index
    %c0_86 = arith.constant 0 : index
    %94 = vector.load %arg5[%c5_84, %c0_85, %c0_86] : memref<9x64x32xbf16, #tpu.memory_space<vmem>>, vector<1x64x32xbf16>
    %95 = vector.shape_cast %94 : vector<1x64x32xbf16> to vector<64x32xbf16>
    %c0_87 = arith.constant 0 : index
    %c80 = arith.constant 80 : index
    %96 = vector.load %arg12[%c0_87, %c80] : memref<32x144xbf16, #tpu.memory_space<vmem>>, vector<32x16xbf16>
    %cst_88 = arith.constant dense<0.000000e+00> : vector<64x16xf32>
    %97 = tpu.matmul %95, %96, %cst_88 {dimension_numbers = #tpu.dot_dimension_numbers<[1], [0], [0], [1], [0, 0, 1, 1], [], []>} : vector<64x32xbf16>, vector<32x16xbf16>, vector<64x16xf32> -> vector<64x16xf32>
    %98 = arith.addf %93, %97 : vector<64x16xf32>
    %c6_89 = arith.constant 6 : index
    %c0_90 = arith.constant 0 : index
    %c0_91 = arith.constant 0 : index
    %99 = vector.load %arg5[%c6_89, %c0_90, %c0_91] : memref<9x64x32xbf16, #tpu.memory_space<vmem>>, vector<1x64x32xbf16>
    %100 = vector.shape_cast %99 : vector<1x64x32xbf16> to vector<64x32xbf16>
    %c0_92 = arith.constant 0 : index
    %c96 = arith.constant 96 : index
    %101 = vector.load %arg12[%c0_92, %c96] : memref<32x144xbf16, #tpu.memory_space<vmem>>, vector<32x16xbf16>
    %cst_93 = arith.constant dense<0.000000e+00> : vector<64x16xf32>
    %102 = tpu.matmul %100, %101, %cst_93 {dimension_numbers = #tpu.dot_dimension_numbers<[1], [0], [0], [1], [0, 0, 1, 1], [], []>} : vector<64x32xbf16>, vector<32x16xbf16>, vector<64x16xf32> -> vector<64x16xf32>
    %103 = arith.addf %98, %102 : vector<64x16xf32>
    %c7_94 = arith.constant 7 : index
    %c0_95 = arith.constant 0 : index
    %c0_96 = arith.constant 0 : index
    %104 = vector.load %arg5[%c7_94, %c0_95, %c0_96] : memref<9x64x32xbf16, #tpu.memory_space<vmem>>, vector<1x64x32xbf16>
    %105 = vector.shape_cast %104 : vector<1x64x32xbf16> to vector<64x32xbf16>
    %c0_97 = arith.constant 0 : index
    %c112 = arith.constant 112 : index
    %106 = vector.load %arg12[%c0_97, %c112] : memref<32x144xbf16, #tpu.memory_space<vmem>>, vector<32x16xbf16>
    %cst_98 = arith.constant dense<0.000000e+00> : vector<64x16xf32>
    %107 = tpu.matmul %105, %106, %cst_98 {dimension_numbers = #tpu.dot_dimension_numbers<[1], [0], [0], [1], [0, 0, 1, 1], [], []>} : vector<64x32xbf16>, vector<32x16xbf16>, vector<64x16xf32> -> vector<64x16xf32>
    %108 = arith.addf %103, %107 : vector<64x16xf32>
    %c8_99 = arith.constant 8 : index
    %c0_100 = arith.constant 0 : index
    %c0_101 = arith.constant 0 : index
    %109 = vector.load %arg5[%c8_99, %c0_100, %c0_101] : memref<9x64x32xbf16, #tpu.memory_space<vmem>>, vector<1x64x32xbf16>
    %110 = vector.shape_cast %109 : vector<1x64x32xbf16> to vector<64x32xbf16>
    %c0_102 = arith.constant 0 : index
    %c128_103 = arith.constant 128 : index
    %111 = vector.load %arg12[%c0_102, %c128_103] : memref<32x144xbf16, #tpu.memory_space<vmem>>, vector<32x16xbf16>
    %cst_104 = arith.constant dense<0.000000e+00> : vector<64x16xf32>
    %112 = tpu.matmul %110, %111, %cst_104 {dimension_numbers = #tpu.dot_dimension_numbers<[1], [0], [0], [1], [0, 0, 1, 1], [], []>} : vector<64x32xbf16>, vector<32x16xbf16>, vector<64x16xf32> -> vector<64x16xf32>
    %113 = arith.addf %108, %112 : vector<64x16xf32>
    %114 = vector.extract_strided_slice %0 {offsets = [0, 1], sizes = [64, 1], strides = [1, 1]} : vector<64x2xf32> to vector<64x1xf32>
    %115 = vector.broadcast %114 : vector<64x1xf32> to vector<64x16xf32>
    %116 = arith.addf %113, %115 : vector<64x16xf32>
    %cst_105 = arith.constant 0.000000e+00 : f32
    %117 = vector.broadcast %cst_105 : f32 to vector<64x16xf32>
    %118 = arith.maximumf %116, %117 : vector<64x16xf32>
    %119 = vector.extract_strided_slice %118 {offsets = [0, 0], sizes = [1, 16], strides = [1, 1]} : vector<64x16xf32> to vector<1x16xf32>
    %c0_106 = arith.constant 0 : index
    %c0_107 = arith.constant 0 : index
    %120 = vector.load %arg13[%c0_106, %c0_107] : memref<2x512xf32, #tpu.memory_space<vmem>>, vector<1x16xf32>
    tpu.vector_store %arg13[%c0_106, %c0_107], %119 {strides = array<i32>} : memref<2x512xf32, #tpu.memory_space<vmem>>, vector<1x16xf32>,
    %121 = vector.extract_strided_slice %118 {offsets = [1, 0], sizes = [1, 16], strides = [1, 1]} : vector<64x16xf32> to vector<1x16xf32>
    %c0_108 = arith.constant 0 : index
    %c16_109 = arith.constant 16 : index
    %122 = vector.load %arg13[%c0_108, %c16_109] : memref<2x512xf32, #tpu.memory_space<vmem>>, vector<1x16xf32>
    tpu.vector_store %arg13[%c0_108, %c16_109], %121 {strides = array<i32>} : memref<2x512xf32, #tpu.memory_space<vmem>>, vector<1x16xf32>,
    %123 = vector.extract_strided_slice %118 {offsets = [2, 0], sizes = [1, 16], strides = [1, 1]} : vector<64x16xf32> to vector<1x16xf32>
    %c0_110 = arith.constant 0 : index
    %c32_111 = arith.constant 32 : index
    %124 = vector.load %arg13[%c0_110, %c32_111] : memref<2x512xf32, #tpu.memory_space<vmem>>, vector<1x16xf32>
    tpu.vector_store %arg13[%c0_110, %c32_111], %123 {strides = array<i32>} : memref<2x512xf32, #tpu.memory_space<vmem>>, vector<1x16xf32>,
    %125 = vector.extract_strided_slice %118 {offsets = [3, 0], sizes = [1, 16], strides = [1, 1]} : vector<64x16xf32> to vector<1x16xf32>
    %c0_112 = arith.constant 0 : index
    %c48_113 = arith.constant 48 : index
    %126 = vector.load %arg13[%c0_112, %c48_113] : memref<2x512xf32, #tpu.memory_space<vmem>>, vector<1x16xf32>
    tpu.vector_store %arg13[%c0_112, %c48_113], %125 {strides = array<i32>} : memref<2x512xf32, #tpu.memory_space<vmem>>, vector<1x16xf32>,
    %127 = vector.extract_strided_slice %118 {offsets = [4, 0], sizes = [1, 16], strides = [1, 1]} : vector<64x16xf32> to vector<1x16xf32>
    %c0_114 = arith.constant 0 : index
    %c64_115 = arith.constant 64 : index
    %128 = vector.load %arg13[%c0_114, %c64_115] : memref<2x512xf32, #tpu.memory_space<vmem>>, vector<1x16xf32>
    tpu.vector_store %arg13[%c0_114, %c64_115], %127 {strides = array<i32>} : memref<2x512xf32, #tpu.memory_space<vmem>>, vector<1x16xf32>,
    %129 = vector.extract_strided_slice %118 {offsets = [5, 0], sizes = [1, 16], strides = [1, 1]} : vector<64x16xf32> to vector<1x16xf32>
    %c0_116 = arith.constant 0 : index
    %c80_117 = arith.constant 80 : index
    %130 = vector.load %arg13[%c0_116, %c80_117] : memref<2x512xf32, #tpu.memory_space<vmem>>, vector<1x16xf32>
    tpu.vector_store %arg13[%c0_116, %c80_117], %129 {strides = array<i32>} : memref<2x512xf32, #tpu.memory_space<vmem>>, vector<1x16xf32>,
    %131 = vector.extract_strided_slice %118 {offsets = [6, 0], sizes = [1, 16], strides = [1, 1]} : vector<64x16xf32> to vector<1x16xf32>
    %c0_118 = arith.constant 0 : index
    %c96_119 = arith.constant 96 : index
    %132 = vector.load %arg13[%c0_118, %c96_119] : memref<2x512xf32, #tpu.memory_space<vmem>>, vector<1x16xf32>
    tpu.vector_store %arg13[%c0_118, %c96_119], %131 {strides = array<i32>} : memref<2x512xf32, #tpu.memory_space<vmem>>, vector<1x16xf32>,
    %133 = vector.extract_strided_slice %118 {offsets = [7, 0], sizes = [1, 16], strides = [1, 1]} : vector<64x16xf32> to vector<1x16xf32>
    %c0_120 = arith.constant 0 : index
    %c112_121 = arith.constant 112 : index
    %134 = vector.load %arg13[%c0_120, %c112_121] : memref<2x512xf32, #tpu.memory_space<vmem>>, vector<1x16xf32>
    tpu.vector_store %arg13[%c0_120, %c112_121], %133 {strides = array<i32>} : memref<2x512xf32, #tpu.memory_space<vmem>>, vector<1x16xf32>,
    %135 = vector.extract_strided_slice %118 {offsets = [8, 0], sizes = [1, 16], strides = [1, 1]} : vector<64x16xf32> to vector<1x16xf32>
    %c0_122 = arith.constant 0 : index
    %c128_123 = arith.constant 128 : index
    %136 = vector.load %arg13[%c0_122, %c128_123] : memref<2x512xf32, #tpu.memory_space<vmem>>, vector<1x16xf32>
    tpu.vector_store %arg13[%c0_122, %c128_123], %135 {strides = array<i32>} : memref<2x512xf32, #tpu.memory_space<vmem>>, vector<1x16xf32>,
    %137 = vector.extract_strided_slice %118 {offsets = [9, 0], sizes = [1, 16], strides = [1, 1]} : vector<64x16xf32> to vector<1x16xf32>
    %c0_124 = arith.constant 0 : index
    %c144 = arith.constant 144 : index
    %138 = vector.load %arg13[%c0_124, %c144] : memref<2x512xf32, #tpu.memory_space<vmem>>, vector<1x16xf32>
    tpu.vector_store %arg13[%c0_124, %c144], %137 {strides = array<i32>} : memref<2x512xf32, #tpu.memory_space<vmem>>, vector<1x16xf32>,
    %139 = vector.extract_strided_slice %118 {offsets = [10, 0], sizes = [1, 16], strides = [1, 1]} : vector<64x16xf32> to vector<1x16xf32>
    %c0_125 = arith.constant 0 : index
    %c160 = arith.constant 160 : index
    %140 = vector.load %arg13[%c0_125, %c160] : memref<2x512xf32, #tpu.memory_space<vmem>>, vector<1x16xf32>
    tpu.vector_store %arg13[%c0_125, %c160], %139 {strides = array<i32>} : memref<2x512xf32, #tpu.memory_space<vmem>>, vector<1x16xf32>,
    %141 = vector.extract_strided_slice %118 {offsets = [11, 0], sizes = [1, 16], strides = [1, 1]} : vector<64x16xf32> to vector<1x16xf32>
    %c0_126 = arith.constant 0 : index
    %c176 = arith.constant 176 : index
    %142 = vector.load %arg13[%c0_126, %c176] : memref<2x512xf32, #tpu.memory_space<vmem>>, vector<1x16xf32>
    tpu.vector_store %arg13[%c0_126, %c176], %141 {strides = array<i32>} : memref<2x512xf32, #tpu.memory_space<vmem>>, vector<1x16xf32>,
    %143 = vector.extract_strided_slice %118 {offsets = [12, 0], sizes = [1, 16], strides = [1, 1]} : vector<64x16xf32> to vector<1x16xf32>
    %c0_127 = arith.constant 0 : index
    %c192_128 = arith.constant 192 : index
    %144 = vector.load %arg13[%c0_127, %c192_128] : memref<2x512xf32, #tpu.memory_space<vmem>>, vector<1x16xf32>
    tpu.vector_store %arg13[%c0_127, %c192_128], %143 {strides = array<i32>} : memref<2x512xf32, #tpu.memory_space<vmem>>, vector<1x16xf32>,
    %145 = vector.extract_strided_slice %118 {offsets = [13, 0], sizes = [1, 16], strides = [1, 1]} : vector<64x16xf32> to vector<1x16xf32>
    %c0_129 = arith.constant 0 : index
    %c208 = arith.constant 208 : index
    %146 = vector.load %arg13[%c0_129, %c208] : memref<2x512xf32, #tpu.memory_space<vmem>>, vector<1x16xf32>
    tpu.vector_store %arg13[%c0_129, %c208], %145 {strides = array<i32>} : memref<2x512xf32, #tpu.memory_space<vmem>>, vector<1x16xf32>,
    %147 = vector.extract_strided_slice %118 {offsets = [14, 0], sizes = [1, 16], strides = [1, 1]} : vector<64x16xf32> to vector<1x16xf32>
    %c0_130 = arith.constant 0 : index
    %c224 = arith.constant 224 : index
    %148 = vector.load %arg13[%c0_130, %c224] : memref<2x512xf32, #tpu.memory_space<vmem>>, vector<1x16xf32>
    tpu.vector_store %arg13[%c0_130, %c224], %147 {strides = array<i32>} : memref<2x512xf32, #tpu.memory_space<vmem>>, vector<1x16xf32>,
    %149 = vector.extract_strided_slice %118 {offsets = [15, 0], sizes = [1, 16], strides = [1, 1]} : vector<64x16xf32> to vector<1x16xf32>
    %c0_131 = arith.constant 0 : index
    %c240 = arith.constant 240 : index
    %150 = vector.load %arg13[%c0_131, %c240] : memref<2x512xf32, #tpu.memory_space<vmem>>, vector<1x16xf32>
    tpu.vector_store %arg13[%c0_131, %c240], %149 {strides = array<i32>} : memref<2x512xf32, #tpu.memory_space<vmem>>, vector<1x16xf32>,
    %151 = vector.extract_strided_slice %118 {offsets = [16, 0], sizes = [1, 16], strides = [1, 1]} : vector<64x16xf32> to vector<1x16xf32>
    %c0_132 = arith.constant 0 : index
    %c256_133 = arith.constant 256 : index
    %152 = vector.load %arg13[%c0_132, %c256_133] : memref<2x512xf32, #tpu.memory_space<vmem>>, vector<1x16xf32>
    tpu.vector_store %arg13[%c0_132, %c256_133], %151 {strides = array<i32>} : memref<2x512xf32, #tpu.memory_space<vmem>>, vector<1x16xf32>,
    %153 = vector.extract_strided_slice %118 {offsets = [17, 0], sizes = [1, 16], strides = [1, 1]} : vector<64x16xf32> to vector<1x16xf32>
    %c0_134 = arith.constant 0 : index
    %c272 = arith.constant 272 : index
    %154 = vector.load %arg13[%c0_134, %c272] : memref<2x512xf32, #tpu.memory_space<vmem>>, vector<1x16xf32>
    tpu.vector_store %arg13[%c0_134, %c272], %153 {strides = array<i32>} : memref<2x512xf32, #tpu.memory_space<vmem>>, vector<1x16xf32>,
    %155 = vector.extract_strided_slice %118 {offsets = [18, 0], sizes = [1, 16], strides = [1, 1]} : vector<64x16xf32> to vector<1x16xf32>
    %c0_135 = arith.constant 0 : index
    %c288 = arith.constant 288 : index
    %156 = vector.load %arg13[%c0_135, %c288] : memref<2x512xf32, #tpu.memory_space<vmem>>, vector<1x16xf32>
    tpu.vector_store %arg13[%c0_135, %c288], %155 {strides = array<i32>} : memref<2x512xf32, #tpu.memory_space<vmem>>, vector<1x16xf32>,
    %157 = vector.extract_strided_slice %118 {offsets = [19, 0], sizes = [1, 16], strides = [1, 1]} : vector<64x16xf32> to vector<1x16xf32>
    %c0_136 = arith.constant 0 : index
    %c304 = arith.constant 304 : index
    %158 = vector.load %arg13[%c0_136, %c304] : memref<2x512xf32, #tpu.memory_space<vmem>>, vector<1x16xf32>
    tpu.vector_store %arg13[%c0_136, %c304], %157 {strides = array<i32>} : memref<2x512xf32, #tpu.memory_space<vmem>>, vector<1x16xf32>,
    %159 = vector.extract_strided_slice %118 {offsets = [20, 0], sizes = [1, 16], strides = [1, 1]} : vector<64x16xf32> to vector<1x16xf32>
    %c0_137 = arith.constant 0 : index
    %c320_138 = arith.constant 320 : index
    %160 = vector.load %arg13[%c0_137, %c320_138] : memref<2x512xf32, #tpu.memory_space<vmem>>, vector<1x16xf32>
    tpu.vector_store %arg13[%c0_137, %c320_138], %159 {strides = array<i32>} : memref<2x512xf32, #tpu.memory_space<vmem>>, vector<1x16xf32>,
    %161 = vector.extract_strided_slice %118 {offsets = [21, 0], sizes = [1, 16], strides = [1, 1]} : vector<64x16xf32> to vector<1x16xf32>
    %c0_139 = arith.constant 0 : index
    %c336 = arith.constant 336 : index
    %162 = vector.load %arg13[%c0_139, %c336] : memref<2x512xf32, #tpu.memory_space<vmem>>, vector<1x16xf32>
    tpu.vector_store %arg13[%c0_139, %c336], %161 {strides = array<i32>} : memref<2x512xf32, #tpu.memory_space<vmem>>, vector<1x16xf32>,
    %163 = vector.extract_strided_slice %118 {offsets = [22, 0], sizes = [1, 16], strides = [1, 1]} : vector<64x16xf32> to vector<1x16xf32>
    %c0_140 = arith.constant 0 : index
    %c352 = arith.constant 352 : index
    %164 = vector.load %arg13[%c0_140, %c352] : memref<2x512xf32, #tpu.memory_space<vmem>>, vector<1x16xf32>
    tpu.vector_store %arg13[%c0_140, %c352], %163 {strides = array<i32>} : memref<2x512xf32, #tpu.memory_space<vmem>>, vector<1x16xf32>,
    %165 = vector.extract_strided_slice %118 {offsets = [23, 0], sizes = [1, 16], strides = [1, 1]} : vector<64x16xf32> to vector<1x16xf32>
    %c0_141 = arith.constant 0 : index
    %c368 = arith.constant 368 : index
    %166 = vector.load %arg13[%c0_141, %c368] : memref<2x512xf32, #tpu.memory_space<vmem>>, vector<1x16xf32>
    tpu.vector_store %arg13[%c0_141, %c368], %165 {strides = array<i32>} : memref<2x512xf32, #tpu.memory_space<vmem>>, vector<1x16xf32>,
    %167 = vector.extract_strided_slice %118 {offsets = [24, 0], sizes = [1, 16], strides = [1, 1]} : vector<64x16xf32> to vector<1x16xf32>
    %c0_142 = arith.constant 0 : index
    %c384_143 = arith.constant 384 : index
    %168 = vector.load %arg13[%c0_142, %c384_143] : memref<2x512xf32, #tpu.memory_space<vmem>>, vector<1x16xf32>
    tpu.vector_store %arg13[%c0_142, %c384_143], %167 {strides = array<i32>} : memref<2x512xf32, #tpu.memory_space<vmem>>, vector<1x16xf32>,
    %169 = vector.extract_strided_slice %118 {offsets = [25, 0], sizes = [1, 16], strides = [1, 1]} : vector<64x16xf32> to vector<1x16xf32>
    %c0_144 = arith.constant 0 : index
    %c400 = arith.constant 400 : index
    %170 = vector.load %arg13[%c0_144, %c400] : memref<2x512xf32, #tpu.memory_space<vmem>>, vector<1x16xf32>
    tpu.vector_store %arg13[%c0_144, %c400], %169 {strides = array<i32>} : memref<2x512xf32, #tpu.memory_space<vmem>>, vector<1x16xf32>,
    %171 = vector.extract_strided_slice %118 {offsets = [26, 0], sizes = [1, 16], strides = [1, 1]} : vector<64x16xf32> to vector<1x16xf32>
    %c0_145 = arith.constant 0 : index
    %c416 = arith.constant 416 : index
    %172 = vector.load %arg13[%c0_145, %c416] : memref<2x512xf32, #tpu.memory_space<vmem>>, vector<1x16xf32>
    tpu.vector_store %arg13[%c0_145, %c416], %171 {strides = array<i32>} : memref<2x512xf32, #tpu.memory_space<vmem>>, vector<1x16xf32>,
    %173 = vector.extract_strided_slice %118 {offsets = [27, 0], sizes = [1, 16], strides = [1, 1]} : vector<64x16xf32> to vector<1x16xf32>
    %c0_146 = arith.constant 0 : index
    %c432 = arith.constant 432 : index
    %174 = vector.load %arg13[%c0_146, %c432] : memref<2x512xf32, #tpu.memory_space<vmem>>, vector<1x16xf32>
    tpu.vector_store %arg13[%c0_146, %c432], %173 {strides = array<i32>} : memref<2x512xf32, #tpu.memory_space<vmem>>, vector<1x16xf32>,
    %175 = vector.extract_strided_slice %118 {offsets = [28, 0], sizes = [1, 16], strides = [1, 1]} : vector<64x16xf32> to vector<1x16xf32>
    %c0_147 = arith.constant 0 : index
    %c448_148 = arith.constant 448 : index
    %176 = vector.load %arg13[%c0_147, %c448_148] : memref<2x512xf32, #tpu.memory_space<vmem>>, vector<1x16xf32>
    tpu.vector_store %arg13[%c0_147, %c448_148], %175 {strides = array<i32>} : memref<2x512xf32, #tpu.memory_space<vmem>>, vector<1x16xf32>,
    %177 = vector.extract_strided_slice %118 {offsets = [29, 0], sizes = [1, 16], strides = [1, 1]} : vector<64x16xf32> to vector<1x16xf32>
    %c0_149 = arith.constant 0 : index
    %c464 = arith.constant 464 : index
    %178 = vector.load %arg13[%c0_149, %c464] : memref<2x512xf32, #tpu.memory_space<vmem>>, vector<1x16xf32>
    tpu.vector_store %arg13[%c0_149, %c464], %177 {strides = array<i32>} : memref<2x512xf32, #tpu.memory_space<vmem>>, vector<1x16xf32>,
    %179 = vector.extract_strided_slice %118 {offsets = [30, 0], sizes = [1, 16], strides = [1, 1]} : vector<64x16xf32> to vector<1x16xf32>
    %c0_150 = arith.constant 0 : index
    %c480 = arith.constant 480 : index
    %180 = vector.load %arg13[%c0_150, %c480] : memref<2x512xf32, #tpu.memory_space<vmem>>, vector<1x16xf32>
    tpu.vector_store %arg13[%c0_150, %c480], %179 {strides = array<i32>} : memref<2x512xf32, #tpu.memory_space<vmem>>, vector<1x16xf32>,
    %181 = vector.extract_strided_slice %118 {offsets = [31, 0], sizes = [1, 16], strides = [1, 1]} : vector<64x16xf32> to vector<1x16xf32>
    %c0_151 = arith.constant 0 : index
    %c496 = arith.constant 496 : index
    %182 = vector.load %arg13[%c0_151, %c496] : memref<2x512xf32, #tpu.memory_space<vmem>>, vector<1x16xf32>
    tpu.vector_store %arg13[%c0_151, %c496], %181 {strides = array<i32>} : memref<2x512xf32, #tpu.memory_space<vmem>>, vector<1x16xf32>,
    %183 = vector.extract_strided_slice %118 {offsets = [32, 0], sizes = [1, 16], strides = [1, 1]} : vector<64x16xf32> to vector<1x16xf32>
    %c1_152 = arith.constant 1 : index
    %c0_153 = arith.constant 0 : index
    %184 = vector.load %arg13[%c1_152, %c0_153] : memref<2x512xf32, #tpu.memory_space<vmem>>, vector<1x16xf32>
    tpu.vector_store %arg13[%c1_152, %c0_153], %183 {strides = array<i32>} : memref<2x512xf32, #tpu.memory_space<vmem>>, vector<1x16xf32>,
    %185 = vector.extract_strided_slice %118 {offsets = [33, 0], sizes = [1, 16], strides = [1, 1]} : vector<64x16xf32> to vector<1x16xf32>
    %c1_154 = arith.constant 1 : index
    %c16_155 = arith.constant 16 : index
    %186 = vector.load %arg13[%c1_154, %c16_155] : memref<2x512xf32, #tpu.memory_space<vmem>>, vector<1x16xf32>
    tpu.vector_store %arg13[%c1_154, %c16_155], %185 {strides = array<i32>} : memref<2x512xf32, #tpu.memory_space<vmem>>, vector<1x16xf32>,
    %187 = vector.extract_strided_slice %118 {offsets = [34, 0], sizes = [1, 16], strides = [1, 1]} : vector<64x16xf32> to vector<1x16xf32>
    %c1_156 = arith.constant 1 : index
    %c32_157 = arith.constant 32 : index
    %188 = vector.load %arg13[%c1_156, %c32_157] : memref<2x512xf32, #tpu.memory_space<vmem>>, vector<1x16xf32>
    tpu.vector_store %arg13[%c1_156, %c32_157], %187 {strides = array<i32>} : memref<2x512xf32, #tpu.memory_space<vmem>>, vector<1x16xf32>,
    %189 = vector.extract_strided_slice %118 {offsets = [35, 0], sizes = [1, 16], strides = [1, 1]} : vector<64x16xf32> to vector<1x16xf32>
    %c1_158 = arith.constant 1 : index
    %c48_159 = arith.constant 48 : index
    %190 = vector.load %arg13[%c1_158, %c48_159] : memref<2x512xf32, #tpu.memory_space<vmem>>, vector<1x16xf32>
    tpu.vector_store %arg13[%c1_158, %c48_159], %189 {strides = array<i32>} : memref<2x512xf32, #tpu.memory_space<vmem>>, vector<1x16xf32>,
    %191 = vector.extract_strided_slice %118 {offsets = [36, 0], sizes = [1, 16], strides = [1, 1]} : vector<64x16xf32> to vector<1x16xf32>
    %c1_160 = arith.constant 1 : index
    %c64_161 = arith.constant 64 : index
    %192 = vector.load %arg13[%c1_160, %c64_161] : memref<2x512xf32, #tpu.memory_space<vmem>>, vector<1x16xf32>
    tpu.vector_store %arg13[%c1_160, %c64_161], %191 {strides = array<i32>} : memref<2x512xf32, #tpu.memory_space<vmem>>, vector<1x16xf32>,
    %193 = vector.extract_strided_slice %118 {offsets = [37, 0], sizes = [1, 16], strides = [1, 1]} : vector<64x16xf32> to vector<1x16xf32>
    %c1_162 = arith.constant 1 : index
    %c80_163 = arith.constant 80 : index
    %194 = vector.load %arg13[%c1_162, %c80_163] : memref<2x512xf32, #tpu.memory_space<vmem>>, vector<1x16xf32>
    tpu.vector_store %arg13[%c1_162, %c80_163], %193 {strides = array<i32>} : memref<2x512xf32, #tpu.memory_space<vmem>>, vector<1x16xf32>,
    %195 = vector.extract_strided_slice %118 {offsets = [38, 0], sizes = [1, 16], strides = [1, 1]} : vector<64x16xf32> to vector<1x16xf32>
    %c1_164 = arith.constant 1 : index
    %c96_165 = arith.constant 96 : index
    %196 = vector.load %arg13[%c1_164, %c96_165] : memref<2x512xf32, #tpu.memory_space<vmem>>, vector<1x16xf32>
    tpu.vector_store %arg13[%c1_164, %c96_165], %195 {strides = array<i32>} : memref<2x512xf32, #tpu.memory_space<vmem>>, vector<1x16xf32>,
    %197 = vector.extract_strided_slice %118 {offsets = [39, 0], sizes = [1, 16], strides = [1, 1]} : vector<64x16xf32> to vector<1x16xf32>
    %c1_166 = arith.constant 1 : index
    %c112_167 = arith.constant 112 : index
    %198 = vector.load %arg13[%c1_166, %c112_167] : memref<2x512xf32, #tpu.memory_space<vmem>>, vector<1x16xf32>
    tpu.vector_store %arg13[%c1_166, %c112_167], %197 {strides = array<i32>} : memref<2x512xf32, #tpu.memory_space<vmem>>, vector<1x16xf32>,
    %199 = vector.extract_strided_slice %118 {offsets = [40, 0], sizes = [1, 16], strides = [1, 1]} : vector<64x16xf32> to vector<1x16xf32>
    %c1_168 = arith.constant 1 : index
    %c128_169 = arith.constant 128 : index
    %200 = vector.load %arg13[%c1_168, %c128_169] : memref<2x512xf32, #tpu.memory_space<vmem>>, vector<1x16xf32>
    tpu.vector_store %arg13[%c1_168, %c128_169], %199 {strides = array<i32>} : memref<2x512xf32, #tpu.memory_space<vmem>>, vector<1x16xf32>,
    %201 = vector.extract_strided_slice %118 {offsets = [41, 0], sizes = [1, 16], strides = [1, 1]} : vector<64x16xf32> to vector<1x16xf32>
    %c1_170 = arith.constant 1 : index
    %c144_171 = arith.constant 144 : index
    %202 = vector.load %arg13[%c1_170, %c144_171] : memref<2x512xf32, #tpu.memory_space<vmem>>, vector<1x16xf32>
    tpu.vector_store %arg13[%c1_170, %c144_171], %201 {strides = array<i32>} : memref<2x512xf32, #tpu.memory_space<vmem>>, vector<1x16xf32>,
    %203 = vector.extract_strided_slice %118 {offsets = [42, 0], sizes = [1, 16], strides = [1, 1]} : vector<64x16xf32> to vector<1x16xf32>
    %c1_172 = arith.constant 1 : index
    %c160_173 = arith.constant 160 : index
    %204 = vector.load %arg13[%c1_172, %c160_173] : memref<2x512xf32, #tpu.memory_space<vmem>>, vector<1x16xf32>
    tpu.vector_store %arg13[%c1_172, %c160_173], %203 {strides = array<i32>} : memref<2x512xf32, #tpu.memory_space<vmem>>, vector<1x16xf32>,
    %205 = vector.extract_strided_slice %118 {offsets = [43, 0], sizes = [1, 16], strides = [1, 1]} : vector<64x16xf32> to vector<1x16xf32>
    %c1_174 = arith.constant 1 : index
    %c176_175 = arith.constant 176 : index
    %206 = vector.load %arg13[%c1_174, %c176_175] : memref<2x512xf32, #tpu.memory_space<vmem>>, vector<1x16xf32>
    tpu.vector_store %arg13[%c1_174, %c176_175], %205 {strides = array<i32>} : memref<2x512xf32, #tpu.memory_space<vmem>>, vector<1x16xf32>,
    %207 = vector.extract_strided_slice %118 {offsets = [44, 0], sizes = [1, 16], strides = [1, 1]} : vector<64x16xf32> to vector<1x16xf32>
    %c1_176 = arith.constant 1 : index
    %c192_177 = arith.constant 192 : index
    %208 = vector.load %arg13[%c1_176, %c192_177] : memref<2x512xf32, #tpu.memory_space<vmem>>, vector<1x16xf32>
    tpu.vector_store %arg13[%c1_176, %c192_177], %207 {strides = array<i32>} : memref<2x512xf32, #tpu.memory_space<vmem>>, vector<1x16xf32>,
    %209 = vector.extract_strided_slice %118 {offsets = [45, 0], sizes = [1, 16], strides = [1, 1]} : vector<64x16xf32> to vector<1x16xf32>
    %c1_178 = arith.constant 1 : index
    %c208_179 = arith.constant 208 : index
    %210 = vector.load %arg13[%c1_178, %c208_179] : memref<2x512xf32, #tpu.memory_space<vmem>>, vector<1x16xf32>
    tpu.vector_store %arg13[%c1_178, %c208_179], %209 {strides = array<i32>} : memref<2x512xf32, #tpu.memory_space<vmem>>, vector<1x16xf32>,
    %211 = vector.extract_strided_slice %118 {offsets = [46, 0], sizes = [1, 16], strides = [1, 1]} : vector<64x16xf32> to vector<1x16xf32>
    %c1_180 = arith.constant 1 : index
    %c224_181 = arith.constant 224 : index
    %212 = vector.load %arg13[%c1_180, %c224_181] : memref<2x512xf32, #tpu.memory_space<vmem>>, vector<1x16xf32>
    tpu.vector_store %arg13[%c1_180, %c224_181], %211 {strides = array<i32>} : memref<2x512xf32, #tpu.memory_space<vmem>>, vector<1x16xf32>,
    %213 = vector.extract_strided_slice %118 {offsets = [47, 0], sizes = [1, 16], strides = [1, 1]} : vector<64x16xf32> to vector<1x16xf32>
    %c1_182 = arith.constant 1 : index
    %c240_183 = arith.constant 240 : index
    %214 = vector.load %arg13[%c1_182, %c240_183] : memref<2x512xf32, #tpu.memory_space<vmem>>, vector<1x16xf32>
    tpu.vector_store %arg13[%c1_182, %c240_183], %213 {strides = array<i32>} : memref<2x512xf32, #tpu.memory_space<vmem>>, vector<1x16xf32>,
    %215 = vector.extract_strided_slice %118 {offsets = [48, 0], sizes = [1, 16], strides = [1, 1]} : vector<64x16xf32> to vector<1x16xf32>
    %c1_184 = arith.constant 1 : index
    %c256_185 = arith.constant 256 : index
    %216 = vector.load %arg13[%c1_184, %c256_185] : memref<2x512xf32, #tpu.memory_space<vmem>>, vector<1x16xf32>
    tpu.vector_store %arg13[%c1_184, %c256_185], %215 {strides = array<i32>} : memref<2x512xf32, #tpu.memory_space<vmem>>, vector<1x16xf32>,
    %217 = vector.extract_strided_slice %118 {offsets = [49, 0], sizes = [1, 16], strides = [1, 1]} : vector<64x16xf32> to vector<1x16xf32>
    %c1_186 = arith.constant 1 : index
    %c272_187 = arith.constant 272 : index
    %218 = vector.load %arg13[%c1_186, %c272_187] : memref<2x512xf32, #tpu.memory_space<vmem>>, vector<1x16xf32>
    tpu.vector_store %arg13[%c1_186, %c272_187], %217 {strides = array<i32>} : memref<2x512xf32, #tpu.memory_space<vmem>>, vector<1x16xf32>,
    %219 = vector.extract_strided_slice %118 {offsets = [50, 0], sizes = [1, 16], strides = [1, 1]} : vector<64x16xf32> to vector<1x16xf32>
    %c1_188 = arith.constant 1 : index
    %c288_189 = arith.constant 288 : index
    %220 = vector.load %arg13[%c1_188, %c288_189] : memref<2x512xf32, #tpu.memory_space<vmem>>, vector<1x16xf32>
    tpu.vector_store %arg13[%c1_188, %c288_189], %219 {strides = array<i32>} : memref<2x512xf32, #tpu.memory_space<vmem>>, vector<1x16xf32>,
    %221 = vector.extract_strided_slice %118 {offsets = [51, 0], sizes = [1, 16], strides = [1, 1]} : vector<64x16xf32> to vector<1x16xf32>
    %c1_190 = arith.constant 1 : index
    %c304_191 = arith.constant 304 : index
    %222 = vector.load %arg13[%c1_190, %c304_191] : memref<2x512xf32, #tpu.memory_space<vmem>>, vector<1x16xf32>
    tpu.vector_store %arg13[%c1_190, %c304_191], %221 {strides = array<i32>} : memref<2x512xf32, #tpu.memory_space<vmem>>, vector<1x16xf32>,
    %223 = vector.extract_strided_slice %118 {offsets = [52, 0], sizes = [1, 16], strides = [1, 1]} : vector<64x16xf32> to vector<1x16xf32>
    %c1_192 = arith.constant 1 : index
    %c320_193 = arith.constant 320 : index
    %224 = vector.load %arg13[%c1_192, %c320_193] : memref<2x512xf32, #tpu.memory_space<vmem>>, vector<1x16xf32>
    tpu.vector_store %arg13[%c1_192, %c320_193], %223 {strides = array<i32>} : memref<2x512xf32, #tpu.memory_space<vmem>>, vector<1x16xf32>,
    %225 = vector.extract_strided_slice %118 {offsets = [53, 0], sizes = [1, 16], strides = [1, 1]} : vector<64x16xf32> to vector<1x16xf32>
    %c1_194 = arith.constant 1 : index
    %c336_195 = arith.constant 336 : index
    %226 = vector.load %arg13[%c1_194, %c336_195] : memref<2x512xf32, #tpu.memory_space<vmem>>, vector<1x16xf32>
    tpu.vector_store %arg13[%c1_194, %c336_195], %225 {strides = array<i32>} : memref<2x512xf32, #tpu.memory_space<vmem>>, vector<1x16xf32>,
    %227 = vector.extract_strided_slice %118 {offsets = [54, 0], sizes = [1, 16], strides = [1, 1]} : vector<64x16xf32> to vector<1x16xf32>
    %c1_196 = arith.constant 1 : index
    %c352_197 = arith.constant 352 : index
    %228 = vector.load %arg13[%c1_196, %c352_197] : memref<2x512xf32, #tpu.memory_space<vmem>>, vector<1x16xf32>
    tpu.vector_store %arg13[%c1_196, %c352_197], %227 {strides = array<i32>} : memref<2x512xf32, #tpu.memory_space<vmem>>, vector<1x16xf32>,
    %229 = vector.extract_strided_slice %118 {offsets = [55, 0], sizes = [1, 16], strides = [1, 1]} : vector<64x16xf32> to vector<1x16xf32>
    %c1_198 = arith.constant 1 : index
    %c368_199 = arith.constant 368 : index
    %230 = vector.load %arg13[%c1_198, %c368_199] : memref<2x512xf32, #tpu.memory_space<vmem>>, vector<1x16xf32>
    tpu.vector_store %arg13[%c1_198, %c368_199], %229 {strides = array<i32>} : memref<2x512xf32, #tpu.memory_space<vmem>>, vector<1x16xf32>,
    %231 = vector.extract_strided_slice %118 {offsets = [56, 0], sizes = [1, 16], strides = [1, 1]} : vector<64x16xf32> to vector<1x16xf32>
    %c1_200 = arith.constant 1 : index
    %c384_201 = arith.constant 384 : index
    %232 = vector.load %arg13[%c1_200, %c384_201] : memref<2x512xf32, #tpu.memory_space<vmem>>, vector<1x16xf32>
    tpu.vector_store %arg13[%c1_200, %c384_201], %231 {strides = array<i32>} : memref<2x512xf32, #tpu.memory_space<vmem>>, vector<1x16xf32>,
    %233 = vector.extract_strided_slice %118 {offsets = [57, 0], sizes = [1, 16], strides = [1, 1]} : vector<64x16xf32> to vector<1x16xf32>
    %c1_202 = arith.constant 1 : index
    %c400_203 = arith.constant 400 : index
    %234 = vector.load %arg13[%c1_202, %c400_203] : memref<2x512xf32, #tpu.memory_space<vmem>>, vector<1x16xf32>
    tpu.vector_store %arg13[%c1_202, %c400_203], %233 {strides = array<i32>} : memref<2x512xf32, #tpu.memory_space<vmem>>, vector<1x16xf32>,
    %235 = vector.extract_strided_slice %118 {offsets = [58, 0], sizes = [1, 16], strides = [1, 1]} : vector<64x16xf32> to vector<1x16xf32>
    %c1_204 = arith.constant 1 : index
    %c416_205 = arith.constant 416 : index
    %236 = vector.load %arg13[%c1_204, %c416_205] : memref<2x512xf32, #tpu.memory_space<vmem>>, vector<1x16xf32>
    tpu.vector_store %arg13[%c1_204, %c416_205], %235 {strides = array<i32>} : memref<2x512xf32, #tpu.memory_space<vmem>>, vector<1x16xf32>,
    %237 = vector.extract_strided_slice %118 {offsets = [59, 0], sizes = [1, 16], strides = [1, 1]} : vector<64x16xf32> to vector<1x16xf32>
    %c1_206 = arith.constant 1 : index
    %c432_207 = arith.constant 432 : index
    %238 = vector.load %arg13[%c1_206, %c432_207] : memref<2x512xf32, #tpu.memory_space<vmem>>, vector<1x16xf32>
    tpu.vector_store %arg13[%c1_206, %c432_207], %237 {strides = array<i32>} : memref<2x512xf32, #tpu.memory_space<vmem>>, vector<1x16xf32>,
    %239 = vector.extract_strided_slice %118 {offsets = [60, 0], sizes = [1, 16], strides = [1, 1]} : vector<64x16xf32> to vector<1x16xf32>
    %c1_208 = arith.constant 1 : index
    %c448_209 = arith.constant 448 : index
    %240 = vector.load %arg13[%c1_208, %c448_209] : memref<2x512xf32, #tpu.memory_space<vmem>>, vector<1x16xf32>
    tpu.vector_store %arg13[%c1_208, %c448_209], %239 {strides = array<i32>} : memref<2x512xf32, #tpu.memory_space<vmem>>, vector<1x16xf32>,
    %241 = vector.extract_strided_slice %118 {offsets = [61, 0], sizes = [1, 16], strides = [1, 1]} : vector<64x16xf32> to vector<1x16xf32>
    %c1_210 = arith.constant 1 : index
    %c464_211 = arith.constant 464 : index
    %242 = vector.load %arg13[%c1_210, %c464_211] : memref<2x512xf32, #tpu.memory_space<vmem>>, vector<1x16xf32>
    tpu.vector_store %arg13[%c1_210, %c464_211], %241 {strides = array<i32>} : memref<2x512xf32, #tpu.memory_space<vmem>>, vector<1x16xf32>,
    %243 = vector.extract_strided_slice %118 {offsets = [62, 0], sizes = [1, 16], strides = [1, 1]} : vector<64x16xf32> to vector<1x16xf32>
    %c1_212 = arith.constant 1 : index
    %c480_213 = arith.constant 480 : index
    %244 = vector.load %arg13[%c1_212, %c480_213] : memref<2x512xf32, #tpu.memory_space<vmem>>, vector<1x16xf32>
    tpu.vector_store %arg13[%c1_212, %c480_213], %243 {strides = array<i32>} : memref<2x512xf32, #tpu.memory_space<vmem>>, vector<1x16xf32>,
    %245 = vector.extract_strided_slice %118 {offsets = [63, 0], sizes = [1, 16], strides = [1, 1]} : vector<64x16xf32> to vector<1x16xf32>
    %c1_214 = arith.constant 1 : index
    %c496_215 = arith.constant 496 : index
    %246 = vector.load %arg13[%c1_214, %c496_215] : memref<2x512xf32, #tpu.memory_space<vmem>>, vector<1x16xf32>
    tpu.vector_store %arg13[%c1_214, %c496_215], %245 {strides = array<i32>} : memref<2x512xf32, #tpu.memory_space<vmem>>, vector<1x16xf32>,
    %c0_216 = arith.constant 0 : index
    %c0_217 = arith.constant 0 : index
    %247 = vector.load %arg13[%c0_216, %c0_217] : memref<2x512xf32, #tpu.memory_space<vmem>>, vector<2x512xf32>
    %248 = arith.truncf %247 : vector<2x512xf32> to vector<2x512xbf16>
    %c0_218 = arith.constant 0 : index
    %c0_219 = arith.constant 0 : index
    %249 = vector.load %arg6[%c0_218, %c0_219] : memref<512x32xbf16, #tpu.memory_space<vmem>>, vector<512x32xbf16>
    %cst_220 = arith.constant dense<0.000000e+00> : vector<2x32xf32>
    %250 = tpu.matmul %248, %249, %cst_220 {dimension_numbers = #tpu.dot_dimension_numbers<[1], [0], [0], [1], [0, 0, 1, 1], [], []>} : vector<2x512xbf16>, vector<512x32xbf16>, vector<2x32xf32> -> vector<2x32xf32>
    %251 = vector.extract_strided_slice %1 {offsets = [0, 0], sizes = [1, 32], strides = [1, 1]} : vector<2x128xf32> to vector<1x32xf32>
    %252 = vector.broadcast %251 : vector<1x32xf32> to vector<2x32xf32>
    %253 = arith.addf %250, %252 : vector<2x32xf32>
    %cst_221 = arith.constant 0.000000e+00 : f32
    %254 = vector.broadcast %cst_221 : f32 to vector<2x32xf32>
    %255 = arith.maximumf %253, %254 : vector<2x32xf32>
    %256 = arith.truncf %255 : vector<2x32xf32> to vector<2x32xbf16>
    %c0_222 = arith.constant 0 : index
    %c0_223 = arith.constant 0 : index
    %257 = vector.load %arg7[%c0_222, %c0_223] : memref<32x6xbf16, #tpu.memory_space<vmem>>, vector<32x6xbf16>
    %cst_224 = arith.constant dense<0.000000e+00> : vector<2x6xf32>
    %258 = tpu.matmul %256, %257, %cst_224 {dimension_numbers = #tpu.dot_dimension_numbers<[1], [0], [0], [1], [0, 0, 1, 1], [], []>} : vector<2x32xbf16>, vector<32x6xbf16>, vector<2x6xf32> -> vector<2x6xf32>
    %259 = vector.extract_strided_slice %1 {offsets = [1, 0], sizes = [1, 6], strides = [1, 1]} : vector<2x128xf32> to vector<1x6xf32>
    %260 = vector.broadcast %259 : vector<1x6xf32> to vector<2x6xf32>
    %261 = arith.addf %258, %260 : vector<2x6xf32>
    %c0_225 = arith.constant 0 : index
    %c0_226 = arith.constant 0 : index
    %262 = vector.load %arg10[%c0_225, %c0_226] : memref<2x6xf32, #tpu.memory_space<vmem>>, vector<2x6xf32>
    tpu.vector_store %arg10[%c0_225, %c0_226], %261 {strides = array<i32>} : memref<2x6xf32, #tpu.memory_space<vmem>>, vector<2x6xf32>,
    return
  }
  func.func @transform_0(%arg0: i32) -> (i32, i32) {
    %c0_i32 = arith.constant 0 : i32
    %c0_i32_0 = arith.constant 0 : i32
    %c0_i32_1 = arith.constant 0 : i32
    return %c0_i32, %c0_i32_0 : i32, i32
  }
  func.func @transform_1(%arg0: i32) -> (i32, i32) {
    %c0_i32 = arith.constant 0 : i32
    %c0_i32_0 = arith.constant 0 : i32
    %c0_i32_1 = arith.constant 0 : i32
    return %c0_i32, %c0_i32_0 : i32, i32
  }
  func.func @transform_2(%arg0: i32) -> (i32, i32, i32) {
    %c0_i32 = arith.constant 0 : i32
    %c0_i32_0 = arith.constant 0 : i32
    %c0_i32_1 = arith.constant 0 : i32
    %c0_i32_2 = arith.constant 0 : i32
    return %c0_i32, %c0_i32_0, %c0_i32_1 : i32, i32, i32
  }
  func.func @transform_3(%arg0: i32) -> (i32, i32) {
    %c0_i32 = arith.constant 0 : i32
    %c0_i32_0 = arith.constant 0 : i32
    %c0_i32_1 = arith.constant 0 : i32
    return %c0_i32, %c0_i32_0 : i32, i32
  }
  func.func @transform_4(%arg0: i32) -> (i32, i32, i32) {
    %c0_i32 = arith.constant 0 : i32
    %c0_i32_0 = arith.constant 0 : i32
    %c0_i32_1 = arith.constant 0 : i32
    %c0_i32_2 = arith.constant 0 : i32
    return %c0_i32, %c0_i32_0, %c0_i32_1 : i32, i32, i32
  }
  func.func @transform_5(%arg0: i32) -> (i32, i32) {
    %c0_i32 = arith.constant 0 : i32
    %c0_i32_0 = arith.constant 0 : i32
    %c0_i32_1 = arith.constant 0 : i32
    return %c0_i32, %c0_i32_0 : i32, i32
  }
  func.func @transform_6(%arg0: i32) -> (i32, i32) {
    %c0_i32 = arith.constant 0 : i32
    %c0_i32_0 = arith.constant 0 : i32
    %c0_i32_1 = arith.constant 0 : i32
    return %c0_i32, %c0_i32_0 : i32, i32
  }
  func.func @transform_7(%arg0: i32) -> (i32, i32) {
    %c0_i32 = arith.constant 0 : i32
    %c0_i32_0 = arith.constant 0 : i32
    %c0_i32_1 = arith.constant 0 : i32
    return %c0_i32, %c0_i32_0 : i32, i32
  }
  func.func @transform_8(%arg0: i32) -> (i32, i32) {
    %c0_i32 = arith.constant 0 : i32
    %c0_i32_0 = arith.constant 0 : i32
    %c0_i32_1 = arith.constant 0 : i32
    return %c0_i32, %c0_i32_0 : i32, i32
  }
  func.func @transform_9(%arg0: i32) -> (i32, i32) {
    %c0_i32 = arith.constant 0 : i32
    %c0_i32_0 = arith.constant 0 : i32
    %c0_i32_1 = arith.constant 0 : i32
    return %c0_i32, %c0_i32_0 : i32, i32
  }
}

</mosaic_0001>

<bundles_post_ra>
// kernel: qnetwork_forward.1
= control target key start
LH: loop header
LB: loop body
LE: loop exit
PB: predicated region body
PF: predicated region fallthrough
CT: control target
= control target key end

     0   :  { %s5358_s0 = inlined_call_operand.vmem [shape: f32[8,256], index: 0, kind: input, shape index: {}]   ;;  %s5359_s1 = inlined_call_operand.vmem [shape: bf16[256,576], index: 1, kind: input, shape index: {}]   ;;  %s5360_s2 = inlined_call_operand.vmem [shape: bf16[9,32,8], index: 2, kind: input, shape index: {}]   ;;  %s5361_s3 = inlined_call_operand.vmem [shape: bf16[64,144], index: 3, kind: input, shape index: {}]   ;;  %s5362_s4 = inlined_call_operand.vmem [shape: bf16[9,64,32], index: 4, kind: input, shape index: {}]   ;;  %s5363_s5 = inlined_call_operand.vmem [shape: bf16[512,32], index: 5, kind: input, shape index: {}]   ;;  %s5364_s6 = inlined_call_operand.vmem [shape: bf16[32,6], index: 6, kind: input, shape index: {}]   ;;  %s5365_s7 = inlined_call_operand.vmem [shape: f32[64,2], index: 7, kind: input, shape index: {}]   ;;  %s5366_s8 = inlined_call_operand.vmem [shape: f32[2,128], index: 8, kind: input, shape index: {}]   ;;  %s5367_s9 = inlined_call_operand.hbm [shape: f32[2,6], index: 9, kind: output, shape index: {}]  }
   0x1   :  { %v3063_v0 = vld [vmem:[%s5359_s1 + $0x118] sm:$0xf]  ;;  %v3865_v1 = vld [vmem:[%s5359_s1 + $0x128] sm:$0xf0]  ;;  %v3863_v5 = vld [vmem:[%s5359_s1 + $0x11c] sm:$0xf] }
   0x2   :  { %v3223_v2 = vld [vmem:[%s5359_s1 + $0x258] sm:$0xf]  ;;  %v3064_v3 = vor.u32 %v3865_v1, %v3063_v0  ;;  %v3905_v4 = vld [vmem:[%s5359_s1 + $0x268] sm:$0xf0]  ;;  %v3065_v6 = vld [vmem:[%s5359_s1 + $0x12c] sm:$0xf0] }
   0x3   :  { %v3224_v7 = vor.u32 %v3905_v4, %v3223_v2  ;;  %v3068_v8 = vor.u32 %v3863_v5, %v3065_v6  ;;  %v3903_v9 = vld [vmem:[%s5359_s1 + $0x25c] sm:$0xf]  ;;  %v3225_v10 = vld [vmem:[%s5359_s1 + $0x26c] sm:$0xf0]  ;;  %v3860_v13 = vld [vmem:[%s5359_s1 + $0x100] sm:$0xf0] }
   0x4   :  { %v3043_v11 = vld [vmem:[%s5359_s1 + $0xf0] sm:$0xf]  ;;  %563 = vmatpush.bf16.msra.mxu0 %v3064_v3  ;;  %v3228_v12 = vor.u32 %v3903_v9, %v3225_v10  ;;  %v3900_v15 = vld [vmem:[%s5359_s1 + $0x240] sm:$0xf0]  ;;  %v3858_v18 = vld [vmem:[%s5359_s1 + $0xf4] sm:$0xf] }
   0x5   :  { %v3203_v14 = vld [vmem:[%s5359_s1 + $0x230] sm:$0xf]  ;;  %576 = vmatpush.bf16.msra.mxu1 %v3224_v7  ;;  %589 = vmatpush.bf16.msra.mxu2 %v3068_v8  ;;  %v3044_v16 = vor.u32 %v3860_v13, %v3043_v11  ;;  %v3045_v19 = vld [vmem:[%s5359_s1 + $0x104] sm:$0xf0]  ;;  %v3898_v20 = vld [vmem:[%s5359_s1 + $0x234] sm:$0xf] }
   0x6   :  { %v3204_v17 = vor.u32 %v3900_v15, %v3203_v14  ;;  %602 = vmatpush.bf16.msra.mxu3 %v3228_v12  ;;  %v3048_v21 = vor.u32 %v3858_v18, %v3045_v19  ;;  %v3205_v22 = vld [vmem:[%s5359_s1 + $0x244] sm:$0xf0]  ;;  %v3855_v24 = vld [vmem:[%s5359_s1 + $0xd8] sm:$0xf0]  ;;  %v3853_v28 = vld [vmem:[%s5359_s1 + $0xcc] sm:$0xf] }
   0x7   :  { %v3023_v23 = vld [vmem:[%s5359_s1 + $0xc8] sm:$0xf]  ;;  %v3208_v25 = vor.u32 %v3898_v20, %v3205_v22  ;;  %v3895_v27 = vld [vmem:[%s5359_s1 + $0x218] sm:$0xf0]  ;;  %v3025_v30 = vld [vmem:[%s5359_s1 + $0xdc] sm:$0xf0] }
   0x8   :  { %v3183_v26 = vld [vmem:[%s5359_s1 + $0x208] sm:$0xf]  ;;  %564 = vmatpush.bf16.msra.mxu0 %v3044_v16  ;;  %v3024_v29 = vor.u32 %v3855_v24, %v3023_v23  ;;  %v3893_v31 = vld [vmem:[%s5359_s1 + $0x20c] sm:$0xf]  ;;  %v3185_v32 = vld [vmem:[%s5359_s1 + $0x21c] sm:$0xf0]  ;;  %v3028_v34 = vor.u32 %v3853_v28, %v3025_v30 }
   0x9   :  { %577 = vmatpush.bf16.msra.mxu1 %v3204_v17  ;;  %590 = vmatpush.bf16.msra.mxu2 %v3048_v21  ;;  %v3184_v33 = vor.u32 %v3895_v27, %v3183_v26  ;;  %v3003_v35 = vld [vmem:[%s5359_s1 + $0xa0] sm:$0xf]  ;;  %v3850_v36 = vld [vmem:[%s5359_s1 + $0xb0] sm:$0xf0]  ;;  %v3188_v38 = vor.u32 %v3893_v31, %v3185_v32  ;;  %v3848_v40 = vld [vmem:[%s5359_s1 + $0xa4] sm:$0xf] }
   0xa   :  { %v3163_v37 = vld [vmem:[%s5359_s1 + $0x1e0] sm:$0xf]  ;;  %603 = vmatpush.bf16.msra.mxu3 %v3208_v25  ;;  %v3890_v39 = vld [vmem:[%s5359_s1 + $0x1f0] sm:$0xf0]  ;;  %v3005_v41 = vld [vmem:[%s5359_s1 + $0xb4] sm:$0xf0]  ;;  %v3004_v44 = vor.u32 %v3850_v36, %v3003_v35 }
   0xb   :  { %v3888_v42 = vld [vmem:[%s5359_s1 + $0x1e4] sm:$0xf]  ;;  %v3165_v43 = vld [vmem:[%s5359_s1 + $0x1f4] sm:$0xf0]  ;;  %v3164_v45 = vor.u32 %v3890_v39, %v3163_v37  ;;  %v3008_v46 = vor.u32 %v3848_v40, %v3005_v41  ;;  %v3845_v48 = vld [vmem:[%s5359_s1 + $0x88] sm:$0xf0] }
   0xc   :  { %565 = vmatpush.bf16.msra.mxu0 %v3024_v29  ;;  %v2983_v47 = vld [vmem:[%s5359_s1 + $0x78] sm:$0xf]  ;;  %v3168_v50 = vor.u32 %v3888_v42, %v3165_v43  ;;  %v3885_v51 = vld [vmem:[%s5359_s1 + $0x1c8] sm:$0xf0]  ;;  %v3843_v52 = vld [vmem:[%s5359_s1 + $0x7c] sm:$0xf] }
   0xd   :  { %578 = vmatpush.bf16.msra.mxu1 %v3184_v33  ;;  %591 = vmatpush.bf16.msra.mxu2 %v3028_v34  ;;  %v3143_v49 = vld [vmem:[%s5359_s1 + $0x1b8] sm:$0xf]  ;;  %v2985_v53 = vld [vmem:[%s5359_s1 + $0x8c] sm:$0xf0]  ;;  %v3883_v54 = vld [vmem:[%s5359_s1 + $0x1bc] sm:$0xf]  ;;  %v2984_v56 = vor.u32 %v3845_v48, %v2983_v47 }
   0xe   :  { %604 = vmatpush.bf16.msra.mxu3 %v3188_v38  ;;  %v3145_v55 = vld [vmem:[%s5359_s1 + $0x1cc] sm:$0xf0]  ;;  %v3144_v57 = vor.u32 %v3885_v51, %v3143_v49  ;;  %v2988_v58 = vor.u32 %v3843_v52, %v2985_v53  ;;  %v3840_v60 = vld [vmem:[%s5359_s1 + $0x60] sm:$0xf0]  ;;  %v3838_v0 = vld [vmem:[%s5359_s1 + $0x54] sm:$0xf] }
   0xf   :  { %v2963_v59 = vld [vmem:[%s5359_s1 + $0x50] sm:$0xf]  ;;  %v3148_v62 = vor.u32 %v3883_v54, %v3145_v55  ;;  %v3880_v63 = vld [vmem:[%s5359_s1 + $0x1a0] sm:$0xf0]  ;;  %v2965_v1 = vld [vmem:[%s5359_s1 + $0x64] sm:$0xf0] }
  0x10   :  { %566 = vmatpush.bf16.msra.mxu0 %v3004_v44  ;;  %v3123_v61 = vld [vmem:[%s5359_s1 + $0x190] sm:$0xf]  ;;  %v3878_v2 = vld [vmem:[%s5359_s1 + $0x194] sm:$0xf]  ;;  %v3125_v3 = vld [vmem:[%s5359_s1 + $0x1a4] sm:$0xf0]  ;;  %v2964_v4 = vor.u32 %v3840_v60, %v2963_v59  ;;  %v2968_v8 = vor.u32 %v3838_v0, %v2965_v1 }
  0x11   :  { %579 = vmatpush.bf16.msra.mxu1 %v3164_v45  ;;  %592 = vmatpush.bf16.msra.mxu2 %v3008_v46  ;;  %v2943_v5 = vld [vmem:[%s5359_s1 + $0x28] sm:$0xf]  ;;  %v3835_v6 = vld [vmem:[%s5359_s1 + $0x38] sm:$0xf0]  ;;  %v3124_v7 = vor.u32 %v3880_v63, %v3123_v61  ;;  %v3833_v11 = vld [vmem:[%s5359_s1 + $0x2c] sm:$0xf]  ;;  %v3128_v12 = vor.u32 %v3878_v2, %v3125_v3 }
  0x12   :  { %605 = vmatpush.bf16.msra.mxu3 %v3168_v50  ;;  %v3103_v9 = vld [vmem:[%s5359_s1 + $0x168] sm:$0xf]  ;;  %v3875_v10 = vld [vmem:[%s5359_s1 + $0x178] sm:$0xf0]  ;;  %v2945_v13 = vld [vmem:[%s5359_s1 + $0x3c] sm:$0xf0]  ;;  %v2944_v19 = vor.u32 %v3835_v6, %v2943_v5 }
  0x13   :  { %v43_v14 = vld [vmem:[%s5358_s0] sm:$0xff]  ;;  %v44_v15 = vld [vmem:[%s5358_s0 + $0x8] sm:$0xff]  ;;  %v3830_v21 = vld [vmem:[%s5359_s1 + $0x10] sm:$0xf0]  ;;  %v3104_v23 = vor.u32 %v3875_v10, %v3103_v9  ;;  %v2948_v24 = vor.u32 %v3833_v11, %v2945_v13 }
  0x14   :  { %567 = vmatpush.bf16.msra.mxu0 %v2984_v56  ;;  %v3873_v16 = vld [vmem:[%s5359_s1 + $0x16c] sm:$0xf]  ;;  %v3105_v17 = vld [vmem:[%s5359_s1 + $0x17c] sm:$0xf0]  ;;  %v45_v18 = vmul.f32 0.007843138, %v43_v14 }
  0x15   :  { %580 = vmatpush.bf16.msra.mxu1 %v3144_v57  ;;  %593 = vmatpush.bf16.msra.mxu2 %v2988_v58  ;;  %v2923_v20 = vld [vmem:[%s5359_s1] sm:$0xf]  ;;  %v46_v22 = vmul.f32 0.007843138, %v44_v15  ;;  %v3870_v26 = vld [vmem:[%s5359_s1 + $0x150] sm:$0xf0]  ;;  %v3108_v28 = vor.u32 %v3873_v16, %v3105_v17 }
  0x16   :  { %606 = vmatpush.bf16.msra.mxu3 %v3148_v62  ;;  %v3083_v25 = vld [vmem:[%s5359_s1 + $0x140] sm:$0xf]  ;;  %v3828_v27 = vld [vmem:[%s5359_s1 + $0x4] sm:$0xf]  ;;  %v2925_v29 = vld [vmem:[%s5359_s1 + $0x14] sm:$0xf0]  ;;  %v2924_v35 = vor.u32 %v3830_v21, %v2923_v20 }
  0x17   :  { %v3868_v30 = vld [vmem:[%s5359_s1 + $0x144] sm:$0xf]  ;;  %v3085_v31 = vld [vmem:[%s5359_s1 + $0x154] sm:$0xf0]  ;;  %v2919_v32 = vadd.f32 -1.0, %v45_v18  ;;  %v2920_v36 = vadd.f32 -1.0, %v46_v22  ;;  %v3084_v39 = vor.u32 %v3870_v26, %v3083_v25  ;;  %v2928_v40 = vor.u32 %v3828_v27, %v2925_v29 }
  0x18   :  { %568 = vmatpush.bf16.msra.mxu0 %v2964_v4  ;;  %v3864_v33 = vld [vmem:[%s5359_s1 + $0x124] sm:$0xf]  ;;  %v3073_v34 = vld [vmem:[%s5359_s1 + $0x134] sm:$0xf0]  ;;  %v3088_v41 = vor.u32 %v3868_v30, %v3085_v31  ;;  %v3859_v43 = vld [vmem:[%s5359_s1 + $0xfc] sm:$0xf] }
  0x19   :  { %581 = vmatpush.bf16.msra.mxu1 %v3124_v7  ;;  %594 = vmatpush.bf16.msra.mxu2 %v2968_v8  ;;  %v3904_v37 = vld [vmem:[%s5359_s1 + $0x264] sm:$0xf]  ;;  %v3233_v38 = vld [vmem:[%s5359_s1 + $0x274] sm:$0xf0]  ;;  %v3076_v42 = vor.u32 %v3864_v33, %v3073_v34  ;;  %v3071_v44 = vld [vmem:[%s5359_s1 + $0x120] sm:$0xf]  ;;  %v4330_v46 = vpack.c.bf16 %v2919_v32, %v2919_v32  ;;  %v4341_v51 = vpack.c.bf16 %v2920_v36, %v2920_v36 }
  0x1a   :  { %607 = vmatpush.bf16.msra.mxu3 %v3128_v12  ;;  %v3866_v45 = vld [vmem:[%s5359_s1 + $0x130] sm:$0xf0]  ;;  %v3236_v47 = vor.u32 %v3904_v37, %v3233_v38  ;;  %v3053_v48 = vld [vmem:[%s5359_s1 + $0x10c] sm:$0xf0]  ;;  %v3231_v49 = vld [vmem:[%s5359_s1 + $0x260] sm:$0xf] }
  0x1b   :  { %v3906_v50 = vld [vmem:[%s5359_s1 + $0x270] sm:$0xf0]  ;;  %v3899_v52 = vld [vmem:[%s5359_s1 + $0x23c] sm:$0xf]  ;;  %v3213_v53 = vld [vmem:[%s5359_s1 + $0x24c] sm:$0xf0]  ;;  %v3072_v54 = vor.u32 %v3866_v45, %v3071_v44  ;;  %v3056_v55 = vor.u32 %v3859_v43, %v3053_v48 }
  0x1c   :  { %569 = vmatpush.bf16.msra.mxu0 %v2944_v19  ;;  %v3232_v56 = vor.u32 %v3906_v50, %v3231_v49  ;;  %v3854_v57 = vld [vmem:[%s5359_s1 + $0xd4] sm:$0xf]  ;;  %v3051_v58 = vld [vmem:[%s5359_s1 + $0xf8] sm:$0xf]  ;;  %v3861_v59 = vld [vmem:[%s5359_s1 + $0x108] sm:$0xf0]  ;;  %v3216_v60 = vor.u32 %v3899_v52, %v3213_v53 }
  0x1d   :  { %582 = vmatpush.bf16.msra.mxu1 %v3104_v23  ;;  %595 = vmatpush.bf16.msra.mxu2 %v2948_v24  ;;  %v3033_v61 = vld [vmem:[%s5359_s1 + $0xe4] sm:$0xf0]  ;;  %v3211_v62 = vld [vmem:[%s5359_s1 + $0x238] sm:$0xf]  ;;  %v3901_v63 = vld [vmem:[%s5359_s1 + $0x248] sm:$0xf0]  ;;  %v3052_v2 = vor.u32 %v3861_v59, %v3051_v58 }
  0x1e   :  { %608 = vmatpush.bf16.msra.mxu3 %v3108_v28  ;;  %v3894_v0 = vld [vmem:[%s5359_s1 + $0x214] sm:$0xf]  ;;  %v3193_v1 = vld [vmem:[%s5359_s1 + $0x224] sm:$0xf0]  ;;  %v3036_v3 = vor.u32 %v3854_v57, %v3033_v61  ;;  %v3212_v4 = vor.u32 %v3901_v63, %v3211_v62  ;;  %v3849_v5 = vld [vmem:[%s5359_s1 + $0xac] sm:$0xf] }
  0x1f   :  { %v3031_v6 = vld [vmem:[%s5359_s1 + $0xd0] sm:$0xf]  ;;  %v3856_v7 = vld [vmem:[%s5359_s1 + $0xe0] sm:$0xf0]  ;;  %v3196_v8 = vor.u32 %v3894_v0, %v3193_v1  ;;  %v3013_v9 = vld [vmem:[%s5359_s1 + $0xbc] sm:$0xf0] }
  0x20   :  { %570 = vmatpush.bf16.msra.mxu0 %v2924_v35  ;;  %v3191_v10 = vld [vmem:[%s5359_s1 + $0x210] sm:$0xf]  ;;  %v3896_v11 = vld [vmem:[%s5359_s1 + $0x220] sm:$0xf0]  ;;  %v3889_v12 = vld [vmem:[%s5359_s1 + $0x1ec] sm:$0xf]  ;;  %v3032_v14 = vor.u32 %v3856_v7, %v3031_v6  ;;  %v3016_v15 = vor.u32 %v3849_v5, %v3013_v9 }
  0x21   :  { %583 = vmatpush.bf16.msra.mxu1 %v3084_v39  ;;  %596 = vmatpush.bf16.msra.mxu2 %v2928_v40  ;;  %v3173_v13 = vld [vmem:[%s5359_s1 + $0x1fc] sm:$0xf0]  ;;  %v3192_v16 = vor.u32 %v3896_v11, %v3191_v10  ;;  %v3844_v17 = vld [vmem:[%s5359_s1 + $0x84] sm:$0xf]  ;;  %v3011_v18 = vld [vmem:[%s5359_s1 + $0xa8] sm:$0xf] }
  0x22   :  { %609 = vmatpush.bf16.msra.mxu3 %v3088_v41  ;;  %v3851_v19 = vld [vmem:[%s5359_s1 + $0xb8] sm:$0xf0]  ;;  %v3176_v20 = vor.u32 %v3889_v12, %v3173_v13  ;;  %v2993_v21 = vld [vmem:[%s5359_s1 + $0x94] sm:$0xf0]  ;;  %v3171_v22 = vld [vmem:[%s5359_s1 + $0x1e8] sm:$0xf] }
  0x23   :  { %571 = vmatmul.bf16.vlgmr.msra.gmra.mxu0 %v4330_v46  ;;  %v3891_v23 = vld [vmem:[%s5359_s1 + $0x1f8] sm:$0xf0]  ;;  %v3884_v24 = vld [vmem:[%s5359_s1 + $0x1c4] sm:$0xf]  ;;  %v3153_v25 = vld [vmem:[%s5359_s1 + $0x1d4] sm:$0xf0]  ;;  %v3012_v26 = vor.u32 %v3851_v19, %v3011_v18  ;;  %v2996_v28 = vor.u32 %v3844_v17, %v2993_v21 }
  0x24   :  { %584 = vmatmul.bf16.vlgmr.msra.gmra.mxu1 %v4341_v51  ;;  %597 = vmatmul.bf16.vlgmr.msra.gmra.mxu2 %v4330_v46  ;;  %v3839_v27 = vld [vmem:[%s5359_s1 + $0x5c] sm:$0xf]  ;;  %v3172_v29 = vor.u32 %v3891_v23, %v3171_v22  ;;  %v2973_v30 = vld [vmem:[%s5359_s1 + $0x6c] sm:$0xf0]  ;;  %v2991_v31 = vld [vmem:[%s5359_s1 + $0x80] sm:$0xf]  ;;  %v3156_v33 = vor.u32 %v3884_v24, %v3153_v25 }
  0x25   :  { %641 = vmatpush.bf16.msrb.mxu2 %v3076_v42  ;;  %610 = vmatmul.bf16.vlgmr.msra.gmra.mxu3 %v4341_v51  ;;  %v3846_v32 = vld [vmem:[%s5359_s1 + $0x90] sm:$0xf0]  ;;  %v3151_v34 = vld [vmem:[%s5359_s1 + $0x1c0] sm:$0xf] }
  0x26   :  { %654 = vmatpush.bf16.msrb.mxu3 %v3236_v47  ;;  %615 = vmatpush.bf16.msrb.mxu0 %v3072_v54  ;;  %v3886_v35 = vld [vmem:[%s5359_s1 + $0x1d0] sm:$0xf0] }
  0x27   :  { %628 = vmatpush.bf16.msrb.mxu1 %v3232_v56 }
  0x29   :  { %642 = vmatpush.bf16.msrb.mxu2 %v3056_v55 }
  0x2a   :  { %655 = vmatpush.bf16.msrb.mxu3 %v3216_v60  ;;  %616 = vmatpush.bf16.msrb.mxu0 %v3052_v2 }
  0x2b   :  { %629 = vmatpush.bf16.msrb.mxu1 %v3212_v4 }
  0x2d   :  { %643 = vmatpush.bf16.msrb.mxu2 %v3036_v3 }
  0x2e   :  { %656 = vmatpush.bf16.msrb.mxu3 %v3196_v8  ;;  %617 = vmatpush.bf16.msrb.mxu0 %v3032_v14 }
  0x2f   :  { %630 = vmatpush.bf16.msrb.mxu1 %v3192_v16 }
  0x31   :  { %644 = vmatpush.bf16.msrb.mxu2 %v3016_v15 }
  0x32   :  { %657 = vmatpush.bf16.msrb.mxu3 %v3176_v20 }
  0x33   :  { %14 = vsyncpa [#allocation6], 0  ;;  %v3879_v36 = vld [vmem:[%s5359_s1 + $0x19c] sm:$0xf]  ;;  %v3133_v37 = vld [vmem:[%s5359_s1 + $0x1ac] sm:$0xf0]  ;;  %618 = vmatpush.bf16.msrb.mxu0 %v3012_v26  ;;  %v2992_v38 = vor.u32 %v3846_v32, %v2991_v31  ;;  %631 = vmatpush.bf16.msrb.mxu1 %v3172_v29  ;;  %v2976_v39 = vor.u32 %v3839_v27, %v2973_v30  ;;  %v3152_v40 = vor.u32 %v3886_v35, %v3151_v34 }
  0x34   :  { %v3834_v41 = vld [vmem:[%s5359_s1 + $0x34] sm:$0xf]  ;;  %v2971_v42 = vld [vmem:[%s5359_s1 + $0x58] sm:$0xf]  ;;  %v3841_v43 = vld [vmem:[%s5359_s1 + $0x68] sm:$0xf0]  ;;  %v3136_v44 = vor.u32 %v3879_v36, %v3133_v37 }
  0x35   :  { %645 = vmatpush.bf16.msrb.mxu2 %v2996_v28  ;;  %v2953_v45 = vld [vmem:[%s5359_s1 + $0x44] sm:$0xf0]  ;;  %v3131_v47 = vld [vmem:[%s5359_s1 + $0x198] sm:$0xf]  ;;  %v3881_v48 = vld [vmem:[%s5359_s1 + $0x1a8] sm:$0xf0]  ;;  %v2972_v52 = vor.u32 %v3841_v43, %v2971_v42 }
  0x36   :  { %658 = vmatpush.bf16.msrb.mxu3 %v3156_v33  ;;  %v3874_v49 = vld [vmem:[%s5359_s1 + $0x174] sm:$0xf]  ;;  %v3113_v50 = vld [vmem:[%s5359_s1 + $0x184] sm:$0xf0]  ;;  %v2956_v53 = vor.u32 %v3834_v41, %v2953_v45  ;;  %v3132_v54 = vor.u32 %v3881_v48, %v3131_v47  ;;  %v3829_v55 = vld [vmem:[%s5359_s1 + $0xc] sm:$0xf] }
  0x37   :  { %619 = vmatpush.bf16.msrb.mxu0 %v2992_v38  ;;  %632 = vmatpush.bf16.msrb.mxu1 %v3152_v40  ;;  %v2951_v56 = vld [vmem:[%s5359_s1 + $0x30] sm:$0xf]  ;;  %v3836_v57 = vld [vmem:[%s5359_s1 + $0x40] sm:$0xf0]  ;;  %v3116_v58 = vor.u32 %v3874_v49, %v3113_v50  ;;  %v2933_v59 = vld [vmem:[%s5359_s1 + $0x1c] sm:$0xf0] }
  0x38   :  { %v3111_v60 = vld [vmem:[%s5359_s1 + $0x170] sm:$0xf]  ;;  %v3876_v61 = vld [vmem:[%s5359_s1 + $0x180] sm:$0xf0]  ;;  %v3869_v62 = vld [vmem:[%s5359_s1 + $0x14c] sm:$0xf]  ;;  %v2952_v0 = vor.u32 %v3836_v57, %v2951_v56  ;;  %v2936_v1 = vor.u32 %v3829_v55, %v2933_v59 }
  0x39   :  { %646 = vmatpush.bf16.msrb.mxu2 %v2976_v39  ;;  %v3093_v63 = vld [vmem:[%s5359_s1 + $0x15c] sm:$0xf0]  ;;  %v3112_v2 = vor.u32 %v3876_v61, %v3111_v60  ;;  %v2931_v3 = vld [vmem:[%s5359_s1 + $0x8] sm:$0xf]  ;;  %v3831_v4 = vld [vmem:[%s5359_s1 + $0x18] sm:$0xf0] }
  0x3a   :  { %659 = vmatpush.bf16.msrb.mxu3 %v3136_v44  ;;  %v3096_v5 = vor.u32 %v3869_v62, %v3093_v63  ;;  %v3091_v6 = vld [vmem:[%s5359_s1 + $0x148] sm:$0xf]  ;;  %v3871_v7 = vld [vmem:[%s5359_s1 + $0x158] sm:$0xf0]  ;;  %v2932_v10 = vor.u32 %v3831_v4, %v2931_v3  ;;  %v3059_v13 = vld [vmem:[%s5359_s1 + $0x100] sm:$0xf] }
  0x3b   :  { %620 = vmatpush.bf16.msrb.mxu0 %v2972_v52  ;;  %633 = vmatpush.bf16.msrb.mxu1 %v3132_v54  ;;  %v3079_v8 = vld [vmem:[%s5359_s1 + $0x128] sm:$0xf]  ;;  %v3867_v9 = vld [vmem:[%s5359_s1 + $0x138] sm:$0xf0]  ;;  %v3092_v11 = vor.u32 %v3871_v7, %v3091_v6  ;;  %v3862_v14 = vld [vmem:[%s5359_s1 + $0x110] sm:$0xf0] }
  0x3c   :  { %v3080_v12 = vor.u32 %v3867_v9, %v3079_v8  ;;  %v3060_v15 = vor.u32 %v3862_v14, %v3059_v13  ;;  %v3039_v16 = vld [vmem:[%s5359_s1 + $0xd8] sm:$0xf]  ;;  %v3857_v17 = vld [vmem:[%s5359_s1 + $0xe8] sm:$0xf0]  ;;  %v3019_v19 = vld [vmem:[%s5359_s1 + $0xb0] sm:$0xf] }
  0x3d   :  { %647 = vmatpush.bf16.msrb.mxu2 %v2956_v53  ;;  %v3040_v18 = vor.u32 %v3857_v17, %v3039_v16  ;;  %v3852_v20 = vld [vmem:[%s5359_s1 + $0xc0] sm:$0xf0]  ;;  %v2999_v22 = vld [vmem:[%s5359_s1 + $0x88] sm:$0xf]  ;;  %v3847_v23 = vld [vmem:[%s5359_s1 + $0x98] sm:$0xf0] }
  0x3e   :  { %660 = vmatpush.bf16.msrb.mxu3 %v3116_v58  ;;  %v3020_v21 = vor.u32 %v3852_v20, %v3019_v19  ;;  %v3000_v24 = vor.u32 %v3847_v23, %v2999_v22  ;;  %v2979_v25 = vld [vmem:[%s5359_s1 + $0x60] sm:$0xf]  ;;  %v3842_v26 = vld [vmem:[%s5359_s1 + $0x70] sm:$0xf0]  ;;  %v2959_v28 = vld [vmem:[%s5359_s1 + $0x38] sm:$0xf] }
  0x3f   :  { %621 = vmatpush.bf16.msrb.mxu0 %v2952_v0  ;;  %634 = vmatpush.bf16.msrb.mxu1 %v3112_v2  ;;  %v2980_v27 = vor.u32 %v3842_v26, %v2979_v25  ;;  %v3837_v29 = vld [vmem:[%s5359_s1 + $0x48] sm:$0xf0]  ;;  %v3239_v31 = vld [vmem:[%s5359_s1 + $0x268] sm:$0xf]  ;;  %v3907_v32 = vld [vmem:[%s5359_s1 + $0x278] sm:$0xf0] }
  0x40   :  { %v2960_v30 = vor.u32 %v3837_v29, %v2959_v28  ;;  %v2939_v33 = vld [vmem:[%s5359_s1 + $0x10] sm:$0xf]  ;;  %v3240_v34 = vor.u32 %v3907_v32, %v3239_v31  ;;  %v3832_v35 = vld [vmem:[%s5359_s1 + $0x20] sm:$0xf0]  ;;  %v3219_v37 = vld [vmem:[%s5359_s1 + $0x240] sm:$0xf] }
  0x41   :  { %648 = vmatpush.bf16.msrb.mxu2 %v2936_v1  ;;  %v2940_v36 = vor.u32 %v3832_v35, %v2939_v33  ;;  %v3902_v38 = vld [vmem:[%s5359_s1 + $0x250] sm:$0xf0]  ;;  %v3199_v40 = vld [vmem:[%s5359_s1 + $0x218] sm:$0xf]  ;;  %v3897_v41 = vld [vmem:[%s5359_s1 + $0x228] sm:$0xf0] }
  0x42   :  { %661 = vmatpush.bf16.msrb.mxu3 %v3096_v5  ;;  %v3220_v39 = vor.u32 %v3902_v38, %v3219_v37  ;;  %v3200_v42 = vor.u32 %v3897_v41, %v3199_v40  ;;  %v3179_v43 = vld [vmem:[%s5359_s1 + $0x1f0] sm:$0xf]  ;;  %v3892_v44 = vld [vmem:[%s5359_s1 + $0x200] sm:$0xf0]  ;;  %v3159_v48 = vld [vmem:[%s5359_s1 + $0x1c8] sm:$0xf] }
  0x43   :  { %622 = vmatpush.bf16.msrb.mxu0 %v2932_v10  ;;  %635 = vmatpush.bf16.msrb.mxu1 %v3092_v11  ;;  %v3887_v49 = vld [vmem:[%s5359_s1 + $0x1d8] sm:$0xf0]  ;;  %v3139_v52 = vld [vmem:[%s5359_s1 + $0x1a0] sm:$0xf]  ;;  %v3882_v53 = vld [vmem:[%s5359_s1 + $0x1b0] sm:$0xf0] }
  0x44   :  { %649 = vmatmul.bf16.vlgmr.msrb.gmra.mxu2 %v4330_v46  ;;  %v3160_v50 = vor.u32 %v3887_v49, %v3159_v48  ;;  %v3140_v54 = vor.u32 %v3882_v53, %v3139_v52  ;;  %v3119_v61 = vld [vmem:[%s5359_s1 + $0x178] sm:$0xf]  ;;  %v3877_v62 = vld [vmem:[%s5359_s1 + $0x188] sm:$0xf0]  ;;  %v3099_v63 = vld [vmem:[%s5359_s1 + $0x150] sm:$0xf] }
  0x45   :  { %662 = vmatmul.bf16.vlgmr.msrb.gmra.mxu3 %v4341_v51  ;;  %v3120_v1 = vor.u32 %v3877_v62, %v3119_v61  ;;  %v3872_v2 = vld [vmem:[%s5359_s1 + $0x160] sm:$0xf0]  ;;  %vm732_vm0 = vcmask 1043456   ;;  %s4051_s1 = smov 64   ;;  %vm725_vm1 = vcmask 64512   ;;  %v3909_v32 = vld [vmem:[%s5360_s2 + $0x8] sm:$0xff] }
  0x46   :  { %623 = vmatmul.bf16.vlgmr.msrb.gmra.mxu0 %v4330_v46  ;;  %636 = vmatmul.bf16.vlgmr.msrb.gmra.mxu1 %v4341_v51  ;;  %v3100_v3 = vor.u32 %v3872_v2, %v3099_v63  ;;  %v3908_v13 = vld [vmem:[%s5360_s2] sm:$0xff]  ;;  %v3910_v38 = vld [vmem:[%s5360_s2 + $0x10] sm:$0xff]  ;;  %vm698_vm2 = vcmask 519168   ;;  %v3919_v62 = vld [vmem:[%s5360_s2 + $0x58] sm:$0xff]  ;;  %vm1219_vm3 = vcmask 523264   ;;  %vm1268_vm4 = vcmask 130052  }
  0x47   :  { %667 = vmatpush.bf16.msra.mxu0 %v3080_v12  ;;  %680 = vmatpush.bf16.msra.mxu1 %v3240_v34  ;;  %v3912_v33 = vld [vmem:[%s5360_s2 + $0x20] sm:$0xff]  ;;  %v3913_v34 = vld [vmem:[%s5360_s2 + $0x28] sm:$0xff]  ;;  %v3922_v61 = vld [vmem:[%s5360_s2 + $0x70] sm:$0xff]  ;;  %s4054_s16 = smov 112   ;;  %s4055_s17 = smov 80   ;;  %vm1331_vm6 = vcmask 261120  }
  0x48   :  { %v3917_v63 = vld [vmem:[%s5360_s2 + $0x48] sm:$0xff]  ;;  %v3923_v2 = vld [vmem:[%s5360_s2 + $0x78] sm:$0xff]  ;;  %vm4785_vm5 = vmor %vm1268_vm4, %vm732_vm0  ;;  %s4056_s18 = smov 32   ;;  %s4057_s19 = smov 16   ;;  %vm2086_vm7 = vcmask 122880   ;;  %vm2094_vm8 = vcmask 254080  }
  0x49   :  { %s4058_s20 = smov 48   ;;  %vm2102_vm9 = vcmask 385280   ;;  %vm2112_vm10 = vcmask 516480   ;;  %vm2120_vm11 = vcmask 647680   ;;  %vm2130_vm12 = vcmask 778880   ;;  %s2910_s14 = sshll.u32 %s5367_s9, 4  ;;  %s2911_s14 = int_to_ptr.hbm [resolvable:$true] %s2910_s14 }
  0x4a   :  { %vm2138_vm13 = vcmask 910080   ;;  %vm2148_vm14 = vcmask 1041280   ;;  %vm2901_vm15 = vcmask 41984  }
  0x4b   :  { %668 = vmatpush.bf16.msra.mxu0 %v3060_v15  ;;  %681 = vmatpush.bf16.msra.mxu1 %v3220_v39 }
  0x4f   :  { %669 = vmatpush.bf16.msra.mxu0 %v3040_v18  ;;  %682 = vmatpush.bf16.msra.mxu1 %v3200_v42 }
  0x53   :  { %670 = vmatpush.bf16.msra.mxu0 %v3020_v21 }
  0x57   :  { %671 = vmatpush.bf16.msra.mxu0 %v3000_v24 }
  0x5b   :  { %672 = vmatpush.bf16.msra.mxu0 %v2980_v27 }
  0x5f   :  { %673 = vmatpush.bf16.msra.mxu0 %v2960_v30 }
  0x63   :  { %674 = vmatpush.bf16.msra.mxu0 %v2940_v36 }
  0x66   :  { %675 = vmatmul.bf16.vlgmr.msra.gmra.mxu0 %v4330_v46  ;;  %v3180_v46 = vor.u32 %v3892_v44, %v3179_v43  ;;  %v3920_v44 = vld [vmem:[%s5360_s2 + $0x60] sm:$0xff] }
  0x68   :  { %683 = vmatpush.bf16.msra.mxu1 %v3180_v46 }
  0x6c   :  { %684 = vmatpush.bf16.msra.mxu1 %v3160_v50  ;;  %v3911_v50 = vld [vmem:[%s5360_s2 + $0x18] sm:$0xff] }
  0x70   :  { %685 = vmatpush.bf16.msra.mxu1 %v3140_v54  ;;  %v3921_v54 = vld [vmem:[%s5360_s2 + $0x68] sm:$0xff] }
  0x74   :  { %686 = vmatpush.bf16.msra.mxu1 %v3120_v1  ;;  %v4692_v1 = vld [vmem:[%s5365_s7] sm:$0xff] }
  0x78   :  { %687 = vmatpush.bf16.msra.mxu1 %v3100_v3  ;;  %v4052_v3 = vmov 0  }
  0x79   :  { %4020 = vset.pattern.permute.xlu0 %v4052_v3  ;;  %4019 = vset.pattern.permute.xlu2 %v4052_v3 }
  0x7a   :  { %1143 = vperm.xlu2 %4019, %v4692_v1   ;;  %4021 = vset.pattern.permute.xlu1 %v4052_v3 }
  0x7b   :  { %688 = vmatmul.bf16.vlgmr.msra.gmra.mxu1 %v4341_v51 }
  0xa0   :  { %v572_v45 = vpop.f32.mrf.mxu0 }
  0xa1   :  { %v585_v47 = vpop.f32.mrf.mxu1 }
  0xa2   :  { %v586_v55 = vadd.f32 %v585_v47, %v572_v45  ;;  %v3914_v45 = vld [vmem:[%s5360_s2 + $0x30] sm:$0xff]  ;;  %v3915_v47 = vld [vmem:[%s5360_s2 + $0x38] sm:$0xff] }
  0xa7   :  { %v598_v56 = vpop.f32.mrf.mxu2 }
  0xa8   :  { %v611_v57 = vpop.f32.mrf.mxu3  ;;  %v574_v58 = vpop.f32.mrf.mxu0 }
  0xa9   :  { %v612_v59 = vadd.f32 %v611_v57, %v598_v56  ;;  %v587_v60 = vpop.f32.mrf.mxu1  ;;  %v3918_v57 = vld [vmem:[%s5360_s2 + $0x50] sm:$0xff]  ;;  %v3916_v58 = vld [vmem:[%s5360_s2 + $0x40] sm:$0xff] }
  0xab   :  { %v693_v0 = vpack.c.bf16 %v612_v59, %v586_v55 }
  0xad   :  { %696 = vst [vmem:[#allocation2] sm:$0xff] %v693_v0  ;;  %v4687_v0 = vld [vmem:[%s5365_s7 + $0x10] sm:$0xff] }
  0xaf   :  { %v600_v4 = vpop.f32.mrf.mxu2 }
  0xb0   :  { %v613_v5 = vpop.f32.mrf.mxu3  ;;  %v4700_v4 = vld [vmem:[%s5365_s7 + $0x18] sm:$0xff] }
  0xb1   :  { %v4709_v5 = vld [vmem:[%s5365_s7 + $0x8] sm:$0xff] }
  0xb2   :  { %1148 = vperm.xlu2 %4019, %v4709_v5  }
  0xb4   :  { %v704_v6 = vld [vmem:[#allocation2] sm:$0xf]  ;;  %v798_v7 = vld [vmem:[#allocation2 + $0x4] sm:$0xf] }
  0xb5   :  { %v772_v8 = vsel %vm732_vm0, %v704_v6, 0  ;;  %v816_v9 = vsel %vm732_vm0, %v798_v7, 0  ;;  %v721_v10 = vunpack.c.l.b16 %v704_v6  ;;  %v857_v12 = vunpack.c.l.b16 %v798_v7  ;;  %v3924_v6 = vld [vmem:[%s5360_s2 + $0x80] sm:$0xff]  ;;  %v3925_v7 = vld [vmem:[%s5360_s2 + $0x88] sm:$0xff] }
  0xb6   :  { %781 = vmatpush.bf16.msra.mxu3 %v772_v8  ;;  %825 = vmatpush.bf16.msrb.mxu0 %v816_v9 }
  0xb7   :  { %v722_v11 = vpack.c.b16 %v721_v10, %v721_v10  ;;  %v858_v14 = vpack.c.b16 %v857_v12, %v857_v12 }
  0xb9   :  { %723 = vrot.lane.b32.xlu0 %v722_v11, %s4051_s1  ;;  %3263 = vmatmul.msk.bf16.vlgmr.msra.gmra.mxu3 %vm725_vm1, %v3908_v13 }
  0xba   :  { %3277 = vmatmul.msk.bf16.vlgmr.msrb.gmra.mxu0 %vm725_vm1, %v3912_v33 }
  0xc1   :  { %859 = vrot.lane.b32.xlu0 %v858_v14, %s4051_s1 }
  0xc3   :  { %v624_v51 = vpop.f32.mrf.mxu0  ;;  %v637_v15 = vpop.f32.mrf.mxu1 }
  0xc4   :  { %v638_v16 = vadd.f32 %v637_v15, %v624_v51 }
  0xc7   :  { %v650_v17 = vpop.f32.mrf.mxu2 }
  0xc8   :  { %v663_v18 = vpop.f32.mrf.mxu3 }
  0xc9   :  { %v664_v19 = vadd.f32 %v663_v18, %v650_v17  ;;  %3264 = vmatmul.msk.bf16.gmra.mxu3 %vm725_vm1, %v3909_v32  ;;  %1153 = vperm.xlu0 %4020, %v4687_v0   ;;  %v3389_v18 = vld [vmem:[%s5361_s3 + $0x30] sm:$0xf]  ;;  %v3383_v32 = vld [vmem:[%s5361_s3 + $0x28] sm:$0xf0] }
  0xca   :  { %3278 = vmatmul.msk.bf16.gmra.mxu0 %vm725_vm1, %v3913_v34  ;;  %v3373_v34 = vld [vmem:[%s5361_s3 + $0x10] sm:$0xf] }
  0xcb   :  { %v694_v20 = vpack.c.bf16 %v664_v19, %v638_v16  ;;  %v626_v21 = vpop.f32.mrf.mxu0  ;;  %v639_v22 = vpop.f32.mrf.mxu1  ;;  %v3933_v19 = vld [vmem:[%s5361_s3 + $0x34] sm:$0xf0] }
  0xcd   :  { %697 = vst [vmem:[#allocation2 + $0x8] sm:$0xff] %v694_v20  ;;  %v3932_v20 = vld [vmem:[%s5361_s3 + $0x34] sm:$0xf] }
  0xcf   :  { %v652_v23 = vpop.f32.mrf.mxu2 }
  0xd0   :  { %v665_v24 = vpop.f32.mrf.mxu3  ;;  %v3390_v23 = vor.u32 %v3933_v19, %v3389_v18 }
  0xd1   :  { %v3391_v24 = vld [vmem:[%s5361_s3 + $0x38] sm:$0xf0] }
  0xd4   :  { %v898_v25 = vld [vmem:[#allocation2 + $0x8] sm:$0xf]  ;;  %v998_v26 = vld [vmem:[#allocation2 + $0xc] sm:$0xf] }
  0xd5   :  { %v957_v27 = vunpack.c.l.b16 %v898_v25  ;;  %v1016_v28 = vsel %vm732_vm0, %v998_v26, 0  ;;  %v1057_v30 = vunpack.c.l.b16 %v998_v26  ;;  %v916_v39 = vsel %vm732_vm0, %v898_v25, 0  ;;  %v3381_v26 = vld [vmem:[%s5361_s3 + $0x20] sm:$0xf] }
  0xd6   :  { %1025 = vmatpush.bf16.msra.mxu0 %v1016_v28  ;;  %v3394_v25 = vor.u32 %v3932_v20, %v3391_v24  ;;  %v3930_v28 = vld [vmem:[%s5361_s3 + $0x24] sm:$0xf] }
  0xd7   :  { %v958_v29 = vpack.c.b16 %v957_v27, %v957_v27  ;;  %v1058_v31 = vpack.c.b16 %v1057_v30, %v1057_v30  ;;  %v3931_v27 = vld [vmem:[%s5361_s3 + $0x24] sm:$0xf0]  ;;  %v3386_v33 = vor.u32 %v3930_v28, %v3383_v32 }
  0xd9   :  { %959 = vrot.lane.b32.xlu1 %v958_v29, %s4051_s1 }
  0xda   :  { %3333 = vmatmul.msk.bf16.vlgmr.msra.gmra.mxu0 %vm725_vm1, %v3920_v44  ;;  %v3926_v44 = vld [vmem:[%s5361_s3 + $0x4] sm:$0xf] }
  0xdb   :  { %1249 = vmatpush.bf16.msrb.mxu0 %v3394_v25 }
  0xdf   :  { %1250 = vmatpush.bf16.msrb.mxu0 %v3386_v33 }
  0xe1   :  { %1059 = vrot.lane.b32.xlu1 %v1058_v31, %s4051_s1  ;;  %v3382_v31 = vor.u32 %v3931_v27, %v3381_v26 }
  0xe3   :  { %v676_v35 = vpop.f32.mrf.mxu0 }
  0xe9   :  { %1158 = vperm.xlu1 %4021, %v4700_v4  }
  0xea   :  { %3334 = vmatmul.msk.bf16.gmra.mxu0 %vm725_vm1, %v3921_v54 }
  0xeb   :  { %v678_v41 = vpop.f32.mrf.mxu0 }
  0xf8   :  { %v689_v40 = vpop.f32.mrf.mxu1 }
  0xf9   :  { %v690_v42 = vadd.f32 %v689_v40, %v676_v35  ;;  %v3929_v35 = vld [vmem:[%s5361_s3 + $0x14] sm:$0xf0] }
  0xfb   :  { %v695_v48 = vpack.c.bf16 %v690_v42, %v690_v42  ;;  %v3365_v42 = vld [vmem:[%s5361_s3] sm:$0xf] }
  0xfd   :  { %699 = vst.msk [vmem:[#allocation2 + $0x10] sm:$0xf] %vm698_vm2, %v695_v48 }
 0x100   :  { %v691_v49 = vpop.f32.mrf.mxu1 }
 0x104   :  { %v1098_v52 = vld [vmem:[#allocation2 + $0x10] sm:$0xf] }
 0x105   :  { %v1116_v53 = vsel %vm732_vm0, %v1098_v52, 0 }
 0x12b   :  { %v724_v36 = vpop.permute.xlu0 %723 }
 0x12c   :  { %v734_v37 = vsel %vm732_vm0, %v724_v36, 0  ;;  %v3928_v36 = vld [vmem:[%s5361_s3 + $0x14] sm:$0xf] }
 0x12d   :  { %743 = vmatpush.bf16.msra.mxu2 %v734_v37 }
 0x130   :  { %3253 = vmatmul.msk.bf16.vlgmr.msra.gmra.mxu2 %vm725_vm1, %v3910_v38  ;;  %v3374_v38 = vor.u32 %v3929_v35, %v3373_v34 }
 0x131   :  { %925 = vmatpush.bf16.msrb.mxu2 %v916_v39  ;;  %v3375_v39 = vld [vmem:[%s5361_s3 + $0x18] sm:$0xf0] }
 0x132   :  { %v3378_v40 = vor.u32 %v3928_v36, %v3375_v39 }
 0x133   :  { %v860_v43 = vpop.permute.xlu0 %859 }
 0x134   :  { %v868_v46 = vsel %vm732_vm0, %v860_v43, 0  ;;  %1251 = vmatpush.bf16.msrb.mxu0 %v3378_v40  ;;  %v3927_v43 = vld [vmem:[%s5361_s3 + $0x4] sm:$0xf0] }
 0x135   :  { %877 = vmatpush.bf16.msrb.mxu1 %v868_v46  ;;  %4008 = vmatpush.bf16.msrb.mxu3 %v868_v46  ;;  %v3366_v46 = vor.u32 %v3927_v43, %v3365_v42 }
 0x136   :  { %1125 = vmatpush.bf16.msra.mxu2 %v1116_v53 }
 0x137   :  { %v827_v13 = vpop.f32.mrf.mxu0 }
 0x138   :  { %3291 = vmatmul.msk.bf16.vlgmr.msrb.gmra.mxu1 %vm725_vm1, %v3914_v45  ;;  %3292 = vmatmul.msk.bf16.vlgmr.msrb.gmra.mxu3 %vm725_vm1, %v3915_v47  ;;  %v3367_v45 = vld [vmem:[%s5361_s3 + $0x8] sm:$0xf0]  ;;  %s4053_s3 = smov 96  }
 0x139   :  { %v3370_v48 = vor.u32 %v3926_v44, %v3367_v45 }
 0x13b   :  { %1252 = vmatpush.bf16.msrb.mxu0 %v3370_v48  ;;  %v1154_v43 = vpop.permute.xlu0 %1153 }
 0x13c   :  { %v783_v8 = vpop.f32.mrf.mxu3 }
 0x13f   :  { %v829_v15 = vpop.f32.mrf.mxu0 }
 0x140   :  { %3254 = vmatmul.msk.bf16.gmra.mxu2 %vm725_vm1, %v3911_v50 }
 0x144   :  { %v785_v9 = vpop.f32.mrf.mxu3 }
 0x147   :  { %v832_v21 = vpop.f32.mrf.mxu0 }
 0x14b   :  { %v960_v55 = vpop.permute.xlu1 %959 }
 0x14c   :  { %v968_v56 = vsel %vm732_vm0, %v960_v55, 0  ;;  %v4720_v11 = vpop.f32.mrf.mxu3 }
 0x14d   :  { %977 = vmatpush.bf16.msra.mxu3 %v968_v56 }
 0x14f   :  { %v834_v41 = vpop.f32.mrf.mxu0 }
 0x150   :  { %3319 = vmatmul.msk.bf16.vlgmr.msra.gmra.mxu3 %vm725_vm1, %v3918_v57  ;;  %3305 = vmatmul.msk.bf16.vlgmr.msrb.gmra.mxu2 %vm725_vm1, %v3916_v58 }
 0x151   :  { %1230 = vmatpush.bf16.msrb.mxu3 %v3390_v23 }
 0x153   :  { %v1060_v59 = vpop.permute.xlu1 %1059 }
 0x154   :  { %v1068_v60 = vsel %vm732_vm0, %v1060_v59, 0  ;;  %v4722_v14 = vpop.f32.mrf.mxu3 }
 0x155   :  { %1077 = vmatpush.bf16.msra.mxu1 %v1068_v60  ;;  %1231 = vmatpush.bf16.msrb.mxu3 %v3382_v31 }
 0x157   :  { %v1027_v55 = vpop.f32.mrf.mxu0 }
 0x158   :  { %3347 = vmatmul.msk.bf16.vlgmr.msra.gmra.mxu1 %vm725_vm1, %v3922_v61 }
 0x159   :  { %1232 = vmatpush.bf16.msrb.mxu3 %v3374_v38 }
 0x15b   :  { %v1159_v45 = vpop.permute.xlu1 %1158 }
 0x15d   :  { %1233 = vmatpush.bf16.msrb.mxu3 %v3366_v46 }
 0x15f   :  { %v1029_v3 = vpop.f32.mrf.mxu0 }
 0x160   :  { %3320 = vmatmul.msk.bf16.gmra.mxu3 %vm725_vm1, %v3919_v62  ;;  %3306 = vmatmul.msk.bf16.gmra.mxu2 %vm725_vm1, %v3917_v63 }
 0x167   :  { %v1032_v25 = vpop.f32.mrf.mxu0 }
 0x168   :  { %3348 = vmatmul.msk.bf16.gmra.mxu1 %vm725_vm1, %v3923_v2 }
 0x16f   :  { %v1034_v38 = vpop.f32.mrf.mxu0 }
 0x170   :  { %3361 = vmatmul.msk.bf16.vlgmr.msra.gmra.mxu2 %vm725_vm1, %v3924_v6 }
 0x180   :  { %3362 = vmatmul.msk.bf16.gmra.mxu2 %vm725_vm1, %v3925_v7 }
 0x1b3   :  { %v745_v10 = vpop.f32.mrf.mxu2 }
 0x1b4   :  { %v784_v47 = vadd.f32 %v783_v8, %v745_v10  ;;  %v1144_v10 = vpop.permute.xlu2 %1143 }
 0x1b5   :  { %v879_v29 = vpop.f32.mrf.mxu1 }
 0x1b6   :  { %v837_v53 = vadd.f32 %v827_v13, %v784_v47 }
 0x1b8   :  { %v889_v56 = vadd.f32 %v879_v29, %v837_v53 }
 0x1bb   :  { %v747_v12 = vpop.f32.mrf.mxu2  ;;  %v4726_v17 = vpop.f32.mrf.mxu3 }
 0x1bc   :  { %v786_v54 = vadd.f32 %v785_v9, %v747_v12  ;;  %v1149_v32 = vpop.permute.xlu2 %1148 }
 0x1bd   :  { %v881_v49 = vpop.f32.mrf.mxu1 }
 0x1be   :  { %v838_v57 = vadd.f32 %v829_v15, %v786_v54 }
 0x1c0   :  { %v890_v62 = vadd.f32 %v881_v49, %v838_v57 }
 0x1c3   :  { %v750_v51 = vpop.f32.mrf.mxu2  ;;  %v886_v30 = vpop.f32.mrf.mxu3 }
 0x1c4   :  { %v789_v6 = vadd.f32 %v4720_v11, %v750_v51 }
 0x1c6   :  { %v839_v13 = vadd.f32 %v832_v21, %v789_v6 }
 0x1cb   :  { %v4724_v16 = vpop.f32.mrf.mxu2 }
 0x1cc   :  { %v791_v9 = vadd.f32 %v4722_v14, %v4724_v16 }
 0x1ce   :  { %v840_v23 = vadd.f32 %v834_v41, %v791_v9  ;;  %v3934_v9 = vld [vmem:[%s5362_s4] sm:$0xff] }
 0x1d0   :  { %v892_v51 = vadd.f32 %v886_v30, %v840_v23 }
 0x1d3   :  { %v927_v22 = vpop.f32.mrf.mxu2  ;;  %v979_v50 = vpop.f32.mrf.mxu3 }
 0x1d4   :  { %v937_v59 = vadd.f32 %v927_v22, %v889_v56  ;;  %v891_v22 = vadd.f32 %v4726_v17, %v839_v13  ;;  %v3964_v56 = vld [vmem:[%s5362_s4 + $0xe0] sm:$0xff] }
 0x1d5   :  { %v1079_v58 = vpop.f32.mrf.mxu1 }
 0x1d6   :  { %v989_v63 = vadd.f32 %v979_v50, %v937_v59 }
 0x1d8   :  { %v1037_v7 = vadd.f32 %v1027_v55, %v989_v63 }
 0x1da   :  { %v1089_v15 = vadd.f32 %v1079_v58, %v1037_v7 }
 0x1db   :  { %v929_v37 = vpop.f32.mrf.mxu2  ;;  %v981_v60 = vpop.f32.mrf.mxu3 }
 0x1dc   :  { %v938_v2 = vadd.f32 %v929_v37, %v890_v62 }
 0x1dd   :  { %v1081_v18 = vpop.f32.mrf.mxu1 }
 0x1de   :  { %v990_v8 = vadd.f32 %v981_v60, %v938_v2 }
 0x1e0   :  { %v1038_v20 = vadd.f32 %v1029_v3, %v990_v8 }
 0x1e2   :  { %v1090_v26 = vadd.f32 %v1081_v18, %v1038_v20  ;;  %v3936_v20 = vld [vmem:[%s5362_s4 + $0x10] sm:$0xff] }
 0x1e3   :  { %v932_v52 = vpop.f32.mrf.mxu2  ;;  %v984_v12 = vpop.f32.mrf.mxu3 }
 0x1e4   :  { %v939_v27 = vadd.f32 %v932_v52, %v891_v22 }
 0x1e5   :  { %v1084_v31 = vpop.f32.mrf.mxu1 }
 0x1e6   :  { %v991_v21 = vadd.f32 %v984_v12, %v939_v27  ;;  %v3935_v12 = vld [vmem:[%s5362_s4 + $0x8] sm:$0xff] }
 0x1e8   :  { %v1039_v36 = vadd.f32 %v1032_v25, %v991_v21  ;;  %v3948_v21 = vld [vmem:[%s5362_s4 + $0x60] sm:$0xff] }
 0x1ea   :  { %v1091_v30 = vadd.f32 %v1084_v31, %v1039_v36  ;;  %v3941_v31 = vld [vmem:[%s5362_s4 + $0x28] sm:$0xff] }
 0x1eb   :  { %v934_v61 = vpop.f32.mrf.mxu2  ;;  %v986_v14 = vpop.f32.mrf.mxu3 }
 0x1ec   :  { %v940_v33 = vadd.f32 %v934_v61, %v892_v51  ;;  %v3937_v51 = vld [vmem:[%s5362_s4 + $0x18] sm:$0xff] }
 0x1ed   :  { %v1086_v41 = vpop.f32.mrf.mxu1 }
 0x1ee   :  { %v992_v17 = vadd.f32 %v986_v14, %v940_v33  ;;  %v3945_v33 = vld [vmem:[%s5362_s4 + $0x48] sm:$0xff] }
 0x1f0   :  { %v1040_v40 = vadd.f32 %v1034_v38, %v992_v17 }
 0x1f2   :  { %v1092_v44 = vadd.f32 %v1086_v41, %v1040_v40  ;;  %v3942_v40 = vld [vmem:[%s5362_s4 + $0x30] sm:$0xff]  ;;  %v3956_v41 = vld [vmem:[%s5362_s4 + $0xa0] sm:$0xff] }
 0x1f3   :  { %v1127_v19 = vpop.f32.mrf.mxu2 }
 0x1f4   :  { %v1137_v24 = vadd.f32 %v1127_v19, %v1089_v15 }
 0x1f6   :  { %v1161_v28 = vadd.f32 %v1144_v10, %v1137_v24  ;;  %v3940_v24 = vld [vmem:[%s5362_s4 + $0x20] sm:$0xff] }
 0x1f8   :  { %v1165_v16 = vmax.f32 %v1161_v28, 0.0 }
 0x1fb   :  { %v1129_v11 = vpop.f32.mrf.mxu2 }
 0x1fc   :  { %v1138_v29 = vadd.f32 %v1129_v11, %v1090_v26  ;;  %v3944_v26 = vld [vmem:[%s5362_s4 + $0x40] sm:$0xff] }
 0x1fe   :  { %v1162_v34 = vadd.f32 %v1149_v32, %v1138_v29 }
 0x200   :  { %v1166_v35 = vmax.f32 %v1162_v34, 0.0 }
 0x202   :  { %v1169_v37 = vpack.c.bf16 %v1166_v35, %v1165_v16 }
 0x203   :  { %v1132_v39 = vpop.f32.mrf.mxu2 }
 0x204   :  { %3395 = vmatmul.msk.bf16.vlgmr.msrb.gmra.mxu3 %vm1219_vm3, %v1169_v37  ;;  %3397 = vmatmul.msk.bf16.vlgmr.msrb.gmra.mxu0 %vm1219_vm3, %v1169_v37  ;;  %v1139_v42 = vadd.f32 %v1132_v39, %v1091_v30 }
 0x206   :  { %v1163_v47 = vadd.f32 %v1154_v43, %v1139_v42  ;;  %v3949_v42 = vld [vmem:[%s5362_s4 + $0x68] sm:$0xff]  ;;  %v3946_v43 = vld [vmem:[%s5362_s4 + $0x50] sm:$0xff] }
 0x208   :  { %v1167_v50 = vmax.f32 %v1163_v47, 0.0  ;;  %v3950_v47 = vld [vmem:[%s5362_s4 + $0x70] sm:$0xff] }
 0x20b   :  { %v1134_v46 = vpop.f32.mrf.mxu2 }
 0x20c   :  { %v1140_v48 = vadd.f32 %v1134_v46, %v1092_v44  ;;  %v3943_v46 = vld [vmem:[%s5362_s4 + $0x38] sm:$0xff] }
 0x20e   :  { %v1164_v49 = vadd.f32 %v1159_v45, %v1140_v48  ;;  %v3957_v45 = vld [vmem:[%s5362_s4 + $0xa8] sm:$0xff]  ;;  %v3947_v48 = vld [vmem:[%s5362_s4 + $0x58] sm:$0xff] }
 0x210   :  { %v1168_v52 = vmax.f32 %v1164_v49, 0.0  ;;  %v3952_v49 = vld [vmem:[%s5362_s4 + $0x80] sm:$0xff] }
 0x212   :  { %v1170_v53 = vpack.c.bf16 %v1168_v52, %v1167_v50  ;;  %v3958_v50 = vld [vmem:[%s5362_s4 + $0xb0] sm:$0xff]  ;;  %v3951_v52 = vld [vmem:[%s5362_s4 + $0x78] sm:$0xff] }
 0x214   :  { %3396 = vmatmul.msk.bf16.gmra.mxu3 %vm1219_vm3, %v1170_v53  ;;  %3398 = vmatmul.msk.bf16.gmra.mxu0 %vm1219_vm3, %v1170_v53  ;;  %v3960_v53 = vld [vmem:[%s5362_s4 + $0xc0] sm:$0xff] }
 0x281   :  { %v1254_v54 = vpop.f32.mrf.mxu0 }
 0x287   :  { %v1235_v55 = vpop.f32.mrf.mxu3 }
 0x288   :  { %v1264_v57 = vpack.c.bf16 %v1254_v54, %v1235_v55  ;;  %v3953_v54 = vld [vmem:[%s5362_s4 + $0x88] sm:$0xff]  ;;  %v3959_v55 = vld [vmem:[%s5362_s4 + $0xb8] sm:$0xff] }
 0x289   :  { %v1256_v58 = vpop.f32.mrf.mxu0 }
 0x28a   :  { %1270 = vst.msk [vmem:[#allocation3] sm:$0xff] %vm4785_vm5, %v1264_v57  ;;  %v3961_v57 = vld [vmem:[%s5362_s4 + $0xc8] sm:$0xff] }
 0x28f   :  { %v1237_v59 = vpop.f32.mrf.mxu3 }
 0x290   :  { %v1265_v60 = vpack.c.bf16 %v1256_v58, %v1237_v59  ;;  %v3954_v58 = vld [vmem:[%s5362_s4 + $0x90] sm:$0xff]  ;;  %v3965_v59 = vld [vmem:[%s5362_s4 + $0xe8] sm:$0xff] }
 0x291   :  { %v1259_v61 = vpop.f32.mrf.mxu0  ;;  %v3425_v2 = vld [vmem:[#allocation3] sm:$0xf]  ;;  %v3649_v38 = vld [vmem:[#allocation3 + $0x4] sm:$0xf] }
 0x292   :  { %1271 = vst.msk [vmem:[#allocation3 + $0x8] sm:$0xff] %vm4785_vm5, %v1265_v60  ;;  %v3962_v60 = vld [vmem:[%s5362_s4 + $0xd0] sm:$0xff] }
 0x297   :  { %v1240_v62 = vpop.f32.mrf.mxu3 }
 0x298   :  { %v1266_v63 = vpack.c.bf16 %v1259_v61, %v1240_v62  ;;  %v3955_v61 = vld [vmem:[%s5362_s4 + $0x98] sm:$0xff]  ;;  %v3966_v62 = vld [vmem:[%s5362_s4 + $0xf0] sm:$0xff] }
 0x299   :  { %v3938_v3 = vld [vmem:[#allocation3 + $0x4] sm:$0xf0]  ;;  %v1261_v7 = vpop.f32.mrf.mxu0  ;;  %v3972_v37 = vld [vmem:[#allocation3 + $0x8] sm:$0xf0] }
 0x29a   :  { %1272 = vst.msk [vmem:[#allocation3 + $0x10] sm:$0xff] %vm4785_vm5, %v1266_v63  ;;  %v3426_v6 = vor.u32 %v3938_v3, %v3425_v2  ;;  %v3650_v39 = vor.u32 %v3972_v37, %v3649_v38  ;;  %v3963_v63 = vld [vmem:[%s5362_s4 + $0xd8] sm:$0xff]  ;;  %v4059_v2 = vmov 1   ;;  %v3968_v3 = vld [vmem:[%s5362_s4 + $0x100] sm:$0xff] }
 0x29b   :  { %4023 = vset.pattern.permute.xlu0 %v4059_v2  ;;  %4024 = vset.pattern.permute.xlu1 %v4059_v2 }
 0x29c   :  { %1465 = vrot.lane.b32.xlu0 %v3426_v6, %s4053_s3  ;;  %1325 = vrot.lane.b32.xlu1 %v3426_v6, %s4054_s16 }
 0x29d   :  { %4022 = vset.pattern.permute.xlu2 %v4059_v2 }
 0x29f   :  { %v1242_v8 = vpop.f32.mrf.mxu3 }
 0x2a0   :  { %v1267_v10 = vpack.c.bf16 %v1261_v7, %v1242_v8 }
 0x2a1   :  { %v3429_v18 = vld [vmem:[#allocation3 + $0x10] sm:$0xf]  ;;  %v3653_v35 = vld [vmem:[#allocation3 + $0x14] sm:$0xf] }
 0x2a2   :  { %1273 = vst.msk [vmem:[#allocation3 + $0x18] sm:$0xff] %vm4785_vm5, %v1267_v10 }
 0x2a4   :  { %1549 = vrot.lane.b32.xlu0 %v3426_v6, %s4055_s17 }
 0x2a9   :  { %v3939_v19 = vld [vmem:[#allocation3 + $0x14] sm:$0xf0]  ;;  %v3973_v34 = vld [vmem:[#allocation3 + $0x18] sm:$0xf0] }
 0x2aa   :  { %v3430_v13 = vor.u32 %v3939_v19, %v3429_v18  ;;  %v3654_v17 = vor.u32 %v3973_v34, %v3653_v35 }
 0x2ac   :  { %1803 = vrot.lane.b32.xlu0 %v3430_v13, %s4056_s18  ;;  %1551 = vrot.lane.b32.xlu1 %v3430_v13, %s4055_s17 }
 0x2ad   :  { %1327 = vrot.lane.b32.xlu2 %v3430_v13, %s4054_s16  ;;  %1413 = vmatpush.bf16.msrb.mxu2 %v3430_v13 }
 0x2b1   :  { %1414 = vmatpush.bf16.msrb.mxu2 %v3426_v6 }
 0x2b4   :  { %1887 = vrot.lane.b32.xlu0 %v3430_v13, %s4057_s19  ;;  %1633 = vrot.lane.b32.xlu1 %v3426_v6, %s4051_s1 }
 0x2b5   :  { %1467 = vrot.lane.b32.xlu2 %v3430_v13, %s4053_s3  ;;  %3451 = vmatmul.msk.bf16.vlgmr.msrb.gmra.mxu2 %vm1331_vm6, %v3934_v9  ;;  %v40_v9 = vld [vmem:[%s5365_s7 + $0x30] sm:$0xff] }
 0x2bc   :  { %1717 = vrot.lane.b32.xlu1 %v3426_v6, %s4058_s20  ;;  %2039 = vperm.xlu0 %4023, %v4709_v5   ;;  %v3967_v5 = vld [vmem:[%s5362_s4 + $0xf8] sm:$0xff] }
 0x2bd   :  { %1635 = vrot.lane.b32.xlu2 %v3430_v13, %s4051_s1 }
 0x2c4   :  { %1885 = vrot.lane.b32.xlu1 %v3426_v6, %s4057_s19  ;;  %2062 = vperm.xlu0 %4023, %v40_v9  }
 0x2c5   :  { %1719 = vrot.lane.b32.xlu2 %v3430_v13, %s4058_s20  ;;  %3452 = vmatmul.msk.bf16.gmra.mxu2 %vm1331_vm6, %v3935_v12  ;;  %v3970_v12 = vld [vmem:[%s5362_s4 + $0x110] sm:$0xff] }
 0x2cc   :  { %2043 = vperm.xlu1 %4024, %v4687_v0   ;;  %v39_v0 = vld [vmem:[%s5365_s7 + $0x28] sm:$0xff] }
 0x2cd   :  { %1801 = vrot.lane.b32.xlu2 %v3426_v6, %s4056_s18 }
 0x2d5   :  { %3453 = vmatmul.msk.bf16.gmra.mxu2 %vm1331_vm6, %v3936_v20  ;;  %2035 = vperm.xlu2 %4022, %v4692_v1   ;;  %v38_v1 = vld [vmem:[%s5365_s7 + $0x20] sm:$0xff] }
 0x2d6   :  { %2052 = vperm.xlu1 %4024, %v38_v1  }
 0x2dd   :  { %2047 = vperm.xlu2 %4022, %v4700_v4   ;;  %v3969_v4 = vld [vmem:[%s5362_s4 + $0x108] sm:$0xff] }
 0x2e5   :  { %3454 = vmatmul.msk.bf16.gmra.mxu2 %vm1331_vm6, %v3937_v51  ;;  %2057 = vperm.xlu2 %4022, %v39_v0  }
 0x307   :  { %v1328_v15 = vpop.permute.xlu2 %1327 }
 0x308   :  { %1350 = vmatpush.bf16.msrb.mxu1 %v1328_v15 }
 0x30e   :  { %v1466_v22 = vpop.permute.xlu0 %1465  ;;  %v1326_v23 = vpop.permute.xlu1 %1325 }
 0x30f   :  { %v1468_v25 = vpop.permute.xlu2 %1467  ;;  %1351 = vmatpush.bf16.msrb.mxu1 %v1326_v23 }
 0x310   :  { %1489 = vmatpush.bf16.msra.mxu3 %v1468_v25 }
 0x312   :  { %3431 = vmatmul.msk.bf16.vlgmr.msrb.gmra.mxu1 %vm1331_vm6, %v3940_v24 }
 0x314   :  { %1490 = vmatpush.bf16.msra.mxu3 %v1466_v22  ;;  %v41_v22 = vld [vmem:[%s5365_s7 + $0x38] sm:$0xff] }
 0x315   :  { %2067 = vperm.xlu1 %4024, %v41_v22  }
 0x316   :  { %v1550_v27 = vpop.permute.xlu0 %1549 }
 0x317   :  { %3479 = vmatmul.msk.bf16.vlgmr.msra.gmra.mxu3 %vm1331_vm6, %v3944_v26  ;;  %v1636_v11 = vpop.permute.xlu2 %1635 }
 0x318   :  { %1657 = vmatpush.bf16.msra.mxu1 %v1636_v11 }
 0x31e   :  { %v1804_v28 = vpop.permute.xlu0 %1803  ;;  %v1552_v29 = vpop.permute.xlu1 %1551 }
 0x31f   :  { %v1720_v32 = vpop.permute.xlu2 %1719  ;;  %1573 = vmatpush.bf16.msra.mxu0 %v1552_v29  ;;  %1825 = vmatpush.bf16.msrb.mxu3 %v1804_v28 }
 0x320   :  { %1741 = vmatpush.bf16.msra.mxu2 %v1720_v32 }
 0x322   :  { %3432 = vmatmul.msk.bf16.gmra.mxu1 %vm1331_vm6, %v3941_v31 }
 0x323   :  { %1574 = vmatpush.bf16.msra.mxu0 %v1550_v27  ;;  %v3971_v27 = vld [vmem:[%s5362_s4 + $0x118] sm:$0xff] }
 0x326   :  { %v1888_v14 = vpop.permute.xlu0 %1887  ;;  %3507 = vmatmul.msk.bf16.vlgmr.msra.gmra.mxu0 %vm1331_vm6, %v3948_v21  ;;  %v1634_v16 = vpop.permute.xlu1 %1633 }
 0x327   :  { %3480 = vmatmul.msk.bf16.gmra.mxu3 %vm1331_vm6, %v3945_v33  ;;  %v1802_v36 = vpop.permute.xlu2 %1801  ;;  %1658 = vmatpush.bf16.msra.mxu1 %v1634_v16 }
 0x328   :  { %1826 = vmatpush.bf16.msrb.mxu3 %v1802_v36  ;;  %1909 = vmatpush.bf16.msrb.mxu0 %v1888_v14 }
 0x32b   :  { %2003 = vmatpush.bf16.msrb.mxu1 %v3654_v17 }
 0x32e   :  { %v1718_v30 = vpop.permute.xlu1 %1717 }
 0x32f   :  { %2004 = vmatpush.bf16.msrb.mxu1 %v3650_v39  ;;  %1742 = vmatpush.bf16.msra.mxu2 %v1718_v30 }
 0x332   :  { %3433 = vmatmul.msk.bf16.gmra.mxu1 %vm1331_vm6, %v3942_v40  ;;  %3563 = vmatmul.msk.bf16.vlgmr.msra.gmra.mxu2 %vm1331_vm6, %v3956_v41 }
 0x336   :  { %3508 = vmatmul.msk.bf16.gmra.mxu0 %vm1331_vm6, %v3949_v42  ;;  %v1886_v44 = vpop.permute.xlu1 %1885 }
 0x337   :  { %3481 = vmatmul.msk.bf16.gmra.mxu3 %vm1331_vm6, %v3946_v43  ;;  %1910 = vmatpush.bf16.msrb.mxu0 %v1886_v44 }
 0x338   :  { %v1416_v18 = vpop.f32.mrf.mxu2 }
 0x340   :  { %v1418_v20 = vpop.f32.mrf.mxu2 }
 0x342   :  { %3434 = vmatmul.msk.bf16.gmra.mxu1 %vm1331_vm6, %v3943_v46  ;;  %3564 = vmatmul.msk.bf16.gmra.mxu2 %vm1331_vm6, %v3957_v45 }
 0x346   :  { %3509 = vmatmul.msk.bf16.gmra.mxu0 %vm1331_vm6, %v3950_v47 }
 0x347   :  { %3482 = vmatmul.msk.bf16.gmra.mxu3 %vm1331_vm6, %v3947_v48 }
 0x348   :  { %v1421_v26 = vpop.f32.mrf.mxu2 }
 0x350   :  { %v1423_v31 = vpop.f32.mrf.mxu2 }
 0x352   :  { %3535 = vmatmul.msk.bf16.vlgmr.msra.gmra.mxu1 %vm1331_vm6, %v3952_v49  ;;  %3565 = vmatmul.msk.bf16.gmra.mxu2 %vm1331_vm6, %v3958_v50 }
 0x356   :  { %3510 = vmatmul.msk.bf16.gmra.mxu0 %vm1331_vm6, %v3951_v52 }
 0x357   :  { %3591 = vmatmul.msk.bf16.vlgmr.msrb.gmra.mxu3 %vm1331_vm6, %v3960_v53 }
 0x358   :  { %v4989_v34 = vpop.f32.mrf.mxu2 }
 0x360   :  { %v4995_v36 = vpop.f32.mrf.mxu2 }
 0x362   :  { %3536 = vmatmul.msk.bf16.gmra.mxu1 %vm1331_vm6, %v3953_v54  ;;  %3566 = vmatmul.msk.bf16.gmra.mxu2 %vm1331_vm6, %v3959_v55 }
 0x366   :  { %3619 = vmatmul.msk.bf16.vlgmr.msrb.gmra.mxu0 %vm1331_vm6, %v3964_v56 }
 0x367   :  { %3592 = vmatmul.msk.bf16.gmra.mxu3 %vm1331_vm6, %v3961_v57 }
 0x368   :  { %v5001_v39 = vpop.f32.mrf.mxu2 }
 0x370   :  { %v5009_v43 = vpop.f32.mrf.mxu2 }
 0x372   :  { %3537 = vmatmul.msk.bf16.gmra.mxu1 %vm1331_vm6, %v3954_v58 }
 0x376   :  { %3620 = vmatmul.msk.bf16.gmra.mxu0 %vm1331_vm6, %v3965_v59 }
 0x377   :  { %3593 = vmatmul.msk.bf16.gmra.mxu3 %vm1331_vm6, %v3962_v60 }
 0x382   :  { %3538 = vmatmul.msk.bf16.gmra.mxu1 %vm1331_vm6, %v3955_v61 }
 0x386   :  { %3621 = vmatmul.msk.bf16.gmra.mxu0 %vm1331_vm6, %v3966_v62 }
 0x387   :  { %3594 = vmatmul.msk.bf16.gmra.mxu3 %vm1331_vm6, %v3963_v63 }
 0x38f   :  { %v1353_v6 = vpop.f32.mrf.mxu1 }
 0x390   :  { %v1417_v52 = vadd.f32 %v1416_v18, %v1353_v6 }
 0x392   :  { %3655 = vmatmul.msk.bf16.vlgmr.msrb.gmra.mxu1 %vm1331_vm6, %v3968_v3 }
 0x396   :  { %3622 = vmatmul.msk.bf16.gmra.mxu0 %vm1331_vm6, %v3967_v5 }
 0x397   :  { %v4947_v7 = vpop.f32.mrf.mxu1 }
 0x398   :  { %v1419_v60 = vadd.f32 %v1418_v20, %v4947_v7 }
 0x39a   :  { %v1492_v19 = vpop.f32.mrf.mxu3 }
 0x39b   :  { %v1512_v53 = vadd.f32 %v1492_v19, %v1417_v52 }
 0x39f   :  { %v4958_v8 = vpop.f32.mrf.mxu1 }
 0x3a0   :  { %v1422_v6 = vadd.f32 %v1421_v26, %v4958_v8  ;;  %v2040_v8 = vpop.permute.xlu0 %2039 }
 0x3a2   :  { %3656 = vmatmul.msk.bf16.gmra.mxu1 %vm1331_vm6, %v3969_v4  ;;  %v1494_v23 = vpop.f32.mrf.mxu3 }
 0x3a3   :  { %v1576_v13 = vpop.f32.mrf.mxu0  ;;  %v1513_v61 = vadd.f32 %v1494_v23, %v1419_v60  ;;  %v2044_v60 = vpop.permute.xlu1 %2043 }
 0x3a4   :  { %v1596_v55 = vadd.f32 %v1576_v13, %v1512_v53  ;;  %v2036_v13 = vpop.permute.xlu2 %2035 }
 0x3a7   :  { %v4961_v10 = vpop.f32.mrf.mxu1 }
 0x3a8   :  { %v1424_v26 = vadd.f32 %v1423_v31, %v4961_v10 }
 0x3aa   :  { %v1497_v11 = vpop.f32.mrf.mxu3 }
 0x3ab   :  { %v1578_v24 = vpop.f32.mrf.mxu0  ;;  %v1514_v9 = vadd.f32 %v1497_v11, %v1422_v6 }
 0x3ac   :  { %v1597_v63 = vadd.f32 %v1578_v24, %v1513_v61 }
 0x3af   :  { %v4969_v15 = vpop.f32.mrf.mxu1 }
 0x3b2   :  { %3657 = vmatmul.msk.bf16.gmra.mxu1 %vm1331_vm6, %v3970_v12  ;;  %v4985_v32 = vpop.f32.mrf.mxu3 }
 0x3b3   :  { %v1581_v28 = vpop.f32.mrf.mxu0 }
 0x3b5   :  { %v1744_v47 = vpop.f32.mrf.mxu2 }
 0x3b7   :  { %v4975_v25 = vpop.f32.mrf.mxu1 }
 0x3ba   :  { %v4991_v14 = vpop.f32.mrf.mxu3 }
 0x3bb   :  { %v4987_v21 = vpop.f32.mrf.mxu0 }
 0x3bd   :  { %v1746_v54 = vpop.f32.mrf.mxu2 }
 0x3bf   :  { %v4980_v51 = vpop.f32.mrf.mxu1 }
 0x3c2   :  { %3658 = vmatmul.msk.bf16.gmra.mxu1 %vm1331_vm6, %v3971_v27  ;;  %v4997_v17 = vpop.f32.mrf.mxu3  ;;  %v1598_v27 = vadd.f32 %v1581_v28, %v1514_v9 }
 0x3c3   :  { %v4993_v16 = vpop.f32.mrf.mxu0 }
 0x3c5   :  { %v1749_v3 = vpop.f32.mrf.mxu2 }
 0x3c7   :  { %v4983_v29 = vpop.f32.mrf.mxu1 }
 0x3ca   :  { %v5003_v30 = vpop.f32.mrf.mxu3 }
 0x3cb   :  { %v4999_v37 = vpop.f32.mrf.mxu0 }
 0x3cd   :  { %v1751_v23 = vpop.f32.mrf.mxu2 }
 0x3cf   :  { %v1660_v33 = vpop.f32.mrf.mxu1 }
 0x3d0   :  { %v1680_v57 = vadd.f32 %v1660_v33, %v1596_v55 }
 0x3d2   :  { %v5011_v44 = vpop.f32.mrf.mxu3  ;;  %v1764_v62 = vadd.f32 %v1744_v47, %v1680_v57 }
 0x3d3   :  { %v5005_v41 = vpop.f32.mrf.mxu0 }
 0x3d7   :  { %v1662_v35 = vpop.f32.mrf.mxu1 }
 0x3d8   :  { %v1681_v5 = vadd.f32 %v1662_v35, %v1597_v63 }
 0x3da   :  { %v1828_v48 = vpop.f32.mrf.mxu3  ;;  %v1765_v12 = vadd.f32 %v1746_v54, %v1681_v5 }
 0x3db   :  { %v5013_v46 = vpop.f32.mrf.mxu0  ;;  %v1848_v2 = vadd.f32 %v1828_v48, %v1764_v62  ;;  %v1515_v48 = vadd.f32 %v4985_v32, %v1424_v26  ;;  %v1427_v32 = vadd.f32 %v4989_v34, %v4969_v15 }
 0x3dd   :  { %v1599_v53 = vadd.f32 %v4987_v21, %v1515_v48  ;;  %v1754_v21 = vpop.f32.mrf.mxu2 }
 0x3df   :  { %v1665_v38 = vpop.f32.mrf.mxu1 }
 0x3e0   :  { %v1682_v20 = vadd.f32 %v1665_v38, %v1598_v27 }
 0x3e2   :  { %v1830_v56 = vpop.f32.mrf.mxu3  ;;  %v1766_v38 = vadd.f32 %v1749_v3, %v1682_v20 }
 0x3e3   :  { %v1912_v49 = vpop.f32.mrf.mxu0  ;;  %v1849_v33 = vadd.f32 %v1830_v56, %v1765_v12 }
 0x3e4   :  { %v1932_v0 = vadd.f32 %v1912_v49, %v1848_v2 }
 0x3e5   :  { %v1756_v12 = vpop.f32.mrf.mxu2 }
 0x3e7   :  { %v1667_v40 = vpop.f32.mrf.mxu1 }
 0x3e8   :  { %v1683_v57 = vadd.f32 %v1667_v40, %v1599_v53  ;;  %v1516_v40 = vadd.f32 %v4991_v14, %v1427_v32  ;;  %v1429_v14 = vadd.f32 %v4995_v36, %v4975_v25 }
 0x3ea   :  { %v1833_v1 = vpop.f32.mrf.mxu3  ;;  %v1767_v62 = vadd.f32 %v1751_v23, %v1683_v57  ;;  %v1600_v3 = vadd.f32 %v4993_v16, %v1516_v40 }
 0x3eb   :  { %v1914_v58 = vpop.f32.mrf.mxu0  ;;  %v1850_v54 = vadd.f32 %v1833_v1, %v1766_v38 }
 0x3ec   :  { %v1933_v24 = vadd.f32 %v1914_v58, %v1849_v33 }
 0x3ed   :  { %v1759_v48 = vpop.f32.mrf.mxu2 }
 0x3ef   :  { %v5007_v42 = vpop.f32.mrf.mxu1 }
 0x3f0   :  { %v1684_v6 = vadd.f32 %v5007_v42, %v1600_v3  ;;  %v1517_v42 = vadd.f32 %v4997_v17, %v1429_v14  ;;  %v2053_v17 = vpop.permute.xlu1 %2052 }
 0x3f2   :  { %v1835_v28 = vpop.f32.mrf.mxu3  ;;  %v1768_v9 = vadd.f32 %v1754_v21, %v1684_v6  ;;  %v1601_v27 = vadd.f32 %v4999_v37, %v1517_v42  ;;  %v1432_v37 = vadd.f32 %v5001_v39, %v4980_v51 }
 0x3f3   :  { %v1917_v18 = vpop.f32.mrf.mxu0  ;;  %v1851_v5 = vadd.f32 %v1835_v28, %v1767_v62 }
 0x3f4   :  { %v1934_v58 = vadd.f32 %v1917_v18, %v1850_v54  ;;  %v1518_v26 = vadd.f32 %v5003_v30, %v1432_v37 }
 0x3f7   :  { %v5015_v45 = vpop.f32.mrf.mxu1 }
 0x3f8   :  { %v1685_v25 = vadd.f32 %v5015_v45, %v1601_v27  ;;  %v1602_v45 = vadd.f32 %v5005_v41, %v1518_v26  ;;  %v1434_v41 = vadd.f32 %v5009_v43, %v4983_v29  ;;  %v1761_v29 = vpop.f32.mrf.mxu2  ;;  %v2068_v14 = vpop.permute.xlu1 %2067 }
 0x3fa   :  { %v1838_v2 = vpop.f32.mrf.mxu3 }
 0x3fb   :  { %v1919_v49 = vpop.f32.mrf.mxu0  ;;  %v1852_v33 = vadd.f32 %v1838_v2, %v1768_v9 }
 0x3fc   :  { %v1935_v18 = vadd.f32 %v1919_v49, %v1851_v5  ;;  %v2063_v5 = vpop.permute.xlu0 %2062 }
 0x3ff   :  { %v5017_v50 = vpop.f32.mrf.mxu1 }
 0x400   :  { %v1686_v54 = vadd.f32 %v5017_v50, %v1602_v45 }
 0x402   :  { %v1840_v23 = vpop.f32.mrf.mxu3 }
 0x407   :  { %v5019_v59 = vpop.f32.mrf.mxu1 }
 0x40a   :  { %v1843_v30 = vpop.f32.mrf.mxu3 }
 0x40f   :  { %v2006_v4 = vpop.f32.mrf.mxu1 }
 0x410   :  { %v2026_v19 = vadd.f32 %v2006_v4, %v1932_v0  ;;  %v1922_v0 = vpop.f32.mrf.mxu0 }
 0x411   :  { %v1936_v36 = vadd.f32 %v1922_v0, %v1852_v33 }
 0x412   :  { %v2070_v22 = vadd.f32 %v2036_v13, %v2026_v19  ;;  %v2048_v13 = vpop.permute.xlu2 %2047 }
 0x414   :  { %v5023_v7 = vmax.f32 %v2070_v22, 0.0 }
 0x416   :  { %2096 = vst.sshfl [vmem:[#allocation1] sm:$0xff pattern:$0x73625140] %v5023_v7  ;;  %v3659_v35 = vrot.slane %v5023_v7, 9 }
 0x417   :  { %v2008_v47 = vpop.f32.mrf.mxu1  ;;  %2087 = vst.msk [vmem:[#allocation4] sm:$0x1] %vm2086_vm7, %v5023_v7 }
 0x418   :  { %v2027_v11 = vadd.f32 %v2008_v47, %v1933_v24  ;;  %2091 = vrot.lane.b32.xlu2 %v3659_v35, %s4057_s19  ;;  %v1924_v35 = vpop.f32.mrf.mxu0 }
 0x41a   :  { %v2071_v52 = vadd.f32 %v2040_v8, %v2027_v11  ;;  %v1769_v11 = vadd.f32 %v1756_v12, %v1685_v25 }
 0x41c   :  { %v5033_v55 = vmax.f32 %v2071_v52, 0.0  ;;  %v1853_v38 = vadd.f32 %v1840_v23, %v1769_v11 }
 0x41d   :  { %v2098_v56 = vld [vmem:[#allocation1 + $0x1] ss:$4 sm:$0xff] }
 0x41e   :  { %2104 = vst.sshfl [vmem:[#allocation1] sm:$0xff pattern:$0x73625140] %v5023_v7  ;;  %2099 = vrot.lane.b32.xlu1 %v2098_v56, %s4056_s18  ;;  %v3663_v10 = vrot.slane %v5033_v55, 9  ;;  %v1937_v56 = vadd.f32 %v1924_v35, %v1853_v38 }
 0x41f   :  { %v2011_v31 = vpop.f32.mrf.mxu1  ;;  %2150 = vst.msk [vmem:[#allocation4 + $0x2] sm:$0x1] %vm2086_vm7, %v5033_v55 }
 0x420   :  { %v2028_v61 = vadd.f32 %v2011_v31, %v1934_v58  ;;  %2154 = vrot.lane.b32.xlu0 %v3663_v10, %s4057_s19  ;;  %v1927_v50 = vpop.f32.mrf.mxu0  ;;  %v2058_v10 = vpop.permute.xlu2 %2057  ;;  %v1519_v31 = vadd.f32 %v5011_v44, %v1434_v41 }
 0x422   :  { %v2072_v63 = vadd.f32 %v2044_v60, %v2028_v61  ;;  %v1770_v60 = vadd.f32 %v1759_v48, %v1686_v54  ;;  %v1603_v21 = vadd.f32 %v5013_v46, %v1519_v31  ;;  %v1845_v46 = vpop.f32.mrf.mxu3 }
 0x424   :  { %v5045_v1 = vmax.f32 %v2072_v63, 0.0  ;;  %v1854_v61 = vadd.f32 %v1843_v30, %v1770_v60  ;;  %v1687_v63 = vadd.f32 %v5019_v59, %v1603_v21 }
 0x425   :  { %v2106_v4 = vld [vmem:[#allocation1 + $0x1] ss:$4 sm:$0xff] }
 0x426   :  { %2114 = vst.sshfl [vmem:[#allocation1] sm:$0xff pattern:$0x73625140] %v5023_v7  ;;  %v3667_v15 = vrot.slane %v5045_v1, 9  ;;  %v3660_v34 = vrot.slane %v2106_v4, 9  ;;  %v1938_v43 = vadd.f32 %v1927_v50, %v1854_v61  ;;  %v1771_v0 = vadd.f32 %v1761_v29, %v1687_v63 }
 0x427   :  { %v2013_v19 = vpop.f32.mrf.mxu1  ;;  %2206 = vst.msk [vmem:[#allocation4 + $0x4] sm:$0x1] %vm2086_vm7, %v5045_v1 }
 0x428   :  { %v2029_v16 = vadd.f32 %v2013_v19, %v1935_v18  ;;  %2210 = vrot.lane.b32.xlu1 %v3667_v15, %s4057_s19  ;;  %2109 = vrot.lane.b32.xlu0 %v3660_v34, %s4058_s20  ;;  %v1929_v59 = vpop.f32.mrf.mxu0  ;;  %v1855_v6 = vadd.f32 %v1845_v46, %v1771_v0 }
 0x42a   :  { %v2073_v22 = vadd.f32 %v2048_v13, %v2029_v16  ;;  %v1939_v15 = vadd.f32 %v1929_v59, %v1855_v6 }
 0x42c   :  { %v5058_v20 = vmax.f32 %v2073_v22, 0.0 }
 0x42d   :  { %v2116_v24 = vld [vmem:[#allocation1 + $0x2] ss:$4 sm:$0xff] }
 0x42e   :  { %2122 = vst.sshfl [vmem:[#allocation1] sm:$0xff pattern:$0x73625140] %v5023_v7  ;;  %2117 = vrot.lane.b32.xlu2 %v2116_v24, %s4051_s1  ;;  %v3671_v52 = vrot.slane %v5058_v20, 9 }
 0x42f   :  { %v2016_v47 = vpop.f32.mrf.mxu1  ;;  %2262 = vst.msk [vmem:[#allocation4 + $0x6] sm:$0x1] %vm2086_vm7, %v5058_v20 }
 0x430   :  { %v2030_v8 = vadd.f32 %v2016_v47, %v1936_v36 }
 0x432   :  { %v2074_v28 = vadd.f32 %v2053_v17, %v2030_v8 }
 0x434   :  { %v5069_v49 = vmax.f32 %v2074_v28, 0.0 }
 0x435   :  { %v2124_v53 = vld [vmem:[#allocation1 + $0x2] ss:$4 sm:$0xff] }
 0x436   :  { %2132 = vst.sshfl [vmem:[#allocation1] sm:$0xff pattern:$0x73625140] %v5023_v7  ;;  %2266 = vrot.lane.b32.xlu2 %v3671_v52, %s4057_s19  ;;  %v3661_v51 = vrot.slane %v2124_v53, 9  ;;  %v3675_v39 = vrot.slane %v5069_v49, 9 }
 0x437   :  { %v2018_v57 = vpop.f32.mrf.mxu1  ;;  %2318 = vst.msk [vmem:[#allocation4 + $0x1] sm:$0x1] %vm2086_vm7, %v5069_v49 }
 0x438   :  { %v2031_v58 = vadd.f32 %v2018_v57, %v1937_v56  ;;  %2127 = vrot.lane.b32.xlu1 %v3661_v51, %s4055_s17  ;;  %2322 = vrot.lane.b32.xlu0 %v3675_v39, %s4057_s19 }
 0x43a   :  { %v2075_v32 = vadd.f32 %v2058_v10, %v2031_v58 }
 0x43c   :  { %v5084_v40 = vmax.f32 %v2075_v32, 0.0 }
 0x43d   :  { %v2134_v62 = vld [vmem:[#allocation1 + $0x3] ss:$4 sm:$0xff] }
 0x43e   :  { %2140 = vst.sshfl [vmem:[#allocation1] sm:$0xff pattern:$0x73625140] %v5023_v7  ;;  %v3679_v2 = vrot.slane %v5084_v40, 9 }
 0x43f   :  { %v2021_v3 = vpop.f32.mrf.mxu1  ;;  %2374 = vst.msk [vmem:[#allocation4 + $0x3] sm:$0x1] %vm2086_vm7, %v5084_v40 }
 0x440   :  { %v2032_v44 = vadd.f32 %v2021_v3, %v1938_v43  ;;  %2378 = vrot.lane.b32.xlu1 %v3679_v2, %s4057_s19  ;;  %2135 = vrot.lane.b32.xlu0 %v2134_v62, %s4053_s3 }
 0x442   :  { %v2076_v4 = vadd.f32 %v2063_v5, %v2032_v44 }
 0x444   :  { %v5093_v18 = vmax.f32 %v2076_v4, 0.0 }
 0x445   :  { %v2142_v7 = vld [vmem:[#allocation1 + $0x3] ss:$4 sm:$0xff] }
 0x446   :  { %2158 = vst.sshfl [vmem:[#allocation1] sm:$0xff pattern:$0x73625140] %v5033_v55  ;;  %v3683_v34 = vrot.slane %v5093_v18, 9  ;;  %v3662_v22 = vrot.slane %v2142_v7, 9 }
 0x447   :  { %v2023_v19 = vpop.f32.mrf.mxu1  ;;  %2430 = vst.msk [vmem:[#allocation4 + $0x5] sm:$0x1] %vm2086_vm7, %v5093_v18 }
 0x448   :  { %v2033_v16 = vadd.f32 %v2023_v19, %v1939_v15  ;;  %2434 = vrot.lane.b32.xlu2 %v3683_v34, %s4057_s19 }
 0x44a   :  { %v2077_v13 = vadd.f32 %v2068_v14, %v2033_v16 }
 0x44c   :  { %v5100_v42 = vmax.f32 %v2077_v13, 0.0 }
 0x44d   :  { %v2160_v9 = vld [vmem:[#allocation1 + $0x1] ss:$4 sm:$0xff] }
 0x44e   :  { %2165 = vst.sshfl [vmem:[#allocation1] sm:$0xff pattern:$0x73625140] %v5033_v55  ;;  %v3687_v12 = vrot.slane %v5100_v42, 9 }
 0x44f   :  { %2486 = vst.msk [vmem:[#allocation4 + $0x7] sm:$0x1] %vm2086_vm7, %v5100_v42 }
 0x450   :  { %2490 = vrot.lane.b32.xlu0 %v3687_v12, %s4057_s19  ;;  %2145 = vrot.lane.b32.xlu2 %v3662_v22, %s4054_s16 }
 0x455   :  { %v2167_v27 = vld [vmem:[#allocation1 + $0x1] ss:$4 sm:$0xff] }
 0x456   :  { %2174 = vst.sshfl [vmem:[#allocation1] sm:$0xff pattern:$0x73625140] %v5033_v55  ;;  %v3664_v33 = vrot.slane %v2167_v27, 9 }
 0x458   :  { %2170 = vrot.lane.b32.xlu1 %v3664_v33, %s4058_s20  ;;  %2161 = vrot.lane.b32.xlu2 %v2160_v9, %s4056_s18 }
 0x45d   :  { %v2176_v23 = vld [vmem:[#allocation1 + $0x2] ss:$4 sm:$0xff] }
 0x45e   :  { %2181 = vst.sshfl [vmem:[#allocation1] sm:$0xff pattern:$0x73625140] %v5033_v55  ;;  %2177 = vrot.lane.b32.xlu0 %v2176_v23, %s4051_s1 }
 0x465   :  { %v2183_v24 = vld [vmem:[#allocation1 + $0x2] ss:$4 sm:$0xff] }
 0x466   :  { %2190 = vst.sshfl [vmem:[#allocation1] sm:$0xff pattern:$0x73625140] %v5033_v55  ;;  %v3665_v25 = vrot.slane %v2183_v24, 9 }
 0x468   :  { %2186 = vrot.lane.b32.xlu2 %v3665_v25, %s4055_s17 }
 0x46d   :  { %v2192_v36 = vld [vmem:[#allocation1 + $0x3] ss:$4 sm:$0xff] }
 0x46e   :  { %2197 = vst.sshfl [vmem:[#allocation1] sm:$0xff pattern:$0x73625140] %v5033_v55  ;;  %2193 = vrot.lane.b32.xlu1 %v2192_v36, %s4053_s3 }
 0x472   :  { %v2092_v35 = vpop.permute.xlu2 %2091 }
 0x473   :  { %2095 = vst.msk [vmem:[#allocation4] sm:$0x1] %vm2094_vm8, %v2092_v35 }
 0x475   :  { %v2199_v47 = vld [vmem:[#allocation1 + $0x3] ss:$4 sm:$0xff] }
 0x476   :  { %2214 = vst.sshfl [vmem:[#allocation1] sm:$0xff pattern:$0x73625140] %v5045_v1  ;;  %v3666_v17 = vrot.slane %v2199_v47, 9 }
 0x478   :  { %2202 = vrot.lane.b32.xlu0 %v3666_v17, %s4054_s16 }
 0x47d   :  { %v2216_v37 = vld [vmem:[#allocation1 + $0x1] ss:$4 sm:$0xff] }
 0x47e   :  { %2221 = vst.sshfl [vmem:[#allocation1] sm:$0xff pattern:$0x73625140] %v5045_v1 }
 0x480   :  { %2217 = vrot.lane.b32.xlu0 %v2216_v37, %s4056_s18 }
 0x485   :  { %v2223_v8 = vld [vmem:[#allocation1 + $0x1] ss:$4 sm:$0xff] }
 0x486   :  { %2230 = vst.sshfl [vmem:[#allocation1] sm:$0xff pattern:$0x73625140] %v5045_v1  ;;  %v3668_v55 = vrot.slane %v2223_v8, 9 }
 0x488   :  { %2226 = vrot.lane.b32.xlu2 %v3668_v55, %s4058_s20  ;;  %v2118_v26 = vpop.permute.xlu2 %2117 }
 0x48d   :  { %v2232_v11 = vld [vmem:[#allocation1 + $0x2] ss:$4 sm:$0xff] }
 0x48e   :  { %2237 = vst.sshfl [vmem:[#allocation1] sm:$0xff pattern:$0x73625140] %v5045_v1  ;;  %2233 = vrot.lane.b32.xlu1 %v2232_v11, %s4051_s1 }
 0x490   :  { %v2100_v28 = vpop.permute.xlu1 %2099  ;;  %v2267_v45 = vpop.permute.xlu2 %2266 }
 0x491   :  { %2103 = vst.msk [vmem:[#allocation4] sm:$0x1] %vm2102_vm9, %v2100_v28 }
 0x492   :  { %2269 = vst.msk [vmem:[#allocation4 + $0x6] sm:$0x1] %vm2094_vm8, %v2267_v45  ;;  %v2155_v48 = vpop.permute.xlu0 %2154 }
 0x493   :  { %2157 = vst.msk [vmem:[#allocation4 + $0x2] sm:$0x1] %vm2094_vm8, %v2155_v48 }
 0x495   :  { %v2239_v38 = vld [vmem:[#allocation1 + $0x2] ss:$4 sm:$0xff] }
 0x496   :  { %2246 = vst.sshfl [vmem:[#allocation1] sm:$0xff pattern:$0x73625140] %v5045_v1  ;;  %v3669_v52 = vrot.slane %v2239_v38, 9 }
 0x498   :  { %2242 = vrot.lane.b32.xlu0 %v3669_v52, %s4055_s17 }
 0x49a   :  { %v2211_v53 = vpop.permute.xlu1 %2210  ;;  %v2110_v54 = vpop.permute.xlu0 %2109 }
 0x49b   :  { %2213 = vst.msk [vmem:[#allocation4 + $0x4] sm:$0x1] %vm2094_vm8, %v2211_v53 }
 0x49c   :  { %2113 = vst.msk [vmem:[#allocation4] sm:$0x1] %vm2112_vm10, %v2110_v54 }
 0x49d   :  { %v2248_v56 = vld [vmem:[#allocation1 + $0x3] ss:$4 sm:$0xff]  ;;  %2121 = vst.msk [vmem:[#allocation4] sm:$0x1] %vm2120_vm11, %v2118_v26 }
 0x49e   :  { %2253 = vst.sshfl [vmem:[#allocation1] sm:$0xff pattern:$0x73625140] %v5045_v1  ;;  %2249 = vrot.lane.b32.xlu2 %v2248_v56, %s4053_s3 }
 0x4a2   :  { %v2435_v51 = vpop.permute.xlu2 %2434 }
 0x4a3   :  { %2437 = vst.msk [vmem:[#allocation4 + $0x5] sm:$0x1] %vm2094_vm8, %v2435_v51 }
 0x4a5   :  { %v2255_v39 = vld [vmem:[#allocation1 + $0x3] ss:$4 sm:$0xff] }
 0x4a6   :  { %2270 = vst.sshfl [vmem:[#allocation1] sm:$0xff pattern:$0x73625140] %v5058_v20  ;;  %v3670_v30 = vrot.slane %v2255_v39, 9 }
 0x4a8   :  { %2258 = vrot.lane.b32.xlu1 %v3670_v30, %s4054_s16 }
 0x4aa   :  { %v2128_v57 = vpop.permute.xlu1 %2127  ;;  %v2323_v41 = vpop.permute.xlu0 %2322 }
 0x4ab   :  { %2131 = vst.msk [vmem:[#allocation4] sm:$0x1] %vm2130_vm12, %v2128_v57  ;;  %v2146_v58 = vpop.permute.xlu2 %2145 }
 0x4ac   :  { %2325 = vst.msk [vmem:[#allocation4 + $0x1] sm:$0x1] %vm2094_vm8, %v2323_v41 }
 0x4ad   :  { %v2272_v1 = vld [vmem:[#allocation1 + $0x1] ss:$4 sm:$0xff] }
 0x4ae   :  { %2277 = vst.sshfl [vmem:[#allocation1] sm:$0xff pattern:$0x73625140] %v5058_v20 }
 0x4b0   :  { %2273 = vrot.lane.b32.xlu1 %v2272_v1, %s4056_s18 }
 0x4b2   :  { %v2379_v50 = vpop.permute.xlu1 %2378  ;;  %v2136_v10 = vpop.permute.xlu0 %2135 }
 0x4b3   :  { %2381 = vst.msk [vmem:[#allocation4 + $0x3] sm:$0x1] %vm2094_vm8, %v2379_v50  ;;  %v2162_v31 = vpop.permute.xlu2 %2161 }
 0x4b4   :  { %2139 = vst.msk [vmem:[#allocation4] sm:$0x1] %vm2138_vm13, %v2136_v10 }
 0x4b5   :  { %2149 = vst.msk [vmem:[#allocation4] sm:$0x1] %vm2148_vm14, %v2146_v58  ;;  %v2279_v60 = vld [vmem:[#allocation1 + $0x1] ss:$4 sm:$0xff] }
 0x4b6   :  { %2164 = vst.msk [vmem:[#allocation4 + $0x2] sm:$0x1] %vm2102_vm9, %v2162_v31  ;;  %v3672_v32 = vrot.slane %v2279_v60, 9 }
 0x4b7   :  { %2286 = vst.sshfl [vmem:[#allocation1] sm:$0xff pattern:$0x73625140] %v5058_v20 }
 0x4b8   :  { %2282 = vrot.lane.b32.xlu0 %v3672_v32, %s4058_s20 }
 0x4be   :  { %v2288_v21 = vld [vmem:[#allocation1 + $0x2] ss:$4 sm:$0xff] }
 0x4bf   :  { %2289 = vrot.lane.b32.xlu2 %v2288_v21, %s4051_s1  ;;  %2293 = vst.sshfl [vmem:[#allocation1] sm:$0xff pattern:$0x73625140] %v5058_v20 }
 0x4c2   :  { %v2491_v61 = vpop.permute.xlu0 %2490  ;;  %v2187_v3 = vpop.permute.xlu2 %2186 }
 0x4c3   :  { %2493 = vst.msk [vmem:[#allocation4 + $0x7] sm:$0x1] %vm2094_vm8, %v2491_v61 }
 0x4c6   :  { %v2295_v62 = vld [vmem:[#allocation1 + $0x2] ss:$4 sm:$0xff] }
 0x4c7   :  { %v3673_v63 = vrot.slane %v2295_v62, 9  ;;  %2302 = vst.sshfl [vmem:[#allocation1] sm:$0xff pattern:$0x73625140] %v5058_v20 }
 0x4c9   :  { %2298 = vrot.lane.b32.xlu1 %v3673_v63, %s4055_s17 }
 0x4ca   :  { %v2171_v29 = vpop.permute.xlu1 %2170 }
 0x4cb   :  { %2173 = vst.msk [vmem:[#allocation4 + $0x2] sm:$0x1] %vm2112_vm10, %v2171_v29 }
 0x4ce   :  { %v2304_v43 = vld [vmem:[#allocation1 + $0x3] ss:$4 sm:$0xff] }
 0x4cf   :  { %2305 = vrot.lane.b32.xlu0 %v2304_v43, %s4053_s3  ;;  %2309 = vst.sshfl [vmem:[#allocation1] sm:$0xff pattern:$0x73625140] %v5058_v20 }
 0x4d0   :  { %v2178_v2 = vpop.permute.xlu0 %2177 }
 0x4d1   :  { %2180 = vst.msk [vmem:[#allocation4 + $0x2] sm:$0x1] %vm2120_vm11, %v2178_v2 }
 0x4d2   :  { %2189 = vst.msk [vmem:[#allocation4 + $0x2] sm:$0x1] %vm2130_vm12, %v2187_v3 }
 0x4d6   :  { %v2311_v5 = vld [vmem:[#allocation1 + $0x3] ss:$4 sm:$0xff] }
 0x4d7   :  { %v3674_v44 = vrot.slane %v2311_v5, 9  ;;  %2326 = vst.sshfl [vmem:[#allocation1] sm:$0xff pattern:$0x73625140] %v5069_v49 }
 0x4d9   :  { %2314 = vrot.lane.b32.xlu2 %v3674_v44, %s4054_s16 }
 0x4de   :  { %v2328_v46 = vld [vmem:[#allocation1 + $0x1] ss:$4 sm:$0xff] }
 0x4df   :  { %2333 = vst.sshfl [vmem:[#allocation1] sm:$0xff pattern:$0x73625140] %v5069_v49 }
 0x4e0   :  { %v2194_v0 = vpop.permute.xlu1 %2193 }
 0x4e1   :  { %2196 = vst.msk [vmem:[#allocation4 + $0x2] sm:$0x1] %vm2138_vm13, %v2194_v0  ;;  %2329 = vrot.lane.b32.xlu2 %v2328_v46, %s4056_s18 }
 0x4e2   :  { %v2227_v15 = vpop.permute.xlu2 %2226 }
 0x4e6   :  { %v2335_v20 = vld [vmem:[#allocation1 + $0x1] ss:$4 sm:$0xff] }
 0x4e7   :  { %v3676_v4 = vrot.slane %v2335_v20, 9  ;;  %2342 = vst.sshfl [vmem:[#allocation1] sm:$0xff pattern:$0x73625140] %v5069_v49 }
 0x4e9   :  { %2338 = vrot.lane.b32.xlu1 %v3676_v4, %s4058_s20  ;;  %v3981_v4 = vld [vmem:[%s5363_s5 + $0x38] sm:$0xff] }
 0x4ea   :  { %v2203_v59 = vpop.permute.xlu0 %2202  ;;  %2814 = vmatpush.bf16.msrb.mxu2 %v3981_v4 }
 0x4eb   :  { %2205 = vst.msk [vmem:[#allocation4 + $0x2] sm:$0x1] %vm2148_vm14, %v2203_v59  ;;  %v3980_v59 = vld [vmem:[%s5363_s5 + $0x30] sm:$0xff] }
 0x4ee   :  { %v2344_v6 = vld [vmem:[#allocation1 + $0x2] ss:$4 sm:$0xff]  ;;  %2815 = vmatpush.bf16.msrb.mxu2 %v3980_v59 }
 0x4ef   :  { %2345 = vrot.lane.b32.xlu0 %v2344_v6, %s4051_s1  ;;  %2349 = vst.sshfl [vmem:[#allocation1] sm:$0xff pattern:$0x73625140] %v5069_v49  ;;  %v3989_v6 = vld [vmem:[%s5363_s5 + $0x78] sm:$0xff] }
 0x4f0   :  { %2827 = vmatpush.bf16.msra.mxu3 %v3989_v6 }
 0x4f2   :  { %v2218_v7 = vpop.permute.xlu0 %2217 }
 0x4f3   :  { %2220 = vst.msk [vmem:[#allocation4 + $0x4] sm:$0x1] %vm2102_vm9, %v2218_v7  ;;  %v3997_v7 = vld [vmem:[%s5363_s5 + $0xb8] sm:$0xff] }
 0x4f4   :  { %2229 = vst.msk [vmem:[#allocation4 + $0x4] sm:$0x1] %vm2112_vm10, %v2227_v15  ;;  %2840 = vmatpush.bf16.msra.mxu0 %v3997_v7  ;;  %v3979_v15 = vld [vmem:[%s5363_s5 + $0x28] sm:$0xff] }
 0x4f5   :  { %2816 = vmatpush.bf16.msrb.mxu2 %v3979_v15 }
 0x4f6   :  { %v2351_v34 = vld [vmem:[#allocation1 + $0x2] ss:$4 sm:$0xff] }
 0x4f7   :  { %v3677_v19 = vrot.slane %v2351_v34, 9  ;;  %2358 = vst.sshfl [vmem:[#allocation1] sm:$0xff pattern:$0x73625140] %v5069_v49  ;;  %v3978_v34 = vld [vmem:[%s5363_s5 + $0x20] sm:$0xff] }
 0x4f8   :  { %v2250_v22 = vpop.permute.xlu2 %2249 }
 0x4f9   :  { %2354 = vrot.lane.b32.xlu2 %v3677_v19, %s4055_s17  ;;  %2817 = vmatpush.bf16.msrb.mxu2 %v3978_v34  ;;  %v3977_v19 = vld [vmem:[%s5363_s5 + $0x18] sm:$0xff] }
 0x4fd   :  { %2818 = vmatpush.bf16.msrb.mxu2 %v3977_v19 }
 0x4fe   :  { %v2360_v14 = vld [vmem:[#allocation1 + $0x3] ss:$4 sm:$0xff] }
 0x4ff   :  { %2361 = vrot.lane.b32.xlu1 %v2360_v14, %s4053_s3  ;;  %2365 = vst.sshfl [vmem:[#allocation1] sm:$0xff pattern:$0x73625140] %v5069_v49  ;;  %v3988_v14 = vld [vmem:[%s5363_s5 + $0x70] sm:$0xff] }
 0x500   :  { %v2234_v16 = vpop.permute.xlu1 %2233  ;;  %2828 = vmatpush.bf16.msra.mxu3 %v3988_v14 }
 0x501   :  { %2236 = vst.msk [vmem:[#allocation4 + $0x4] sm:$0x1] %vm2120_vm11, %v2234_v16  ;;  %v3996_v16 = vld [vmem:[%s5363_s5 + $0xb0] sm:$0xff] }
 0x502   :  { %2841 = vmatpush.bf16.msra.mxu0 %v3996_v16 }
 0x506   :  { %v2367_v13 = vld [vmem:[#allocation1 + $0x3] ss:$4 sm:$0xff] }
 0x507   :  { %v3678_v9 = vrot.slane %v2367_v13, 9  ;;  %2382 = vst.sshfl [vmem:[#allocation1] sm:$0xff pattern:$0x73625140] %v5084_v40 }
 0x509   :  { %2370 = vrot.lane.b32.xlu0 %v3678_v9, %s4054_s16  ;;  %v3976_v9 = vld [vmem:[%s5363_s5 + $0x10] sm:$0xff] }
 0x50a   :  { %v2243_v12 = vpop.permute.xlu0 %2242  ;;  %2819 = vmatpush.bf16.msrb.mxu2 %v3976_v9 }
 0x50b   :  { %2245 = vst.msk [vmem:[#allocation4 + $0x4] sm:$0x1] %vm2130_vm12, %v2243_v12  ;;  %v3987_v12 = vld [vmem:[%s5363_s5 + $0x68] sm:$0xff] }
 0x50c   :  { %2252 = vst.msk [vmem:[#allocation4 + $0x4] sm:$0x1] %vm2138_vm13, %v2250_v22  ;;  %v3995_v22 = vld [vmem:[%s5363_s5 + $0xa8] sm:$0xff]  ;;  %2829 = vmatpush.bf16.msra.mxu3 %v3987_v12 }
 0x50d   :  { %2842 = vmatpush.bf16.msra.mxu0 %v3995_v22 }
 0x50e   :  { %v2384_v27 = vld [vmem:[#allocation1 + $0x1] ss:$4 sm:$0xff] }
 0x50f   :  { %2389 = vst.sshfl [vmem:[#allocation1] sm:$0xff pattern:$0x73625140] %v5084_v40 }
 0x511   :  { %2385 = vrot.lane.b32.xlu0 %v2384_v27, %s4056_s18  ;;  %v3975_v27 = vld [vmem:[%s5363_s5 + $0x8] sm:$0xff] }
 0x512   :  { %2820 = vmatpush.bf16.msrb.mxu2 %v3975_v27 }
 0x516   :  { %v2391_v49 = vld [vmem:[#allocation1 + $0x1] ss:$4 sm:$0xff] }
 0x517   :  { %v3680_v33 = vrot.slane %v2391_v49, 9  ;;  %2398 = vst.sshfl [vmem:[#allocation1] sm:$0xff pattern:$0x73625140] %v5084_v40  ;;  %v3986_v49 = vld [vmem:[%s5363_s5 + $0x60] sm:$0xff] }
 0x518   :  { %2830 = vmatpush.bf16.msra.mxu3 %v3986_v49 }
 0x519   :  { %2394 = vrot.lane.b32.xlu2 %v3680_v33, %s4058_s20  ;;  %v2290_v17 = vpop.permute.xlu2 %2289  ;;  %v3994_v33 = vld [vmem:[%s5363_s5 + $0xa0] sm:$0xff] }
 0x51a   :  { %v2259_v23 = vpop.permute.xlu1 %2258  ;;  %2843 = vmatpush.bf16.msra.mxu0 %v3994_v33 }
 0x51b   :  { %2261 = vst.msk [vmem:[#allocation4 + $0x4] sm:$0x1] %vm2148_vm14, %v2259_v23 }
 0x51e   :  { %v2400_v24 = vld [vmem:[#allocation1 + $0x2] ss:$4 sm:$0xff] }
 0x51f   :  { %2401 = vrot.lane.b32.xlu1 %v2400_v24, %s4051_s1  ;;  %2405 = vst.sshfl [vmem:[#allocation1] sm:$0xff pattern:$0x73625140] %v5084_v40 }
 0x522   :  { %v2274_v25 = vpop.permute.xlu1 %2273 }
 0x523   :  { %2276 = vst.msk [vmem:[#allocation4 + $0x6] sm:$0x1] %vm2102_vm9, %v2274_v25  ;;  %v3974_v25 = vld [vmem:[%s5363_s5] sm:$0xff] }
 0x524   :  { %2821 = vmatpush.bf16.msrb.mxu2 %v3974_v25 }
 0x526   :  { %v2407_v36 = vld [vmem:[#allocation1 + $0x2] ss:$4 sm:$0xff] }
 0x527   :  { %v3681_v35 = vrot.slane %v2407_v36, 9  ;;  %2414 = vst.sshfl [vmem:[#allocation1] sm:$0xff pattern:$0x73625140] %v5084_v40  ;;  %v3985_v36 = vld [vmem:[%s5363_s5 + $0x58] sm:$0xff] }
 0x528   :  { %2831 = vmatpush.bf16.msra.mxu3 %v3985_v36 }
 0x529   :  { %2410 = vrot.lane.b32.xlu0 %v3681_v35, %s4055_s17  ;;  %v3993_v35 = vld [vmem:[%s5363_s5 + $0x98] sm:$0xff] }
 0x52a   :  { %v2283_v47 = vpop.permute.xlu0 %2282  ;;  %2844 = vmatpush.bf16.msra.mxu0 %v3993_v35 }
 0x52b   :  { %2285 = vst.msk [vmem:[#allocation4 + $0x6] sm:$0x1] %vm2112_vm10, %v2283_v47  ;;  %v4005_v47 = vld [vmem:[%s5363_s5 + $0xf8] sm:$0xff] }
 0x52c   :  { %2292 = vst.msk [vmem:[#allocation4 + $0x6] sm:$0x1] %vm2120_vm11, %v2290_v17  ;;  %2853 = vmatpush.bf16.msra.mxu2 %v4005_v47 }
 0x52e   :  { %v2416_v37 = vld [vmem:[#allocation1 + $0x3] ss:$4 sm:$0xff] }
 0x52f   :  { %2421 = vst.sshfl [vmem:[#allocation1] sm:$0xff pattern:$0x73625140] %v5084_v40  ;;  %2417 = vrot.lane.b32.xlu2 %v2416_v37, %s4053_s3  ;;  %v3984_v37 = vld [vmem:[%s5363_s5 + $0x50] sm:$0xff] }
 0x530   :  { %2832 = vmatpush.bf16.msra.mxu3 %v3984_v37 }
 0x533   :  { %v2315_v8 = vpop.permute.xlu2 %2314 }
 0x536   :  { %v5194_v55 = vld [vmem:[#allocation1 + $0x3] ss:$4 sm:$0xff] }
 0x537   :  { %2438 = vst.sshfl [vmem:[#allocation1] sm:$0xff pattern:$0x73625140] %v5093_v18  ;;  %v3682_v63 = vrot.slane %v5194_v55, 9  ;;  %v4004_v55 = vld [vmem:[%s5363_s5 + $0xf0] sm:$0xff] }
 0x538   :  { %2854 = vmatpush.bf16.msra.mxu2 %v4004_v55 }
 0x53b   :  { %v2299_v26 = vpop.permute.xlu1 %2298  ;;  %v2330_v11 = vpop.permute.xlu2 %2329 }
 0x53c   :  { %2301 = vst.msk [vmem:[#allocation4 + $0x6] sm:$0x1] %vm2130_vm12, %v2299_v26  ;;  %v3983_v26 = vld [vmem:[%s5363_s5 + $0x48] sm:$0xff] }
 0x53d   :  { %2332 = vst.msk [vmem:[#allocation4 + $0x1] sm:$0x1] %vm2102_vm9, %v2330_v11  ;;  %v3991_v11 = vld [vmem:[%s5363_s5 + $0x88] sm:$0xff]  ;;  %2833 = vmatpush.bf16.msra.mxu3 %v3983_v26 }
 0x53e   :  { %v2440_v28 = vld [vmem:[#allocation1 + $0x1] ss:$4 sm:$0xff] }
 0x53f   :  { %2441 = vrot.lane.b32.xlu1 %v2440_v28, %s4056_s18  ;;  %2445 = vst.sshfl [vmem:[#allocation1] sm:$0xff pattern:$0x73625140] %v5093_v18  ;;  %v4003_v28 = vld [vmem:[%s5363_s5 + $0xe8] sm:$0xff] }
 0x540   :  { %2855 = vmatpush.bf16.msra.mxu2 %v4003_v28 }
 0x541   :  { %v2306_v45 = vpop.permute.xlu0 %2305 }
 0x542   :  { %2308 = vst.msk [vmem:[#allocation4 + $0x6] sm:$0x1] %vm2138_vm13, %v2306_v45  ;;  %v3982_v45 = vld [vmem:[%s5363_s5 + $0x40] sm:$0xff] }
 0x543   :  { %2317 = vst.msk [vmem:[#allocation4 + $0x6] sm:$0x1] %vm2148_vm14, %v2315_v8  ;;  %v3992_v8 = vld [vmem:[%s5363_s5 + $0x90] sm:$0xff]  ;;  %2834 = vmatpush.bf16.msra.mxu3 %v3982_v45 }
 0x544   :  { %2845 = vmatpush.bf16.msra.mxu0 %v3992_v8 }
 0x546   :  { %v2447_v40 = vld [vmem:[#allocation1 + $0x1] ss:$4 sm:$0xff] }
 0x547   :  { %v3684_v48 = vrot.slane %v2447_v40, 9  ;;  %2454 = vst.sshfl [vmem:[#allocation1] sm:$0xff pattern:$0x73625140] %v5093_v18  ;;  %v3990_v40 = vld [vmem:[%s5363_s5 + $0x80] sm:$0xff] }
 0x548   :  { %2846 = vmatpush.bf16.msra.mxu0 %v3991_v11 }
 0x549   :  { %2450 = vrot.lane.b32.xlu0 %v3684_v48, %s4058_s20  ;;  %v4002_v48 = vld [vmem:[%s5363_s5 + $0xe0] sm:$0xff] }
 0x54a   :  { %2856 = vmatpush.bf16.msra.mxu2 %v4002_v48 }
 0x54c   :  { %2847 = vmatpush.bf16.msra.mxu0 %v3990_v40 }
 0x54e   :  { %v2456_v38 = vld [vmem:[#allocation1 + $0x2] ss:$4 sm:$0xff] }
 0x54f   :  { %2457 = vrot.lane.b32.xlu2 %v2456_v38, %s4051_s1  ;;  %2461 = vst.sshfl [vmem:[#allocation1] sm:$0xff pattern:$0x73625140] %v5093_v18  ;;  %v4001_v38 = vld [vmem:[%s5363_s5 + $0xd8] sm:$0xff] }
 0x550   :  { %2857 = vmatpush.bf16.msra.mxu2 %v4001_v38 }
 0x553   :  { %v2355_v39 = vpop.permute.xlu2 %2354 }
 0x556   :  { %v2463_v52 = vld [vmem:[#allocation1 + $0x2] ss:$4 sm:$0xff] }
 0x557   :  { %v3685_v53 = vrot.slane %v2463_v52, 9  ;;  %2470 = vst.sshfl [vmem:[#allocation1] sm:$0xff pattern:$0x73625140] %v5093_v18 }
 0x559   :  { %2466 = vrot.lane.b32.xlu1 %v3685_v53, %s4055_s17  ;;  %v4000_v53 = vld [vmem:[%s5363_s5 + $0xd0] sm:$0xff] }
 0x55a   :  { %2858 = vmatpush.bf16.msra.mxu2 %v4000_v53 }
 0x55b   :  { %v2339_v54 = vpop.permute.xlu1 %2338 }
 0x55c   :  { %2341 = vst.msk [vmem:[#allocation4 + $0x1] sm:$0x1] %vm2112_vm10, %v2339_v54  ;;  %v3999_v54 = vld [vmem:[%s5363_s5 + $0xc8] sm:$0xff] }
 0x55e   :  { %v2472_v56 = vld [vmem:[#allocation1 + $0x3] ss:$4 sm:$0xff]  ;;  %2859 = vmatpush.bf16.msra.mxu2 %v3999_v54 }
 0x55f   :  { %2477 = vst.sshfl [vmem:[#allocation1] sm:$0xff pattern:$0x73625140] %v5093_v18  ;;  %2473 = vrot.lane.b32.xlu0 %v2472_v56, %s4053_s3 }
 0x561   :  { %v2346_v51 = vpop.permute.xlu0 %2345 }
 0x562   :  { %2348 = vst.msk [vmem:[#allocation4 + $0x1] sm:$0x1] %vm2120_vm11, %v2346_v51  ;;  %v3998_v51 = vld [vmem:[%s5363_s5 + $0xc0] sm:$0xff] }
 0x563   :  { %2357 = vst.msk [vmem:[#allocation4 + $0x1] sm:$0x1] %vm2130_vm12, %v2355_v39  ;;  %2860 = vmatpush.bf16.msra.mxu2 %v3998_v51 }
 0x566   :  { %v2479_v30 = vld [vmem:[#allocation1 + $0x3] ss:$4 sm:$0xff] }
 0x567   :  { %2494 = vst.sshfl [vmem:[#allocation1] sm:$0xff pattern:$0x73625140] %v5100_v42  ;;  %v3686_v61 = vrot.slane %v2479_v30, 9 }
 0x56e   :  { %v2496_v57 = vld [vmem:[#allocation1 + $0x1] ss:$4 sm:$0xff] }
 0x56f   :  { %2497 = vrot.lane.b32.xlu2 %v2496_v57, %s4056_s18  ;;  %2501 = vst.sshfl [vmem:[#allocation1] sm:$0xff pattern:$0x73625140] %v5100_v42 }
 0x571   :  { %v2362_v41 = vpop.permute.xlu1 %2361 }
 0x572   :  { %2364 = vst.msk [vmem:[#allocation4 + $0x1] sm:$0x1] %vm2138_vm13, %v2362_v41 }
 0x573   :  { %v2395_v31 = vpop.permute.xlu2 %2394 }
 0x576   :  { %v2503_v18 = vld [vmem:[#allocation1 + $0x1] ss:$4 sm:$0xff] }
 0x577   :  { %v3688_v58 = vrot.slane %v2503_v18, 9  ;;  %2510 = vst.sshfl [vmem:[#allocation1] sm:$0xff pattern:$0x73625140] %v5100_v42 }
 0x579   :  { %2506 = vrot.lane.b32.xlu1 %v3688_v58, %s4058_s20 }
 0x57b   :  { %v2371_v1 = vpop.permute.xlu0 %2370 }
 0x57c   :  { %2373 = vst.msk [vmem:[#allocation4 + $0x1] sm:$0x1] %vm2148_vm14, %v2371_v1 }
 0x57e   :  { %v2512_v50 = vld [vmem:[#allocation1 + $0x2] ss:$4 sm:$0xff] }
 0x57f   :  { %2513 = vrot.lane.b32.xlu0 %v2512_v50, %s4051_s1  ;;  %2517 = vst.sshfl [vmem:[#allocation1] sm:$0xff pattern:$0x73625140] %v5100_v42 }
 0x583   :  { %v2386_v10 = vpop.permute.xlu0 %2385 }
 0x584   :  { %2388 = vst.msk [vmem:[#allocation4 + $0x3] sm:$0x1] %vm2102_vm9, %v2386_v10 }
 0x585   :  { %2397 = vst.msk [vmem:[#allocation4 + $0x3] sm:$0x1] %vm2112_vm10, %v2395_v31 }
 0x586   :  { %v2519_v60 = vld [vmem:[#allocation1 + $0x2] ss:$4 sm:$0xff] }
 0x587   :  { %v3689_v32 = vrot.slane %v2519_v60, 9  ;;  %2526 = vst.sshfl [vmem:[#allocation1] sm:$0xff pattern:$0x73625140] %v5100_v42  ;;  %v4007_v60 = vld [vmem:[%s5364_s6 + $0x8] sm:$0xff] }
 0x588   :  { %2894 = vmatpush.bf16.msrb.mxu3 %v4007_v60 }
 0x589   :  { %2522 = vrot.lane.b32.xlu2 %v3689_v32, %s4055_s17  ;;  %v2418_v3 = vpop.permute.xlu2 %2417  ;;  %v4006_v32 = vld [vmem:[%s5364_s6] sm:$0xff]  ;;  %s4060_s6 = smov [#allocation5]  }
 0x58a   :  { %s2908_s12 = sshll.u32 %s4060_s6, 4  ;;  %s2909_s12 = int_to_ptr.vmem [resolvable:$true] %s2908_s12 }
 0x58c   :  { %2895 = vmatpush.bf16.msrb.mxu3 %v4006_v32 }
 0x58e   :  { %v2528_v21 = vld [vmem:[#allocation1 + $0x3] ss:$4 sm:$0xff] }
 0x58f   :  { %2529 = vrot.lane.b32.xlu1 %v2528_v21, %s4053_s3  ;;  %2533 = vst.sshfl [vmem:[#allocation1] sm:$0xff pattern:$0x73625140] %v5100_v42 }
 0x591   :  { %v2402_v62 = vpop.permute.xlu1 %2401  ;;  %2482 = vrot.lane.b32.xlu2 %v3686_v61, %s4054_s16  ;;  %v42_v61 = vld [vmem:[%s5366_s8] sm:$0x3] }
 0x592   :  { %2404 = vst.msk [vmem:[#allocation4 + $0x3] sm:$0x1] %vm2120_vm11, %v2402_v62  ;;  %v2872_v6 = vperm.slane %v42_v61, 1 }
 0x596   :  { %v2535_v29 = vld [vmem:[#allocation1 + $0x3] ss:$4 sm:$0xff] }
 0x597   :  { %2426 = vrot.lane.b32.xlu1 %v3682_v63, %s4054_s16  ;;  %v3690_v43 = vrot.slane %v2535_v29, 9  ;;  %v2621_v29 = vperm.slane %v42_v61, 0 }
 0x599   :  { %2538 = vrot.lane.b32.xlu0 %v3690_v43, %s4054_s16 }
 0x59b   :  { %v2411_v2 = vpop.permute.xlu0 %2410 }
 0x59c   :  { %2413 = vst.msk [vmem:[#allocation4 + $0x3] sm:$0x1] %vm2130_vm12, %v2411_v2 }
 0x59d   :  { %2420 = vst.msk [vmem:[#allocation4 + $0x3] sm:$0x1] %vm2138_vm13, %v2418_v3 }
 0x5a9   :  { %v2458_v44 = vpop.permute.xlu2 %2457 }
 0x5b1   :  { %v2442_v42 = vpop.permute.xlu1 %2441 }
 0x5b2   :  { %2444 = vst.msk [vmem:[#allocation4 + $0x5] sm:$0x1] %vm2102_vm9, %v2442_v42 }
 0x5bb   :  { %v2451_v5 = vpop.permute.xlu0 %2450 }
 0x5bc   :  { %2453 = vst.msk [vmem:[#allocation4 + $0x5] sm:$0x1] %vm2112_vm10, %v2451_v5 }
 0x5bd   :  { %2460 = vst.msk [vmem:[#allocation4 + $0x5] sm:$0x1] %vm2120_vm11, %v2458_v44 }
 0x5c9   :  { %v2498_v46 = vpop.permute.xlu2 %2497 }
 0x5ca   :  { %2500 = vst.msk [vmem:[#allocation4 + $0x7] sm:$0x1] %vm2102_vm9, %v2498_v46 }
 0x5cb   :  { %v2467_v0 = vpop.permute.xlu1 %2466 }
 0x5cc   :  { %2469 = vst.msk [vmem:[#allocation4 + $0x5] sm:$0x1] %vm2130_vm12, %v2467_v0 }
 0x5d1   :  { %v2474_v20 = vpop.permute.xlu0 %2473 }
 0x5d2   :  { %2476 = vst.msk [vmem:[#allocation4 + $0x5] sm:$0x1] %vm2138_vm13, %v2474_v20 }
 0x5e3   :  { %v2523_v13 = vpop.permute.xlu2 %2522 }
 0x5eb   :  { %v2507_v23 = vpop.permute.xlu1 %2506  ;;  %v2483_v24 = vpop.permute.xlu2 %2482 }
 0x5ec   :  { %2509 = vst.msk [vmem:[#allocation4 + $0x7] sm:$0x1] %vm2112_vm10, %v2507_v23 }
 0x5ed   :  { %2485 = vst.msk [vmem:[#allocation4 + $0x5] sm:$0x1] %vm2148_vm14, %v2483_v24 }
 0x5f1   :  { %v2514_v17 = vpop.permute.xlu0 %2513 }
 0x5f2   :  { %2516 = vst.msk [vmem:[#allocation4 + $0x7] sm:$0x1] %vm2120_vm11, %v2514_v17 }
 0x5f3   :  { %2525 = vst.msk [vmem:[#allocation4 + $0x7] sm:$0x1] %vm2130_vm12, %v2523_v13 }
 0x601   :  { %v2530_v52 = vpop.permute.xlu1 %2529 }
 0x602   :  { %2532 = vst.msk [vmem:[#allocation4 + $0x7] sm:$0x1] %vm2138_vm13, %v2530_v52 }
 0x609   :  { %v2427_v56 = vpop.permute.xlu1 %2426 }
 0x60a   :  { %2429 = vst.msk [vmem:[#allocation4 + $0x3] sm:$0x1] %vm2148_vm14, %v2427_v56 }
 0x60b   :  { %v2539_v39 = vpop.permute.xlu0 %2538 }
 0x60c   :  { %2541 = vst.msk [vmem:[#allocation4 + $0x7] sm:$0x1] %vm2148_vm14, %v2539_v39 }
 0x613   :  { %v2542_v30 = vld [vmem:[#allocation4] sm:$0xff] }
 0x614   :  { %2544 = vst [vmem:[#allocation1] ss:$4 sm:$0xff] %v2542_v30 }
 0x61b   :  { %v2545_v57 = vld.sshfl [vmem:[#allocation1] sm:$0xff pattern:$0x73625140]  ;;  %v2546_v41 = vld.sshfl [vmem:[#allocation1 + $0x8] sm:$0xff pattern:$0x73625140] }
 0x61c   :  { %v2553_v18 = vpack.c.bf16 %v2545_v57, %v2545_v57  ;;  %v2554_v58 = vpack.c.bf16 %v2546_v41, %v2546_v41  ;;  %v2547_v1 = vld.sshfl [vmem:[#allocation1 + $0x10] sm:$0xff pattern:$0x73625140]  ;;  %v2548_v10 = vld.sshfl [vmem:[#allocation1 + $0x18] sm:$0xff pattern:$0x73625140] }
 0x61d   :  { %v2555_v50 = vpack.c.bf16 %v2547_v1, %v2547_v1  ;;  %v2556_v31 = vpack.c.bf16 %v2548_v10, %v2548_v10 }
 0x61e   :  { %2822 = vmatmul.bf16.vlgmr.msrb.gmra.mxu2 %v2553_v18  ;;  %2835 = vmatmul.bf16.vlgmr.msra.gmra.mxu3 %v2554_v58 }
 0x61f   :  { %2848 = vmatmul.bf16.vlgmr.msra.gmra.mxu0 %v2555_v50 }
 0x62e   :  { %2861 = vmatmul.bf16.vlgmr.msra.gmra.mxu2 %v2556_v31 }
 0x69c   :  { %v2849_v21 = vpop.f32.mrf.mxu0 }
 0x6a1   :  { %v2823_v62 = vpop.f32.mrf.mxu2  ;;  %v2836_v63 = vpop.f32.mrf.mxu3 }
 0x6a2   :  { %v2824_v2 = vadd.f32 %v2823_v62, %v2621_v29 }
 0x6a4   :  { %v2851_v43 = vpop.f32.mrf.mxu0  ;;  %v2837_v5 = vadd.f32 %v2836_v63, %v2824_v2 }
 0x6a6   :  { %v2850_v44 = vadd.f32 %v2849_v21, %v2837_v5 }
 0x6a9   :  { %v2825_v3 = vpop.f32.mrf.mxu2  ;;  %v2838_v42 = vpop.f32.mrf.mxu3 }
 0x6b1   :  { %v2862_v46 = vpop.f32.mrf.mxu2 }
 0x6b2   :  { %v2863_v0 = vadd.f32 %v2862_v46, %v2850_v44 }
 0x6b4   :  { %v2866_v20 = vmax.f32 %v2863_v0, 0.0 }
 0x6b6   :  { %v2867_v4 = vpack.c.bf16 %v2866_v20, %v2866_v20 }
 0x6b8   :  { %3827 = vmatmul.msk.bf16.vlgmr.msrb.gmra.mxu3 %vm1331_vm6, %v2867_v4 }
 0x6b9   :  { %v2864_v59 = vpop.f32.mrf.mxu2 }
 0x73b   :  { %v2897_v7 = vpop.f32.mrf.mxu3 }
 0x73c   :  { %v2898_v15 = vadd.f32 %v2897_v7, %v2872_v6 }
 0x73e   :  { %2902 = vst.msk [vmem:[#allocation5] sm:$0x3] %vm2901_vm15, %v2898_v15 }
 0x73f   :  { %2913 = dma.vmem_to_hbm [thread:$0]  %s2909_s12, 32, %s2911_s14, [#allocation6]  }
 0x743   :  { %v2899_v34 = vpop.f32.mrf.mxu3 }
 0x744   :  { %4049 = dma.done.wait [#allocation6], 32  }
 0x745   :  { %4050 = vsyncadd [#allocation6], 4294967264 }
 0x746   :  { %2918 = vsyncpa [#allocation6], 1 }

</bundles_post_ra>
